<compile_context>
chip_gen: v6e
topology: v6e:2x2x1
jax: 0.10.0
libtpu: 0.0.40
codegen_flags: <defaults>
</compile_context>

<pallas_src>
import functools

import jax
import jax.numpy as jnp
from jax.experimental import pallas as pl
from jax.experimental.pallas import tpu as pltpu

N_INPUT = 784     # 28*28; K of the first matmul (784 = 8*98, sublane-aligned; MXU chunk-pads K itself)
H1 = 1024
H2 = 512
OUT_PAD = 128     # last layer has 1 unit; pad to a full lane width for lane-dense stores


def _round_up(x, m):
    return ((x + m - 1) // m) * m


def _pick_block_b(b, max_block_b):
    """Adaptive batch tile: tiny batches -> one grid step; big batches -> >=2 steps (2 TCs on v7x)."""
    b16 = _round_up(b, 16)                      # bf16 packs 16 rows per vreg sublane group
    if b16 <= 256:
        return min(max_block_b, b16)
    return min(max_block_b, _round_up((b16 + 1) // 2, 16))


def _disc_kernel(x_ref, w1_ref, b1_ref, w2_ref, b2_ref, w3_ref, b3_ref, o_ref):
    # Layer 1: Linear(784 -> 1024) + ReLU (bf16 operands, f32 accumulation)
    h1 = jnp.dot(x_ref[...], w1_ref[...], preferred_element_type=jnp.float32) + b1_ref[...]
    h1 = jnp.maximum(h1, 0.0).astype(jnp.bfloat16)
    # Layer 2: Linear(1024 -> 512) + ReLU
    h2 = jnp.dot(h1, w2_ref[...], preferred_element_type=jnp.float32) + b2_ref[...]
    h2 = jnp.maximum(h2, 0.0).astype(jnp.bfloat16)
    # Layer 3: Linear(512 -> 1) + Sigmoid (W3/b3 padded to 128 output lanes; only lane 0 is real)
    logits = jnp.dot(h2, w3_ref[...], preferred_element_type=jnp.float32) + b3_ref[...]
    o_ref[...] = jax.nn.sigmoid(logits).astype(o_ref.dtype)


def prepare_params(params):
    """One-time weight prep (bf16 cast, lane-pad of the 1-unit output layer). Call once, reuse."""
    w1, b1, w2, b2, w3, b3 = params
    w1p = w1.astype(jnp.bfloat16)                                                  # (784, 1024)
    w2p = w2.astype(jnp.bfloat16)                                                  # (1024, 512)
    w3p = jnp.zeros((H2, OUT_PAD), jnp.bfloat16).at[:, :1].set(w3.astype(jnp.bfloat16))
    b1p = b1.reshape(1, H1).astype(jnp.float32)
    b2p = b2.reshape(1, H2).astype(jnp.float32)
    b3p = jnp.zeros((1, OUT_PAD), jnp.float32).at[:, :1].set(b3.reshape(1, 1).astype(jnp.float32))
    return (w1p, b1p, w2p, b2p, w3p, b3p)


@functools.partial(jax.jit, static_argnames=("max_block_b",))
def discriminator_forward(x, prepared, max_block_b=512):
    """x: any shape with total elements divisible by 784 (e.g. (B,1,28,28)). prepared = prepare_params(...)."""
    assert max_block_b % 16 == 0 and max_block_b >= 16
    w1p, b1p, w2p, b2p, w3p, b3p = prepared

    x2d = x.reshape(-1, N_INPUT).astype(jnp.bfloat16)   # fuses cast into the (only) activation write
    b = x2d.shape[0]

    block_b = _pick_block_b(b, max_block_b)
    b_pad = _round_up(b, block_b)
    if b_pad != b:
        # Padded rows produce sigmoid(b3) garbage; they are sliced off below. Keep that slice!
        x2d = jnp.pad(x2d, ((0, b_pad - b), (0, 0)))

    grid = (b_pad // block_b,)
    out = pl.pallas_call(
        _disc_kernel,
        out_shape=jax.ShapeDtypeStruct((b_pad, OUT_PAD), jnp.bfloat16),
        grid_spec=pltpu.PrefetchScalarGridSpec(
            num_scalar_prefetch=0,
            grid=grid,
            in_specs=[
                pl.BlockSpec((block_b, N_INPUT), lambda i: (i, 0)),  # x tile (only block that moves)
                pl.BlockSpec((N_INPUT, H1), lambda i: (0, 0)),       # W1 (resident across the grid)
                pl.BlockSpec((1, H1), lambda i: (0, 0)),             # b1
                pl.BlockSpec((H1, H2), lambda i: (0, 0)),            # W2
                pl.BlockSpec((1, H2), lambda i: (0, 0)),             # b2
                pl.BlockSpec((H2, OUT_PAD), lambda i: (0, 0)),       # W3 (lane-padded)
                pl.BlockSpec((1, OUT_PAD), lambda i: (0, 0)),        # b3 (lane-padded)
            ],
            out_specs=pl.BlockSpec((block_b, OUT_PAD), lambda i: (i, 0)),
        ),
        compiler_params=pltpu.CompilerParams(
            dimension_semantics=("parallel",),           # shards grid steps across TCs (v7x)
            vmem_limit_bytes=32 << 20,                   # ~12 MiB actually needed at block_b=512
        ),
    )(x2d, w1p, b1p, w2p, b2p, w3p, b3p)

    # Only lane 0 and the first b rows are real.
    return out[:b, :1].astype(jnp.float32)


def init_params(key):
    """Deterministic synthetic params; shapes match torch Linear layers (stored as (in, out))."""
    k1, k2, k3, k4, k5, k6 = jax.random.split(key, 6)

    def lin(kw, kb, fan_in, fan_out):
        bound = 1.0 / jnp.sqrt(fan_in)
        w = jax.random.uniform(kw, (fan_in, fan_out), jnp.float32, -bound, bound)
        b = jax.random.uniform(kb, (1, fan_out), jnp.float32, -bound, bound)
        return w, b

    w1, b1 = lin(k1, k2, N_INPUT, H1)
    w2, b2 = lin(k3, k4, H1, H2)
    w3, b3 = lin(k5, k6, H2, 1)
    return (w1, b1, w2, b2, w3, b3)


def _reference(x, params):
    w1, b1, w2, b2, w3, b3 = params
    h = x.reshape(-1, N_INPUT).astype(jnp.float32)
    h = jnp.maximum(h @ w1 + b1, 0.0)
    h = jnp.maximum(h @ w2 + b2, 0.0)
    return jax.nn.sigmoid(h @ w3 + b3)


if __name__ == "__main__":
    key = jax.random.PRNGKey(0)
    kp, kx = jax.random.split(key)
    params = init_params(kp)
    prepared = jax.block_until_ready(prepare_params(params))   # one-time weight prep (hoisted)

    # 1) Small MNIST-like batch: (B, 1, 28, 28) -> view(-1, 784). Single-step grid path.
    x = jax.random.normal(kx, (8, 1, 28, 28), jnp.float32)
    out = jax.block_until_ready(discriminator_forward(x, prepared))
    ref = _reference(x, params)
    assert out.shape == (8, 1), out.shape
    # bf16 weights/activations/output -> loosen tolerance vs. the f32 reference.
    assert jnp.allclose(out, ref, atol=2e-2, rtol=2e-2), float(jnp.max(jnp.abs(out - ref)))

    # 2) Multi-step pipelined grid path (forced small tile: 40 rows -> block 16, grid = 3).
    x2 = jax.random.normal(jax.random.PRNGKey(1), (40, 1, 28, 28), jnp.float32)
    out2 = jax.block_until_ready(discriminator_forward(x2, prepared, max_block_b=16))
    ref2 = _reference(x2, params)
    assert out2.shape == (40, 1), out2.shape
    assert jnp.allclose(out2, ref2, atol=2e-2, rtol=2e-2), float(jnp.max(jnp.abs(out2 - ref2)))

    # 3) Medium batch (>256 rows): batch is split into >=2 'parallel' grid steps (2 TCs on v7x).
    x3 = jax.random.normal(jax.random.PRNGKey(2), (320, 784), jnp.float32)
    out3 = jax.block_until_ready(discriminator_forward(x3, prepared))
    ref3 = _reference(x3, params)
    assert out3.shape == (320, 1), out3.shape
    assert jnp.allclose(out3, ref3, atol=2e-2, rtol=2e-2), float(jnp.max(jnp.abs(out3 - ref3)))

    print("KERNEL_OK")
</pallas_src>

<mosaic_0001>
module attributes {stable_mosaic.version = 11 : i64} {
  func.func @_disc_kernel(%arg0: i32, %arg1: memref<16x784xbf16, #tpu.memory_space<vmem>>, %arg2: memref<784x1024xbf16, #tpu.memory_space<vmem>>, %arg3: memref<1x1024xf32, #tpu.memory_space<vmem>>, %arg4: memref<1024x512xbf16, #tpu.memory_space<vmem>>, %arg5: memref<1x512xf32, #tpu.memory_space<vmem>>, %arg6: memref<512x128xbf16, #tpu.memory_space<vmem>>, %arg7: memref<1x128xf32, #tpu.memory_space<vmem>>, %arg8: memref<16x128xbf16, #tpu.memory_space<vmem>>) attributes {dimension_semantics = [#tpu.dimension_semantics<parallel>], iteration_bounds = array<i64: 1>, scalar_prefetch = 0 : i64, scratch_operands = 0 : i64, tpu.core_type = #tpu.core_type<tc>, window_params = [{transform_indices = @transform_0, window_bounds = array<i64: 16, 784>}, {pipeline_mode = #tpu.pipeline_mode<synchronous>, transform_indices = @transform_1, window_bounds = array<i64: 784, 1024>}, {pipeline_mode = #tpu.pipeline_mode<synchronous>, transform_indices = @transform_2, window_bounds = array<i64: 1, 1024>}, {pipeline_mode = #tpu.pipeline_mode<synchronous>, transform_indices = @transform_3, window_bounds = array<i64: 1024, 512>}, {pipeline_mode = #tpu.pipeline_mode<synchronous>, transform_indices = @transform_4, window_bounds = array<i64: 1, 512>}, {pipeline_mode = #tpu.pipeline_mode<synchronous>, transform_indices = @transform_5, window_bounds = array<i64: 512, 128>}, {pipeline_mode = #tpu.pipeline_mode<synchronous>, transform_indices = @transform_6, window_bounds = array<i64: 1, 128>}, {transform_indices = @transform_7, window_bounds = array<i64: 16, 128>}]} {
    %c0 = arith.constant 0 : index
    %c0_0 = arith.constant 0 : index
    %0 = vector.load %arg1[%c0, %c0_0] : memref<16x784xbf16, #tpu.memory_space<vmem>>, vector<16x784xbf16>
    %c0_1 = arith.constant 0 : index
    %c0_2 = arith.constant 0 : index
    %1 = vector.load %arg2[%c0_1, %c0_2] : memref<784x1024xbf16, #tpu.memory_space<vmem>>, vector<784x1024xbf16>
    %cst = arith.constant dense<0.000000e+00> : vector<16x1024xf32>
    %2 = tpu.matmul %0, %1, %cst {dimension_numbers = #tpu.dot_dimension_numbers<[1], [0], [0], [1], [0, 0, 1, 1], [], []>} : vector<16x784xbf16>, vector<784x1024xbf16>, vector<16x1024xf32> -> vector<16x1024xf32>
    %c0_3 = arith.constant 0 : index
    %c0_4 = arith.constant 0 : index
    %3 = vector.load %arg3[%c0_3, %c0_4] : memref<1x1024xf32, #tpu.memory_space<vmem>>, vector<1x1024xf32>
    %4 = vector.broadcast %3 : vector<1x1024xf32> to vector<16x1024xf32>
    %5 = arith.addf %2, %4 : vector<16x1024xf32>
    %cst_5 = arith.constant 0.000000e+00 : f32
    %6 = vector.broadcast %cst_5 : f32 to vector<16x1024xf32>
    %7 = arith.maximumf %5, %6 : vector<16x1024xf32>
    %8 = arith.truncf %7 : vector<16x1024xf32> to vector<16x1024xbf16>
    %c0_6 = arith.constant 0 : index
    %c0_7 = arith.constant 0 : index
    %9 = vector.load %arg4[%c0_6, %c0_7] : memref<1024x512xbf16, #tpu.memory_space<vmem>>, vector<1024x512xbf16>
    %cst_8 = arith.constant dense<0.000000e+00> : vector<16x512xf32>
    %10 = tpu.matmul %8, %9, %cst_8 {dimension_numbers = #tpu.dot_dimension_numbers<[1], [0], [0], [1], [0, 0, 1, 1], [], []>} : vector<16x1024xbf16>, vector<1024x512xbf16>, vector<16x512xf32> -> vector<16x512xf32>
    %c0_9 = arith.constant 0 : index
    %c0_10 = arith.constant 0 : index
    %11 = vector.load %arg5[%c0_9, %c0_10] : memref<1x512xf32, #tpu.memory_space<vmem>>, vector<1x512xf32>
    %12 = vector.broadcast %11 : vector<1x512xf32> to vector<16x512xf32>
    %13 = arith.addf %10, %12 : vector<16x512xf32>
    %cst_11 = arith.constant 0.000000e+00 : f32
    %14 = vector.broadcast %cst_11 : f32 to vector<16x512xf32>
    %15 = arith.maximumf %13, %14 : vector<16x512xf32>
    %16 = arith.truncf %15 : vector<16x512xf32> to vector<16x512xbf16>
    %c0_12 = arith.constant 0 : index
    %c0_13 = arith.constant 0 : index
    %17 = vector.load %arg6[%c0_12, %c0_13] : memref<512x128xbf16, #tpu.memory_space<vmem>>, vector<512x128xbf16>
    %cst_14 = arith.constant dense<0.000000e+00> : vector<16x128xf32>
    %18 = tpu.matmul %16, %17, %cst_14 {dimension_numbers = #tpu.dot_dimension_numbers<[1], [0], [0], [1], [0, 0, 1, 1], [], []>} : vector<16x512xbf16>, vector<512x128xbf16>, vector<16x128xf32> -> vector<16x128xf32>
    %c0_15 = arith.constant 0 : index
    %c0_16 = arith.constant 0 : index
    %19 = vector.load %arg7[%c0_15, %c0_16] : memref<1x128xf32, #tpu.memory_space<vmem>>, vector<1x128xf32>
    %20 = vector.broadcast %19 : vector<1x128xf32> to vector<16x128xf32>
    %21 = arith.addf %18, %20 : vector<16x128xf32>
    %22 = arith.negf %21 : vector<16x128xf32>
    %23 = math.exp %22 : vector<16x128xf32>
    %cst_17 = arith.constant 1.000000e+00 : f32
    %24 = vector.broadcast %cst_17 : f32 to vector<16x128xf32>
    %25 = arith.addf %24, %23 : vector<16x128xf32>
    %26 = arith.divf %24, %25 : vector<16x128xf32>
    %27 = arith.truncf %26 : vector<16x128xf32> to vector<16x128xbf16>
    %c0_18 = arith.constant 0 : index
    %c0_19 = arith.constant 0 : index
    %28 = vector.load %arg8[%c0_18, %c0_19] : memref<16x128xbf16, #tpu.memory_space<vmem>>, vector<16x128xbf16>
    tpu.vector_store %arg8[%c0_18, %c0_19], %27 {strides = array<i32>} : memref<16x128xbf16, #tpu.memory_space<vmem>>, vector<16x128xbf16>,
    return
  }
  func.func @transform_0(%arg0: i32) -> (i32, i32) {
    %c0_i32 = arith.constant 0 : i32
    %c0_i32_0 = arith.constant 0 : i32
    return %arg0, %c0_i32 : i32, i32
  }
  func.func @transform_1(%arg0: i32) -> (i32, i32) {
    %c0_i32 = arith.constant 0 : i32
    %c0_i32_0 = arith.constant 0 : i32
    %c0_i32_1 = arith.constant 0 : i32
    return %c0_i32, %c0_i32_0 : i32, i32
  }
  func.func @transform_2(%arg0: i32) -> (i32, i32) {
    %c0_i32 = arith.constant 0 : i32
    %c0_i32_0 = arith.constant 0 : i32
    %c0_i32_1 = arith.constant 0 : i32
    return %c0_i32, %c0_i32_0 : i32, i32
  }
  func.func @transform_3(%arg0: i32) -> (i32, i32) {
    %c0_i32 = arith.constant 0 : i32
    %c0_i32_0 = arith.constant 0 : i32
    %c0_i32_1 = arith.constant 0 : i32
    return %c0_i32, %c0_i32_0 : i32, i32
  }
  func.func @transform_4(%arg0: i32) -> (i32, i32) {
    %c0_i32 = arith.constant 0 : i32
    %c0_i32_0 = arith.constant 0 : i32
    %c0_i32_1 = arith.constant 0 : i32
    return %c0_i32, %c0_i32_0 : i32, i32
  }
  func.func @transform_5(%arg0: i32) -> (i32, i32) {
    %c0_i32 = arith.constant 0 : i32
    %c0_i32_0 = arith.constant 0 : i32
    %c0_i32_1 = arith.constant 0 : i32
    return %c0_i32, %c0_i32_0 : i32, i32
  }
  func.func @transform_6(%arg0: i32) -> (i32, i32) {
    %c0_i32 = arith.constant 0 : i32
    %c0_i32_0 = arith.constant 0 : i32
    %c0_i32_1 = arith.constant 0 : i32
    return %c0_i32, %c0_i32_0 : i32, i32
  }
  func.func @transform_7(%arg0: i32) -> (i32, i32) {
    %c0_i32 = arith.constant 0 : i32
    %c0_i32_0 = arith.constant 0 : i32
    return %arg0, %c0_i32 : i32, i32
  }
}

</mosaic_0001>

<bundles_post_ra>
// kernel: discriminator_forward.1
= control target key start
LH: loop header
LB: loop body
LE: loop exit
PB: predicated region body
PF: predicated region fallthrough
CT: control target
= control target key end

     0   :  { %12 = vsyncpa [#allocation3], 0  ;;  %s7180_s0 = inlined_call_operand.vmem [shape: bf16[16,784], index: 0, kind: input, shape index: {}]   ;;  %s7181_s1 = inlined_call_operand.hbm [shape: bf16[784,1024], index: 1, kind: input, shape index: {}]   ;;  %s7182_s2 = inlined_call_operand.hbm [shape: f32[1,1024], index: 2, kind: input, shape index: {}]   ;;  %s7183_s3 = inlined_call_operand.hbm [shape: bf16[1024,512], index: 3, kind: input, shape index: {}]   ;;  %s7184_s4 = inlined_call_operand.hbm [shape: f32[1,512], index: 4, kind: input, shape index: {}]   ;;  %s7185_s5 = inlined_call_operand.hbm [shape: bf16[512,128], index: 5, kind: input, shape index: {}]   ;;  %s7186_s6 = inlined_call_operand.hbm [shape: f32[1,128], index: 6, kind: input, shape index: {}]   ;;  %s7187_s7 = inlined_call_operand.vmem [shape: bf16[16,128], index: 7, kind: output, shape index: {}]  }
   0x1   :  { %13 = vsyncpa [#allocation5], 0 }
   0x2   :  { %14 = vsyncpa [#allocation8], 0 }
   0x3   :  { %15 = vsyncpa [#allocation11], 0  ;;  %s6877_s24 = smov [#allocation4]   ;;  %s6878_s26 = smov [#allocation7]  }
   0x4   :  { %s36_s25 = sshll.u32 %s6877_s24, 4  ;;  %s58_s27 = sshll.u32 %s6878_s26, 4  ;;  %s37_s25 = int_to_ptr.vmem [resolvable:$true] %s36_s25  ;;  %s59_s27 = int_to_ptr.vmem [resolvable:$true] %s58_s27 }
   0x5   :  { %s6757_s28 = scalar_lea.vmem %s37_s25, 128  ;;  %p6762_p1 = scmp.lt.s32.totalorder %s37_s25, %s37_s25 }
   0x6   :  { %p6758_p0 = scmp.ne.s32.totalorder %s37_s25, %s6757_s28  ;;  %p6763_p2 = scmp.lt.s32.totalorder %s6757_s28, %s6757_s28 }
   0x8   :  { %p6764_p3 = por %p6763_p2, %p6762_p1 }
   0xa   :  { %p6765_p4 = pnand %p6764_p3, %p6758_p0 }
   0xc   :  { %6768 = shalt.err (!%p6765_p4)
}
   0xd   :  { %39 = dma.hbm_to_vmem [thread:$0]  %s7182_s2, 128, %s37_s25, [#allocation5]  }
   0xe   :  { %s6777_s8 = scalar_lea.vmem %s59_s27, 64  ;;  %p6782_p6 = scmp.lt.s32.totalorder %s59_s27, %s59_s27 }
   0xf   :  { %p6778_p5 = scmp.ne.s32.totalorder %s59_s27, %s6777_s8  ;;  %p6783_p7 = scmp.lt.s32.totalorder %s6777_s8, %s6777_s8 }
  0x11   :  { %p6784_p8 = por %p6783_p7, %p6782_p6 }
  0x13   :  { %p6785_p9 = pnand %p6784_p8, %p6778_p5 }
  0x15   :  { %6788 = shalt.err (!%p6785_p9)
}
  0x16   :  { %61 = dma.hbm_to_vmem [thread:$0]  %s7184_s4, 64, %s59_s27, [#allocation8]  }
  0x17   :  { %s6879_s11 = smov [#allocation2]  }
  0x18   :  { %s23_s12 = sshll.u32 %s6879_s11, 4  ;;  %s24_s12 = int_to_ptr.vmem [resolvable:$true] %s23_s12 }
  0x19   :  { %s6797_s13 = scalar_lea.vmem %s24_s12, 50176  ;;  %p6802_p11 = scmp.lt.s32.totalorder %s24_s12, %s24_s12 }
  0x1a   :  { %p6798_p10 = scmp.ne.s32.totalorder %s24_s12, %s6797_s13  ;;  %p6803_p12 = scmp.lt.s32.totalorder %s6797_s13, %s6797_s13 }
  0x1c   :  { %p6804_p13 = por %p6803_p12, %p6802_p11 }
  0x1e   :  { %p6805_p0 = pnand %p6804_p13, %p6798_p10 }
  0x20   :  { %6808 = shalt.err (!%p6805_p0)
}
  0x21   :  { %s6880_s2 = smov 512   ;;  %s6881_s14 = smov 32  }
  0x22   :  { %29 = dma.hbm_to_vmem [thread:$0]  %s7181_s1, 50176, %s24_s12, [#allocation3], %s6880_s2, %s6880_s2, %s6881_s14  }
  0x23   :  { %s6882_s17 = smov [#allocation6]  }
  0x24   :  { %s45_s18 = sshll.u32 %s6882_s17, 4  ;;  %s46_s18 = int_to_ptr.vmem [resolvable:$true] %s45_s18 }
  0x25   :  { %s6817_s4 = scalar_lea.vmem %s46_s18, 32768  ;;  %p6822_p2 = scmp.lt.s32.totalorder %s46_s18, %s46_s18 }
  0x26   :  { %p6818_p1 = scmp.ne.s32.totalorder %s46_s18, %s6817_s4  ;;  %p6823_p3 = scmp.lt.s32.totalorder %s6817_s4, %s6817_s4 }
  0x28   :  { %p6824_p4 = por %p6823_p3, %p6822_p2 }
  0x2a   :  { %p6825_p5 = pnand %p6824_p4, %p6818_p1 }
  0x2c   :  { %6828 = shalt.err (!%p6825_p5)
}
  0x2d   :  { %s6883_s19 = smov 256   ;;  %s6884_s20 = smov 16  }
  0x2e   :  { %51 = dma.hbm_to_vmem [thread:$0]  %s7183_s3, 32768, %s46_s18, [#allocation5], %s6883_s19, %s6883_s19, %s6884_s20  }
  0x2f   :  { %s6885_s23 = smov [#allocation9]  }
  0x30   :  { %s67_s24 = sshll.u32 %s6885_s23, 4  ;;  %s68_s24 = int_to_ptr.vmem [resolvable:$true] %s67_s24 }
  0x31   :  { %s6837_s1 = scalar_lea.vmem %s68_s24, 4096  ;;  %p6842_p7 = scmp.lt.s32.totalorder %s68_s24, %s68_s24 }
  0x32   :  { %p6838_p6 = scmp.ne.s32.totalorder %s68_s24, %s6837_s1  ;;  %p6843_p8 = scmp.lt.s32.totalorder %s6837_s1, %s6837_s1 }
  0x34   :  { %p6844_p9 = por %p6843_p8, %p6842_p7 }
  0x36   :  { %p6845_p10 = pnand %p6844_p9, %p6838_p6 }
  0x38   :  { %6848 = shalt.err (!%p6845_p10)
}
  0x39   :  { %s6886_s25 = smov 64   ;;  %s6887_s26 = smov 4  }
  0x3a   :  { %73 = dma.hbm_to_vmem [thread:$0]  %s7185_s5, 4096, %s68_s24, [#allocation8], %s6886_s25, %s6886_s25, %s6887_s26  }
  0x3b   :  { %s6888_s29 = smov [#allocation10]  }
  0x3c   :  { %s80_s30 = sshll.u32 %s6888_s29, 4  ;;  %s81_s30 = int_to_ptr.vmem [resolvable:$true] %s80_s30 }
  0x3d   :  { %s6857_s3 = scalar_lea.vmem %s81_s30, 16  ;;  %s6861_s8 = scalar_lea.vmem %s81_s30, 32 }
  0x3e   :  { %p6858_p11 = scmp.ne.s32.totalorder %s81_s30, %s6857_s3  ;;  %p6862_p12 = scmp.lt.s32.totalorder %s81_s30, %s81_s30 }
  0x3f   :  { %p6863_p13 = scmp.lt.s32.totalorder %s6861_s8, %s6857_s3 }
  0x41   :  { %p6864_p0 = por %p6863_p13, %p6862_p12 }
  0x43   :  { %p6865_p1 = pnand %p6864_p0, %p6858_p11 }
  0x45   :  { %6868 = shalt.err (!%p6865_p1)
}
  0x46   :  { %83 = dma.hbm_to_vmem [thread:$0]  %s7186_s6, 16, %s81_s30, [#allocation11]  }
  0x47   :  { %6869 = dma.done.wait [#allocation3], 50176  }
  0x48   :  { %6870 = vsyncadd [#allocation3], 4294917120 }
  0x49   :  { %6871 = dma.done.wait [#allocation5], 32896  }
  0x4a   :  { %6872 = vsyncadd [#allocation5], 4294934400 }
  0x4b   :  { %6873 = dma.done.wait [#allocation8], 4160  }
  0x4c   :  { %6874 = vsyncadd [#allocation8], 4294963136 }
  0x4d   :  { %6875 = dma.done.wait [#allocation11], 16  }
  0x4e   :  { %6876 = vsyncadd [#allocation11], 4294967280  ;;  %v167_v0 = vld [vmem:[#allocation2 + $0x1c0] sm:$0xff]  ;;  %v6956_v59 = vld [vmem:[%s7180_s0 + $0xc] ss:$28 sps:$4 sm:$0xff]   ;;  %vm2540_vm0 = vcmask 130048  }
  0x4f   :  { %v171_v1 = vld [vmem:[#allocation2 + $0x1e0] sm:$0xff]  ;;  %2619 = vmatprep.mubr.bf16.mxu1 %v6956_v59 }
  0x50   :  { %v295_v2 = vld [vmem:[#allocation2 + $0x5c0] sm:$0xff]  ;;  %v5609_v3 = vcombine.high %v167_v0, %v171_v1  ;;  %v5608_v5 = vcombine.low %v167_v0, %v171_v1 }
  0x51   :  { %v299_v4 = vld [vmem:[#allocation2 + $0x5e0] sm:$0xff] }
  0x52   :  { %v159_v6 = vld [vmem:[#allocation2 + $0x180] sm:$0xff]  ;;  %v5737_v8 = vcombine.high %v295_v2, %v299_v4  ;;  %v5736_v9 = vcombine.low %v295_v2, %v299_v4  ;;  %2544 = vmatprep.subr.bf16.mxu0 %v5609_v3 }
  0x53   :  { %v163_v7 = vld [vmem:[#allocation2 + $0x1a0] sm:$0xff]  ;;  %2545 = vmatpush1.bf16.msra.mxu0 %v5608_v5 }
  0x54   :  { %v5601_v10 = vcombine.high %v159_v6, %v163_v7  ;;  %v287_v11 = vld [vmem:[#allocation2 + $0x580] sm:$0xff]  ;;  %2587 = vmatprep.subr.bf16.mxu1 %v5737_v8  ;;  %v5600_v18 = vcombine.low %v159_v6, %v163_v7 }
  0x55   :  { %v291_v12 = vld [vmem:[#allocation2 + $0x5a0] sm:$0xff]  ;;  %2588 = vmatpush1.bf16.msra.mxu1 %v5736_v9 }
  0x56   :  { %v151_v13 = vld [vmem:[#allocation2 + $0x140] sm:$0xff]  ;;  %v5729_v14 = vcombine.high %v287_v11, %v291_v12  ;;  %2546 = vmatprep.subr.bf16.mxu0 %v5601_v10  ;;  %v5728_v19 = vcombine.low %v287_v11, %v291_v12 }
  0x57   :  { %v155_v15 = vld [vmem:[#allocation2 + $0x160] sm:$0xff]  ;;  %2547 = vmatpush1.bf16.msra.mxu0 %v5600_v18 }
  0x58   :  { %v279_v16 = vld [vmem:[#allocation2 + $0x540] sm:$0xff]  ;;  %v5593_v20 = vcombine.high %v151_v13, %v155_v15  ;;  %2589 = vmatprep.subr.bf16.mxu1 %v5729_v14  ;;  %v5592_v26 = vcombine.low %v151_v13, %v155_v15 }
  0x59   :  { %v283_v17 = vld [vmem:[#allocation2 + $0x560] sm:$0xff]  ;;  %2590 = vmatpush1.bf16.msra.mxu1 %v5728_v19 }
  0x5a   :  { %v5721_v21 = vcombine.high %v279_v16, %v283_v17  ;;  %v143_v22 = vld [vmem:[#allocation2 + $0x100] sm:$0xff]  ;;  %2548 = vmatprep.subr.bf16.mxu0 %v5593_v20  ;;  %v5720_v27 = vcombine.low %v279_v16, %v283_v17 }
  0x5b   :  { %v147_v23 = vld [vmem:[#allocation2 + $0x120] sm:$0xff]  ;;  %2549 = vmatpush1.bf16.msra.mxu0 %v5592_v26 }
  0x5c   :  { %v271_v24 = vld [vmem:[#allocation2 + $0x500] sm:$0xff]  ;;  %v5585_v28 = vcombine.high %v143_v22, %v147_v23  ;;  %2591 = vmatprep.subr.bf16.mxu1 %v5721_v21  ;;  %v5584_v34 = vcombine.low %v143_v22, %v147_v23 }
  0x5d   :  { %v275_v25 = vld [vmem:[#allocation2 + $0x520] sm:$0xff]  ;;  %2592 = vmatpush1.bf16.msra.mxu1 %v5720_v27 }
  0x5e   :  { %v5713_v29 = vcombine.high %v271_v24, %v275_v25  ;;  %v135_v30 = vld [vmem:[#allocation2 + $0xc0] sm:$0xff]  ;;  %2550 = vmatprep.subr.bf16.mxu0 %v5585_v28  ;;  %v5712_v35 = vcombine.low %v271_v24, %v275_v25 }
  0x5f   :  { %v139_v31 = vld [vmem:[#allocation2 + $0xe0] sm:$0xff]  ;;  %2551 = vmatpush1.bf16.msra.mxu0 %v5584_v34 }
  0x60   :  { %v263_v32 = vld [vmem:[#allocation2 + $0x4c0] sm:$0xff]  ;;  %v5577_v36 = vcombine.high %v135_v30, %v139_v31  ;;  %2593 = vmatprep.subr.bf16.mxu1 %v5713_v29  ;;  %v5576_v42 = vcombine.low %v135_v30, %v139_v31 }
  0x61   :  { %v267_v33 = vld [vmem:[#allocation2 + $0x4e0] sm:$0xff]  ;;  %2594 = vmatpush1.bf16.msra.mxu1 %v5712_v35 }
  0x62   :  { %v5705_v37 = vcombine.high %v263_v32, %v267_v33  ;;  %v127_v38 = vld [vmem:[#allocation2 + $0x80] sm:$0xff]  ;;  %2552 = vmatprep.subr.bf16.mxu0 %v5577_v36  ;;  %v5704_v43 = vcombine.low %v263_v32, %v267_v33 }
  0x63   :  { %v131_v39 = vld [vmem:[#allocation2 + $0xa0] sm:$0xff]  ;;  %2553 = vmatpush1.bf16.msra.mxu0 %v5576_v42 }
  0x64   :  { %v255_v40 = vld [vmem:[#allocation2 + $0x480] sm:$0xff]  ;;  %v5569_v44 = vcombine.high %v127_v38, %v131_v39  ;;  %2595 = vmatprep.subr.bf16.mxu1 %v5705_v37  ;;  %v5568_v50 = vcombine.low %v127_v38, %v131_v39 }
  0x65   :  { %v259_v41 = vld [vmem:[#allocation2 + $0x4a0] sm:$0xff]  ;;  %2596 = vmatpush1.bf16.msra.mxu1 %v5704_v43 }
  0x66   :  { %v5697_v45 = vcombine.high %v255_v40, %v259_v41  ;;  %v119_v46 = vld [vmem:[#allocation2 + $0x40] sm:$0xff]  ;;  %2554 = vmatprep.subr.bf16.mxu0 %v5569_v44  ;;  %v5696_v52 = vcombine.low %v255_v40, %v259_v41 }
  0x67   :  { %v123_v47 = vld [vmem:[#allocation2 + $0x60] sm:$0xff]  ;;  %2555 = vmatpush1.bf16.msra.mxu0 %v5568_v50 }
  0x68   :  { %v247_v48 = vld [vmem:[#allocation2 + $0x440] sm:$0xff]  ;;  %v5561_v53 = vcombine.high %v119_v46, %v123_v47  ;;  %2597 = vmatprep.subr.bf16.mxu1 %v5697_v45  ;;  %v5560_v60 = vcombine.low %v119_v46, %v123_v47 }
  0x69   :  { %v251_v49 = vld [vmem:[#allocation2 + $0x460] sm:$0xff]  ;;  %2598 = vmatpush1.bf16.msra.mxu1 %v5696_v52 }
  0x6a   :  { %v111_v51 = vld [vmem:[#allocation2] sm:$0xff]  ;;  %v5689_v55 = vcombine.high %v247_v48, %v251_v49  ;;  %2556 = vmatprep.subr.bf16.mxu0 %v5561_v53  ;;  %v5688_v61 = vcombine.low %v247_v48, %v251_v49 }
  0x6b   :  { %v115_v54 = vld [vmem:[#allocation2 + $0x20] sm:$0xff]  ;;  %2557 = vmatpush1.bf16.msra.mxu0 %v5560_v60 }
  0x6c   :  { %v6951_v56 = vld [vmem:[%s7180_s0 + $0x4] ss:$28 sps:$4 sm:$0xff]   ;;  %v5553_v62 = vcombine.high %v111_v51, %v115_v54  ;;  %2599 = vmatprep.subr.bf16.mxu1 %v5689_v55  ;;  %v5552_v4 = vcombine.low %v111_v51, %v115_v54 }
  0x6d   :  { %v239_v57 = vld [vmem:[#allocation2 + $0x400] sm:$0xff]  ;;  %2576 = vmatprep.mubr.bf16.mxu0 %v6951_v56  ;;  %2600 = vmatpush1.bf16.msra.mxu1 %v5688_v61 }
  0x6e   :  { %v243_v58 = vld [vmem:[#allocation2 + $0x420] sm:$0xff]  ;;  %2558 = vmatprep.subr.bf16.mxu0 %v5553_v62 }
  0x6f   :  { %v5681_v63 = vcombine.high %v239_v57, %v243_v58  ;;  %v231_v0 = vld [vmem:[#allocation2 + $0x3c0] sm:$0xff]  ;;  %v5680_v5 = vcombine.low %v239_v57, %v243_v58  ;;  %2559 = vmatpush1.bf16.msra.mxu0 %v5552_v4 }
  0x70   :  { %v235_v1 = vld [vmem:[#allocation2 + $0x3e0] sm:$0xff] }
  0x71   :  { %v359_v2 = vld [vmem:[#allocation2 + $0x7c0] sm:$0xff]  ;;  %v5673_v6 = vcombine.high %v231_v0, %v235_v1  ;;  %2601 = vmatprep.subr.bf16.mxu1 %v5681_v63  ;;  %v5672_v12 = vcombine.low %v231_v0, %v235_v1 }
  0x72   :  { %v363_v3 = vld [vmem:[#allocation2 + $0x7e0] sm:$0xff]  ;;  %2602 = vmatpush1.bf16.msra.mxu1 %v5680_v5 }
  0x73   :  { %v5801_v7 = vcombine.high %v359_v2, %v363_v3  ;;  %v223_v8 = vld [vmem:[#allocation2 + $0x380] sm:$0xff]  ;;  %2560 = vmatprep.subr.bf16.mxu0 %v5673_v6  ;;  %v5800_v13 = vcombine.low %v359_v2, %v363_v3 }
  0x74   :  { %v227_v9 = vld [vmem:[#allocation2 + $0x3a0] sm:$0xff]  ;;  %2561 = vmatpush2.bf16.msra.mxu0 %v5672_v12 }
  0x75   :  { %v351_v10 = vld [vmem:[#allocation2 + $0x780] sm:$0xff]  ;;  %v5665_v14 = vcombine.high %v223_v8, %v227_v9  ;;  %2603 = vmatprep.subr.bf16.mxu1 %v5801_v7  ;;  %v5664_v20 = vcombine.low %v223_v8, %v227_v9 }
  0x76   :  { %v355_v11 = vld [vmem:[#allocation2 + $0x7a0] sm:$0xff]  ;;  %2604 = vmatpush2.bf16.msra.mxu1 %v5800_v13  ;;  %v168_v13 = vld [vmem:[#allocation2 + $0x1c8] sm:$0xff] }
  0x77   :  { %v5793_v15 = vcombine.high %v351_v10, %v355_v11  ;;  %v215_v16 = vld [vmem:[#allocation2 + $0x340] sm:$0xff]  ;;  %2562 = vmatprep.subr.bf16.mxu0 %v5665_v14  ;;  %v5792_v21 = vcombine.low %v351_v10, %v355_v11  ;;  %v172_v14 = vld [vmem:[#allocation2 + $0x1e8] sm:$0xff] }
  0x78   :  { %v219_v17 = vld [vmem:[#allocation2 + $0x360] sm:$0xff]  ;;  %2563 = vmatpush2.bf16.msra.mxu0 %v5664_v20 }
  0x79   :  { %v343_v18 = vld [vmem:[#allocation2 + $0x740] sm:$0xff]  ;;  %v5657_v22 = vcombine.high %v215_v16, %v219_v17  ;;  %2605 = vmatprep.subr.bf16.mxu1 %v5793_v15  ;;  %v5656_v28 = vcombine.low %v215_v16, %v219_v17 }
  0x7a   :  { %v347_v19 = vld [vmem:[#allocation2 + $0x760] sm:$0xff]  ;;  %2606 = vmatpush2.bf16.msra.mxu1 %v5792_v21 }
  0x7b   :  { %v5785_v23 = vcombine.high %v343_v18, %v347_v19  ;;  %v207_v24 = vld [vmem:[#allocation2 + $0x300] sm:$0xff]  ;;  %2564 = vmatprep.subr.bf16.mxu0 %v5657_v22  ;;  %v5784_v29 = vcombine.low %v343_v18, %v347_v19  ;;  %v5611_v19 = vcombine.high %v168_v13, %v172_v14  ;;  %v6972_v22 = vld [vmem:[%s7180_s0 + $0x14] ss:$28 sps:$4 sm:$0xff]  }
  0x7c   :  { %v211_v25 = vld [vmem:[#allocation2 + $0x320] sm:$0xff]  ;;  %2565 = vmatpush2.bf16.msra.mxu0 %v5656_v28  ;;  %v6889_v28 = vmov 0  }
  0x7d   :  { %v335_v26 = vld [vmem:[#allocation2 + $0x700] sm:$0xff]  ;;  %v5649_v30 = vcombine.high %v207_v24, %v211_v25  ;;  %2607 = vmatprep.subr.bf16.mxu1 %v5785_v23  ;;  %v5648_v36 = vcombine.low %v207_v24, %v211_v25  ;;  %v160_v25 = vld [vmem:[#allocation2 + $0x188] sm:$0xff] }
  0x7e   :  { %v339_v27 = vld [vmem:[#allocation2 + $0x720] sm:$0xff]  ;;  %2608 = vmatpush2.bf16.msra.mxu1 %v5784_v29  ;;  %v6311_v29 = vld [vmem:[%s7180_s0 + $0x18] ss:$28 sps:$4 sm:$0xff]  }
  0x7f   :  { %v5777_v31 = vcombine.high %v335_v26, %v339_v27  ;;  %v199_v32 = vld [vmem:[#allocation2 + $0x2c0] sm:$0xff]  ;;  %2566 = vmatprep.subr.bf16.mxu0 %v5649_v30  ;;  %v5776_v37 = vcombine.low %v335_v26, %v339_v27  ;;  %v164_v26 = vld [vmem:[#allocation2 + $0x1a8] sm:$0xff] }
  0x80   :  { %v203_v33 = vld [vmem:[#allocation2 + $0x2e0] sm:$0xff]  ;;  %2567 = vmatpush2.bf16.msra.mxu0 %v5648_v36 }
  0x81   :  { %v327_v34 = vld [vmem:[#allocation2 + $0x6c0] sm:$0xff]  ;;  %v5641_v38 = vcombine.high %v199_v32, %v203_v33  ;;  %2609 = vmatprep.subr.bf16.mxu1 %v5777_v31  ;;  %v5640_v44 = vcombine.low %v199_v32, %v203_v33  ;;  %v5610_v32 = vcombine.low %v168_v13, %v172_v14  ;;  %v116_v13 = vld [vmem:[#allocation2 + $0x28] sm:$0xff] }
  0x82   :  { %v331_v35 = vld [vmem:[#allocation2 + $0x6e0] sm:$0xff]  ;;  %2610 = vmatpush2.bf16.msra.mxu1 %v5776_v37  ;;  %v5603_v37 = vcombine.high %v160_v25, %v164_v26 }
  0x83   :  { %v5769_v39 = vcombine.high %v327_v34, %v331_v35  ;;  %v191_v40 = vld [vmem:[#allocation2 + $0x280] sm:$0xff]  ;;  %2568 = vmatprep.subr.bf16.mxu0 %v5641_v38  ;;  %v5768_v45 = vcombine.low %v327_v34, %v331_v35  ;;  %v152_v34 = vld [vmem:[#allocation2 + $0x148] sm:$0xff] }
  0x84   :  { %v195_v41 = vld [vmem:[#allocation2 + $0x2a0] sm:$0xff]  ;;  %2569 = vmatpush2.bf16.msra.mxu0 %v5640_v44  ;;  %v156_v35 = vld [vmem:[#allocation2 + $0x168] sm:$0xff] }
  0x85   :  { %v319_v42 = vld [vmem:[#allocation2 + $0x680] sm:$0xff]  ;;  %v5633_v46 = vcombine.high %v191_v40, %v195_v41  ;;  %2611 = vmatprep.subr.bf16.mxu1 %v5769_v39  ;;  %v5632_v52 = vcombine.low %v191_v40, %v195_v41  ;;  %v5602_v40 = vcombine.low %v160_v25, %v164_v26 }
  0x86   :  { %v323_v43 = vld [vmem:[#allocation2 + $0x6a0] sm:$0xff]  ;;  %2612 = vmatpush2.bf16.msra.mxu1 %v5768_v45  ;;  %v5595_v45 = vcombine.high %v152_v34, %v156_v35 }
  0x87   :  { %v5761_v47 = vcombine.high %v319_v42, %v323_v43  ;;  %v183_v48 = vld [vmem:[#allocation2 + $0x240] sm:$0xff]  ;;  %2570 = vmatprep.subr.bf16.mxu0 %v5633_v46  ;;  %v5760_v53 = vcombine.low %v319_v42, %v323_v43  ;;  %v144_v42 = vld [vmem:[#allocation2 + $0x108] sm:$0xff] }
  0x88   :  { %v187_v49 = vld [vmem:[#allocation2 + $0x260] sm:$0xff]  ;;  %2571 = vmatpush2.bf16.msra.mxu0 %v5632_v52  ;;  %v148_v43 = vld [vmem:[#allocation2 + $0x128] sm:$0xff] }
  0x89   :  { %v311_v50 = vld [vmem:[#allocation2 + $0x640] sm:$0xff]  ;;  %v5625_v54 = vcombine.high %v183_v48, %v187_v49  ;;  %2613 = vmatprep.subr.bf16.mxu1 %v5761_v47  ;;  %v5624_v62 = vcombine.low %v183_v48, %v187_v49  ;;  %v5594_v48 = vcombine.low %v152_v34, %v156_v35 }
  0x8a   :  { %v315_v51 = vld [vmem:[#allocation2 + $0x660] sm:$0xff]  ;;  %2614 = vmatpush2.bf16.msra.mxu1 %v5760_v53  ;;  %v5587_v53 = vcombine.high %v144_v42, %v148_v43 }
  0x8b   :  { %v5753_v55 = vcombine.high %v311_v50, %v315_v51  ;;  %v175_v57 = vld [vmem:[#allocation2 + $0x200] sm:$0xff]  ;;  %2572 = vmatprep.subr.bf16.mxu0 %v5625_v54  ;;  %v5752_v63 = vcombine.low %v311_v50, %v315_v51  ;;  %v136_v50 = vld [vmem:[#allocation2 + $0xc8] sm:$0xff] }
  0x8c   :  { %v179_v58 = vld [vmem:[#allocation2 + $0x220] sm:$0xff]  ;;  %2573 = vmatpush2.bf16.msra.mxu0 %v5624_v62  ;;  %v140_v51 = vld [vmem:[#allocation2 + $0xe8] sm:$0xff] }
  0x8d   :  { %v303_v60 = vld [vmem:[#allocation2 + $0x600] sm:$0xff]  ;;  %v5617_v0 = vcombine.high %v175_v57, %v179_v58  ;;  %2615 = vmatprep.subr.bf16.mxu1 %v5753_v55  ;;  %v5616_v6 = vcombine.low %v175_v57, %v179_v58  ;;  %v5586_v57 = vcombine.low %v144_v42, %v148_v43  ;;  %v5579_v62 = vcombine.high %v136_v50, %v140_v51 }
  0x8e   :  { %v307_v61 = vld [vmem:[#allocation2 + $0x620] sm:$0xff]  ;;  %2616 = vmatpush2.bf16.msra.mxu1 %v5752_v63 }
  0x8f   :  { %v5745_v1 = vcombine.high %v303_v60, %v307_v61  ;;  %v423_v2 = vld [vmem:[#allocation2 + $0x9c0] sm:$0xff]  ;;  %2574 = vmatprep.subr.bf16.mxu0 %v5617_v0  ;;  %v5744_v7 = vcombine.low %v303_v60, %v307_v61  ;;  %v128_v60 = vld [vmem:[#allocation2 + $0x88] sm:$0xff] }
  0x90   :  { %v427_v3 = vld [vmem:[#allocation2 + $0x9e0] sm:$0xff]  ;;  %2575 = vmatpush2.bf16.msra.mxu0 %v5616_v6 }
  0x91   :  { %v495_v4 = vld [vmem:[#allocation2 + $0xc00] sm:$0xff]  ;;  %v5865_v8 = vcombine.high %v423_v2, %v427_v3  ;;  %2617 = vmatprep.subr.bf16.mxu1 %v5745_v1  ;;  %v5864_v16 = vcombine.low %v423_v2, %v427_v3  ;;  %v5578_v1 = vcombine.low %v136_v50, %v140_v51  ;;  %v120_v3 = vld [vmem:[#allocation2 + $0x48] sm:$0xff] }
  0x92   :  { %v499_v5 = vld [vmem:[#allocation2 + $0xc20] sm:$0xff]  ;;  %2618 = vmatpush2.bf16.msra.mxu1 %v5744_v7 }
  0x93   :  { %v5937_v9 = vcombine.high %v495_v4, %v499_v5  ;;  %v415_v10 = vld [vmem:[#allocation2 + $0x980] sm:$0xff]  ;;  %2630 = vmatprep.subr.bf16.mxu0 %v5865_v8  ;;  %v5936_v17 = vcombine.low %v495_v4, %v499_v5  ;;  %v124_v4 = vld [vmem:[#allocation2 + $0x68] sm:$0xff] }
  0x94   :  { %v419_v11 = vld [vmem:[#allocation2 + $0x9a0] sm:$0xff] }
  0x95   :  { %v6963_v12 = vld [vmem:[%s7180_s0] ss:$28 sps:$4 sm:$0xff]   ;;  %v6310_v15 = vld [vmem:[%s7180_s0 + $0x8] ss:$28 sps:$4 sm:$0xff]   ;;  %v5857_v18 = vcombine.high %v415_v10, %v419_v11  ;;  %2687 = vmatprep.subr.bf16.mxu1 %v5937_v9  ;;  %v5856_v23 = vcombine.low %v415_v10, %v419_v11 }
  0x96   :  { %v407_v20 = vld [vmem:[#allocation2 + $0x940] sm:$0xff]  ;;  %2577 = vmatmul.mubr.bf16.vlgmr.msra.gmra.mxu0 %v6963_v12  ;;  %2620 = vmatmul.mubr.bf16.vlgmr.msra.gmra.mxu1 %v6310_v15  ;;  %v112_v11 = vld [vmem:[#allocation2 + $0x8] sm:$0xff]  ;;  %v5563_v15 = vcombine.high %v120_v3, %v124_v4 }
  0x97   :  { %v411_v21 = vld [vmem:[#allocation2 + $0x960] sm:$0xff]  ;;  %2631 = vmatpush1.bf16.msra.mxu0 %v5864_v16  ;;  %2688 = vmatpush1.bf16.msra.mxu1 %v5936_v17 }
  0x98   :  { %2632 = vmatprep.subr.bf16.mxu0 %v5857_v18  ;;  %v5849_v24 = vcombine.high %v407_v20, %v411_v21  ;;  %v399_v27 = vld [vmem:[#allocation2 + $0x900] sm:$0xff]  ;;  %2705 = vmatprep.mubr.bf16.mxu1 %v6889_v28  ;;  %v5848_v31 = vcombine.low %v407_v20, %v411_v21  ;;  %v5562_v18 = vcombine.low %v120_v3, %v124_v4  ;;  %v232_v20 = vld [vmem:[#allocation2 + $0x3c8] sm:$0xff] }
  0x99   :  { %2716 = vmatprep.subr.bf16.mxu1 %v5611_v19  ;;  %v403_v30 = vld [vmem:[#allocation2 + $0x920] sm:$0xff]  ;;  %2662 = vmatprep.mubr.bf16.mxu0 %v6972_v22  ;;  %v236_v21 = vld [vmem:[#allocation2 + $0x3e8] sm:$0xff] }
  0x9a   :  { %v5841_v33 = vcombine.high %v399_v27, %v403_v30  ;;  %v391_v36 = vld [vmem:[#allocation2 + $0x8c0] sm:$0xff]  ;;  %v5840_v39 = vcombine.low %v399_v27, %v403_v30  ;;  %v5554_v27 = vcombine.low %v112_v11, %v116_v13  ;;  %v224_v30 = vld [vmem:[#allocation2 + $0x388] sm:$0xff] }
  0x9b   :  { %2633 = vmatpush1.bf16.msra.mxu0 %v5856_v23  ;;  %v395_v38 = vld [vmem:[#allocation2 + $0x8e0] sm:$0xff] }
  0x9c   :  { %2634 = vmatprep.subr.bf16.mxu0 %v5849_v24  ;;  %v5833_v41 = vcombine.high %v391_v36, %v395_v38  ;;  %v383_v44 = vld [vmem:[#allocation2 + $0x880] sm:$0xff]  ;;  %v5832_v47 = vcombine.low %v391_v36, %v395_v38  ;;  %v5555_v24 = vcombine.high %v112_v11, %v116_v13  ;;  %v5674_v36 = vcombine.low %v232_v20, %v236_v21  ;;  %v216_v38 = vld [vmem:[#allocation2 + $0x348] sm:$0xff] }
  0x9d   :  { %v387_v46 = vld [vmem:[#allocation2 + $0x8a0] sm:$0xff]  ;;  %v300_v11 = vld [vmem:[#allocation2 + $0x5e8] sm:$0xff] }
  0x9e   :  { %5944 = vmatmul.mubr.msk.bf16.vlgmr.msra.gmra.mxu1 %vm2540_vm0, %v6311_v29  ;;  %v5825_v49 = vcombine.high %v383_v44, %v387_v46  ;;  %v375_v52 = vld [vmem:[#allocation2 + $0x840] sm:$0xff]  ;;  %v5824_v55 = vcombine.low %v383_v44, %v387_v46  ;;  %v208_v46 = vld [vmem:[#allocation2 + $0x308] sm:$0xff] }
  0x9f   :  { %2635 = vmatpush1.bf16.msra.mxu0 %v5848_v31  ;;  %2717 = vmatpush1.bf16.msra.mxu1 %v5610_v32  ;;  %v379_v54 = vld [vmem:[#allocation2 + $0x860] sm:$0xff]  ;;  %v228_v31 = vld [vmem:[#allocation2 + $0x3a8] sm:$0xff] }
  0xa0   :  { %2636 = vmatprep.subr.bf16.mxu0 %v5841_v33  ;;  %2718 = vmatprep.subr.bf16.mxu1 %v5603_v37  ;;  %v5817_v58 = vcombine.high %v375_v52, %v379_v54  ;;  %v367_v61 = vld [vmem:[#allocation2 + $0x800] sm:$0xff]  ;;  %v5816_v0 = vcombine.low %v375_v52, %v379_v54  ;;  %v5675_v33 = vcombine.high %v232_v20, %v236_v21  ;;  %v200_v54 = vld [vmem:[#allocation2 + $0x2c8] sm:$0xff] }
  0xa1   :  { %2748 = vmatprep.mubr.bf16.mxu1 %v6951_v56  ;;  %v132_v56 = vld [vmem:[#allocation2 + $0xa8] sm:$0xff]  ;;  %v371_v63 = vld [vmem:[#allocation2 + $0x820] sm:$0xff]  ;;  %v5666_v44 = vcombine.low %v224_v30, %v228_v31 }
  0xa2   :  { %v5809_v2 = vcombine.high %v367_v61, %v371_v63  ;;  %v487_v5 = vld [vmem:[#allocation2 + $0xbc0] sm:$0xff]  ;;  %v5571_v6 = vcombine.high %v128_v60, %v132_v56  ;;  %v5808_v8 = vcombine.low %v367_v61, %v371_v63  ;;  %v5570_v9 = vcombine.low %v128_v60, %v132_v56  ;;  %v192_v63 = vld [vmem:[#allocation2 + $0x288] sm:$0xff] }
  0xa3   :  { %2637 = vmatpush1.bf16.msra.mxu0 %v5840_v39  ;;  %2719 = vmatpush1.bf16.msra.mxu1 %v5602_v40  ;;  %v491_v7 = vld [vmem:[#allocation2 + $0xbe0] sm:$0xff]  ;;  %v220_v39 = vld [vmem:[#allocation2 + $0x368] sm:$0xff] }
  0xa4   :  { %2638 = vmatprep.subr.bf16.mxu0 %v5833_v41  ;;  %2720 = vmatprep.subr.bf16.mxu1 %v5595_v45  ;;  %v5929_v10 = vcombine.high %v487_v5, %v491_v7  ;;  %v479_v14 = vld [vmem:[#allocation2 + $0xb80] sm:$0xff]  ;;  %v5928_v17 = vcombine.low %v487_v5, %v491_v7  ;;  %v5667_v41 = vcombine.high %v224_v30, %v228_v31  ;;  %v184_v7 = vld [vmem:[#allocation2 + $0x248] sm:$0xff] }
  0xa5   :  { %v483_v16 = vld [vmem:[#allocation2 + $0xba0] sm:$0xff]  ;;  %v5658_v52 = vcombine.low %v216_v38, %v220_v39  ;;  %v292_v21 = vld [vmem:[#allocation2 + $0x5a8] sm:$0xff] }
  0xa6   :  { %v5921_v19 = vcombine.high %v479_v14, %v483_v16  ;;  %v471_v23 = vld [vmem:[#allocation2 + $0xb40] sm:$0xff]  ;;  %v5920_v26 = vcombine.low %v479_v14, %v483_v16  ;;  %v280_v30 = vld [vmem:[#allocation2 + $0x548] sm:$0xff] }
  0xa7   :  { %2639 = vmatpush1.bf16.msra.mxu0 %v5832_v47  ;;  %2721 = vmatpush1.bf16.msra.mxu1 %v5594_v48  ;;  %v475_v25 = vld [vmem:[#allocation2 + $0xb60] sm:$0xff]  ;;  %v212_v47 = vld [vmem:[#allocation2 + $0x328] sm:$0xff] }
  0xa8   :  { %2640 = vmatprep.subr.bf16.mxu0 %v5825_v49  ;;  %2722 = vmatprep.subr.bf16.mxu1 %v5587_v53  ;;  %v5913_v29 = vcombine.high %v471_v23, %v475_v25  ;;  %v463_v32 = vld [vmem:[#allocation2 + $0xb00] sm:$0xff]  ;;  %v5912_v35 = vcombine.low %v471_v23, %v475_v25  ;;  %v5659_v49 = vcombine.high %v216_v38, %v220_v39  ;;  %v284_v31 = vld [vmem:[#allocation2 + $0x568] sm:$0xff] }
  0xa9   :  { %v467_v34 = vld [vmem:[#allocation2 + $0xb20] sm:$0xff]  ;;  %v5650_v61 = vcombine.low %v208_v46, %v212_v47  ;;  %v276_v39 = vld [vmem:[#allocation2 + $0x528] sm:$0xff] }
  0xaa   :  { %v5905_v37 = vcombine.high %v463_v32, %v467_v34  ;;  %v455_v40 = vld [vmem:[#allocation2 + $0xac0] sm:$0xff]  ;;  %v5904_v43 = vcombine.low %v463_v32, %v467_v34  ;;  %v5723_v34 = vcombine.high %v280_v30, %v284_v31 }
  0xab   :  { %2641 = vmatpush1.bf16.msra.mxu0 %v5824_v55  ;;  %2723 = vmatpush1.bf16.msra.mxu1 %v5586_v57  ;;  %v459_v42 = vld [vmem:[#allocation2 + $0xae0] sm:$0xff]  ;;  %v204_v55 = vld [vmem:[#allocation2 + $0x2e8] sm:$0xff] }
  0xac   :  { %2642 = vmatprep.subr.bf16.mxu0 %v5817_v58  ;;  %2724 = vmatprep.subr.bf16.mxu1 %v5579_v62  ;;  %v5897_v45 = vcombine.high %v455_v40, %v459_v42  ;;  %v447_v48 = vld [vmem:[#allocation2 + $0xa80] sm:$0xff]  ;;  %v5896_v51 = vcombine.low %v455_v40, %v459_v42  ;;  %v5651_v58 = vcombine.high %v208_v46, %v212_v47 }
  0xad   :  { %v451_v50 = vld [vmem:[#allocation2 + $0xaa0] sm:$0xff]  ;;  %v5642_v5 = vcombine.low %v200_v54, %v204_v55  ;;  %v5722_v40 = vcombine.low %v280_v30, %v284_v31  ;;  %v492_v30 = vld [vmem:[#allocation2 + $0xbe8] sm:$0xff] }
  0xae   :  { %v5889_v53 = vcombine.high %v447_v48, %v451_v50  ;;  %v439_v57 = vld [vmem:[#allocation2 + $0xa40] sm:$0xff]  ;;  %v5888_v56 = vcombine.low %v447_v48, %v451_v50  ;;  %v400_v50 = vld [vmem:[#allocation2 + $0x908] sm:$0xff] }
  0xaf   :  { %2643 = vmatpush1.bf16.msra.mxu0 %v5816_v0  ;;  %2725 = vmatpush1.bf16.msra.mxu1 %v5578_v1  ;;  %v443_v60 = vld [vmem:[#allocation2 + $0xa60] sm:$0xff]  ;;  %v196_v0 = vld [vmem:[#allocation2 + $0x2a8] sm:$0xff] }
  0xb0   :  { %2644 = vmatprep.subr.bf16.mxu0 %v5809_v2  ;;  %2726 = vmatprep.subr.bf16.mxu1 %v5571_v6  ;;  %v5881_v62 = vcombine.high %v439_v57, %v443_v60  ;;  %v431_v1 = vld [vmem:[#allocation2 + $0xa00] sm:$0xff]  ;;  %v5643_v2 = vcombine.high %v200_v54, %v204_v55  ;;  %v5880_v4 = vcombine.low %v439_v57, %v443_v60  ;;  %v396_v60 = vld [vmem:[#allocation2 + $0x8e8] sm:$0xff] }
  0xb1   :  { %v435_v3 = vld [vmem:[#allocation2 + $0xa20] sm:$0xff]  ;;  %v5634_v14 = vcombine.low %v192_v63, %v196_v0 }
  0xb2   :  { %v5873_v6 = vcombine.high %v431_v1, %v435_v3  ;;  %v5872_v13 = vcombine.low %v431_v1, %v435_v3 }
  0xb3   :  { %2645 = vmatpush1.bf16.msra.mxu0 %v5808_v8  ;;  %2727 = vmatpush1.bf16.msra.mxu1 %v5570_v9  ;;  %v188_v8 = vld [vmem:[#allocation2 + $0x268] sm:$0xff] }
  0xb4   :  { %2646 = vmatprep.subr.bf16.mxu0 %v5929_v10  ;;  %2728 = vmatprep.subr.bf16.mxu1 %v5563_v15  ;;  %v296_v9 = vld [vmem:[#allocation2 + $0x5c8] sm:$0xff]  ;;  %v5635_v10 = vcombine.high %v192_v63, %v196_v0  ;;  %v5627_v20 = vcombine.high %v184_v7, %v188_v8 }
  0xb5   :  { %v6984_v15 = vld [vmem:[%s7180_s0 + $0x10] ss:$28 sps:$4 sm:$0xff]   ;;  %v5739_v16 = vcombine.high %v296_v9, %v300_v11  ;;  %v5738_v23 = vcombine.low %v296_v9, %v300_v11 }
  0xb6   :  { %v376_v9 = vld [vmem:[#allocation2 + $0x848] sm:$0xff] }
  0xb7   :  { %2647 = vmatpush2.bf16.msra.mxu0 %v5928_v17  ;;  %2729 = vmatpush1.bf16.msra.mxu1 %v5562_v18  ;;  %v176_v17 = vld [vmem:[#allocation2 + $0x208] sm:$0xff] }
  0xb8   :  { %2648 = vmatprep.subr.bf16.mxu0 %v5921_v19  ;;  %2730 = vmatprep.subr.bf16.mxu1 %v5555_v24  ;;  %v180_v18 = vld [vmem:[#allocation2 + $0x228] sm:$0xff]  ;;  %v5626_v24 = vcombine.low %v184_v7, %v188_v8 }
  0xb9   :  { %v288_v19 = vld [vmem:[#allocation2 + $0x588] sm:$0xff] }
  0xba   :  { %v5731_v25 = vcombine.high %v288_v19, %v292_v21  ;;  %v5730_v32 = vcombine.low %v288_v19, %v292_v21  ;;  %v368_v19 = vld [vmem:[#allocation2 + $0x808] sm:$0xff] }
  0xbb   :  { %2649 = vmatpush2.bf16.msra.mxu0 %v5920_v26  ;;  %2731 = vmatpush1.bf16.msra.mxu1 %v5554_v27  ;;  %v424_v26 = vld [vmem:[#allocation2 + $0x9c8] sm:$0xff] }
  0xbc   :  { %2650 = vmatprep.subr.bf16.mxu0 %v5913_v29  ;;  %2732 = vmatprep.subr.bf16.mxu1 %v5675_v33  ;;  %v428_v27 = vld [vmem:[#allocation2 + $0x9e8] sm:$0xff]  ;;  %v5619_v29 = vcombine.high %v176_v17, %v180_v18  ;;  %v5618_v33 = vcombine.low %v176_v17, %v180_v18 }
  0xbd   :  { %v5867_v38 = vcombine.high %v424_v26, %v428_v27 }
  0xbf   :  { %2651 = vmatpush2.bf16.msra.mxu0 %v5912_v35  ;;  %2733 = vmatpush2.bf16.msra.mxu1 %v5674_v36  ;;  %v416_v35 = vld [vmem:[#allocation2 + $0x988] sm:$0xff] }
  0xc0   :  { %2652 = vmatprep.subr.bf16.mxu0 %v5905_v37  ;;  %2734 = vmatprep.subr.bf16.mxu1 %v5667_v41  ;;  %v420_v36 = vld [vmem:[#allocation2 + $0x9a8] sm:$0xff]  ;;  %v5866_v41 = vcombine.low %v424_v26, %v428_v27 }
  0xc1   :  { %v272_v37 = vld [vmem:[#allocation2 + $0x508] sm:$0xff]  ;;  %v5859_v46 = vcombine.high %v416_v35, %v420_v36  ;;  %v5858_v48 = vcombine.low %v416_v35, %v420_v36 }
  0xc2   :  { %v5715_v42 = vcombine.high %v272_v37, %v276_v39  ;;  %v5714_v47 = vcombine.low %v272_v37, %v276_v39  ;;  %v480_v37 = vld [vmem:[#allocation2 + $0xb88] sm:$0xff] }
  0xc3   :  { %2653 = vmatpush2.bf16.msra.mxu0 %v5904_v43  ;;  %2735 = vmatpush2.bf16.msra.mxu1 %v5666_v44  ;;  %v408_v43 = vld [vmem:[#allocation2 + $0x948] sm:$0xff] }
  0xc4   :  { %2654 = vmatprep.subr.bf16.mxu0 %v5897_v45  ;;  %2736 = vmatprep.subr.bf16.mxu1 %v5659_v49  ;;  %v412_v44 = vld [vmem:[#allocation2 + $0x968] sm:$0xff] }
  0xc5   :  { %v264_v45 = vld [vmem:[#allocation2 + $0x4c8] sm:$0xff]  ;;  %v5851_v54 = vcombine.high %v408_v43, %v412_v44  ;;  %v5850_v57 = vcombine.low %v408_v43, %v412_v44 }
  0xc7   :  { %2655 = vmatpush2.bf16.msra.mxu0 %v5896_v51  ;;  %2737 = vmatpush2.bf16.msra.mxu1 %v5658_v52  ;;  %v404_v51 = vld [vmem:[#allocation2 + $0x928] sm:$0xff] }
  0xc8   :  { %2656 = vmatprep.subr.bf16.mxu0 %v5889_v53  ;;  %2738 = vmatprep.subr.bf16.mxu1 %v5651_v58  ;;  %v256_v52 = vld [vmem:[#allocation2 + $0x488] sm:$0xff]  ;;  %v5842_v0 = vcombine.low %v400_v50, %v404_v51 }
  0xc9   :  { %v260_v53 = vld [vmem:[#allocation2 + $0x4a8] sm:$0xff] }
  0xca   :  { %v392_v58 = vld [vmem:[#allocation2 + $0x8c8] sm:$0xff]  ;;  %v5698_v63 = vcombine.low %v256_v52, %v260_v53 }
  0xcb   :  { %2657 = vmatpush2.bf16.msra.mxu0 %v5888_v56  ;;  %2739 = vmatpush2.bf16.msra.mxu1 %v5650_v61  ;;  %v248_v56 = vld [vmem:[#allocation2 + $0x448] sm:$0xff]  ;;  %v5835_v3 = vcombine.high %v392_v58, %v396_v60  ;;  %v5834_v7 = vcombine.low %v392_v58, %v396_v60 }
  0xcc   :  { %2658 = vmatprep.subr.bf16.mxu0 %v5881_v62  ;;  %2740 = vmatprep.subr.bf16.mxu1 %v5643_v2  ;;  %v252_v61 = vld [vmem:[#allocation2 + $0x468] sm:$0xff]  ;;  %v5843_v62 = vcombine.high %v400_v50, %v404_v51 }
  0xcd   :  { %v5691_v1 = vcombine.high %v248_v56, %v252_v61  ;;  %v384_v2 = vld [vmem:[#allocation2 + $0x888] sm:$0xff] }
  0xcf   :  { %2659 = vmatpush2.bf16.msra.mxu0 %v5880_v4  ;;  %2741 = vmatpush2.bf16.msra.mxu1 %v5642_v5  ;;  %v240_v4 = vld [vmem:[#allocation2 + $0x408] sm:$0xff] }
  0xd0   :  { %2660 = vmatprep.subr.bf16.mxu0 %v5873_v6  ;;  %2742 = vmatprep.subr.bf16.mxu1 %v5635_v10  ;;  %v244_v5 = vld [vmem:[#allocation2 + $0x428] sm:$0xff]  ;;  %v5690_v6 = vcombine.low %v248_v56, %v252_v61 }
  0xd1   :  { %v5683_v8 = vcombine.high %v240_v4, %v244_v5  ;;  %v380_v10 = vld [vmem:[#allocation2 + $0x868] sm:$0xff] }
  0xd2   :  { %v5819_v21 = vcombine.high %v376_v9, %v380_v10  ;;  %v5818_v26 = vcombine.low %v376_v9, %v380_v10  ;;  %v456_v56 = vld [vmem:[#allocation2 + $0xac8] sm:$0xff] }
  0xd3   :  { %2661 = vmatpush2.bf16.msra.mxu0 %v5872_v13  ;;  %2743 = vmatpush2.bf16.msra.mxu1 %v5634_v14  ;;  %v360_v13 = vld [vmem:[#allocation2 + $0x7c8] sm:$0xff] }
  0xd4   :  { %2759 = vmatprep.subr.bf16.mxu0 %v5739_v16  ;;  %2744 = vmatprep.subr.bf16.mxu1 %v5627_v20  ;;  %v364_v14 = vld [vmem:[#allocation2 + $0x7e8] sm:$0xff]  ;;  %v5682_v16 = vcombine.low %v240_v4, %v244_v5 }
  0xd5   :  { %v5803_v18 = vcombine.high %v360_v13, %v364_v14  ;;  %v372_v20 = vld [vmem:[#allocation2 + $0x828] sm:$0xff] }
  0xd6   :  { %2663 = vmatmul.mubr.bf16.vlgmr.msra.gmra.mxu0 %v6984_v15  ;;  %v5811_v31 = vcombine.high %v368_v19, %v372_v20  ;;  %v5810_v35 = vcombine.low %v368_v19, %v372_v20  ;;  %v460_v61 = vld [vmem:[#allocation2 + $0xae8] sm:$0xff] }
  0xd7   :  { %2760 = vmatpush1.bf16.msra.mxu0 %v5738_v23  ;;  %2791 = vmatprep.mubr.bf16.mxu0 %v6956_v59  ;;  %v268_v59 = vld [vmem:[#allocation2 + $0x4e8] sm:$0xff]  ;;  %v5899_v5 = vcombine.high %v456_v56, %v460_v61  ;;  %v5898_v9 = vcombine.low %v456_v56, %v460_v61  ;;  %v137_v61 = vld [vmem:[#allocation2 + $0xd0] sm:$0xff] }
  0xd8   :  { %2745 = vmatpush2.bf16.msra.mxu1 %v5626_v24  ;;  %2761 = vmatprep.subr.bf16.mxu0 %v5731_v25  ;;  %v5707_v49 = vcombine.high %v264_v45, %v268_v59  ;;  %v5706_v55 = vcombine.low %v264_v45, %v268_v59  ;;  %v352_v23 = vld [vmem:[#allocation2 + $0x788] sm:$0xff]  ;;  %v5802_v25 = vcombine.low %v360_v13, %v364_v14 }
  0xd9   :  { %2746 = vmatprep.subr.bf16.mxu1 %v5619_v29  ;;  %v356_v24 = vld [vmem:[#allocation2 + $0x7a8] sm:$0xff] }
  0xda   :  { %v5795_v27 = vcombine.high %v352_v23, %v356_v24  ;;  %v488_v29 = vld [vmem:[#allocation2 + $0xbc8] sm:$0xff] }
  0xdb   :  { %2762 = vmatpush1.bf16.msra.mxu0 %v5730_v32  ;;  %v344_v32 = vld [vmem:[#allocation2 + $0x748] sm:$0xff]  ;;  %v5931_v39 = vcombine.high %v488_v29, %v492_v30  ;;  %v5930_v43 = vcombine.low %v488_v29, %v492_v30 }
  0xdc   :  { %2747 = vmatpush2.bf16.msra.mxu1 %v5618_v33  ;;  %2763 = vmatprep.subr.bf16.mxu0 %v5723_v34  ;;  %v348_v33 = vld [vmem:[#allocation2 + $0x768] sm:$0xff]  ;;  %v5794_v34 = vcombine.low %v352_v23, %v356_v24 }
  0xdd   :  { %2802 = vmatprep.subr.bf16.mxu1 %v5867_v38  ;;  %v5787_v36 = vcombine.high %v344_v32, %v348_v33  ;;  %v484_v38 = vld [vmem:[#allocation2 + $0xba8] sm:$0xff] }
  0xde   :  { %v472_v45 = vld [vmem:[#allocation2 + $0xb48] sm:$0xff]  ;;  %v5922_v50 = vcombine.low %v480_v37, %v484_v38 }
  0xdf   :  { %2749 = vmatmul.mubr.bf16.vlgmr.msra.gmra.mxu1 %v6963_v12  ;;  %2764 = vmatpush1.bf16.msra.mxu0 %v5722_v40  ;;  %v5699_v12 = vcombine.high %v256_v52, %v260_v53  ;;  %v336_v40 = vld [vmem:[#allocation2 + $0x708] sm:$0xff] }
  0xe0   :  { %2803 = vmatpush1.bf16.msra.mxu1 %v5866_v41  ;;  %2765 = vmatprep.subr.bf16.mxu0 %v5715_v42  ;;  %v340_v41 = vld [vmem:[#allocation2 + $0x728] sm:$0xff]  ;;  %v5786_v42 = vcombine.low %v344_v32, %v348_v33  ;;  %v297_v32 = vld [vmem:[#allocation2 + $0x5d0] sm:$0xff] }
  0xe1   :  { %2804 = vmatprep.subr.bf16.mxu1 %v5859_v46  ;;  %2834 = vmatprep.mubr.bf16.mxu1 %v6972_v22  ;;  %v388_v22 = vld [vmem:[#allocation2 + $0x8a8] sm:$0xff]  ;;  %v5779_v44 = vcombine.high %v336_v40, %v340_v41  ;;  %v5923_v46 = vcombine.high %v480_v37, %v484_v38  ;;  %v301_v33 = vld [vmem:[#allocation2 + $0x5f0] sm:$0xff] }
  0xe2   :  { %v5827_v11 = vcombine.high %v384_v2, %v388_v22  ;;  %v5826_v17 = vcombine.low %v384_v2, %v388_v22  ;;  %v476_v59 = vld [vmem:[#allocation2 + $0xb68] sm:$0xff]  ;;  %v165_v37 = vld [vmem:[#allocation2 + $0x1b0] sm:$0xff]  ;;  %v5741_v38 = vcombine.high %v297_v32, %v301_v33 }
  0xe3   :  { %2766 = vmatpush1.bf16.msra.mxu0 %v5714_v47  ;;  %v328_v47 = vld [vmem:[#allocation2 + $0x6c8] sm:$0xff]  ;;  %v5914_v58 = vcombine.low %v472_v45, %v476_v59 }
  0xe4   :  { %2805 = vmatpush1.bf16.msra.mxu1 %v5858_v48  ;;  %2767 = vmatprep.subr.bf16.mxu0 %v5707_v49  ;;  %v332_v48 = vld [vmem:[#allocation2 + $0x6e8] sm:$0xff]  ;;  %v5778_v49 = vcombine.low %v336_v40, %v340_v41  ;;  %v293_v40 = vld [vmem:[#allocation2 + $0x5b0] sm:$0xff] }
  0xe5   :  { %2806 = vmatprep.subr.bf16.mxu1 %v5851_v54  ;;  %v5771_v51 = vcombine.high %v328_v47, %v332_v48  ;;  %v464_v52 = vld [vmem:[#allocation2 + $0xb08] sm:$0xff]  ;;  %v5915_v54 = vcombine.high %v472_v45, %v476_v59  ;;  %v157_v59 = vld [vmem:[#allocation2 + $0x170] sm:$0xff] }
  0xe6   :  { %v468_v53 = vld [vmem:[#allocation2 + $0xb28] sm:$0xff] }
  0xe7   :  { %2768 = vmatpush1.bf16.msra.mxu0 %v5706_v55  ;;  %v320_v55 = vld [vmem:[#allocation2 + $0x688] sm:$0xff]  ;;  %v5906_v2 = vcombine.low %v464_v52, %v468_v53 }
  0xe8   :  { %2807 = vmatpush1.bf16.msra.mxu1 %v5850_v57  ;;  %2769 = vmatprep.subr.bf16.mxu0 %v5699_v12  ;;  %v324_v57 = vld [vmem:[#allocation2 + $0x6a8] sm:$0xff]  ;;  %v5770_v12 = vcombine.low %v328_v47, %v332_v48  ;;  %v7000_v47 = vld [vmem:[%s7180_s0 + $0x18] ss:$28 sps:$4 sm:$0xff]  }
  0xe9   :  { %2808 = vmatprep.subr.bf16.mxu1 %v5843_v62  ;;  %v5763_v60 = vcombine.high %v320_v55, %v324_v57  ;;  %v5907_v62 = vcombine.high %v464_v52, %v468_v53  ;;  %v452_v4 = vld [vmem:[#allocation2 + $0xaa8] sm:$0xff]  ;;  %v285_v48 = vld [vmem:[#allocation2 + $0x570] sm:$0xff] }
  0xea   :  { %v444_v13 = vld [vmem:[#allocation2 + $0xa68] sm:$0xff]  ;;  %v145_v52 = vld [vmem:[#allocation2 + $0x110] sm:$0xff] }
  0xeb   :  { %2770 = vmatpush1.bf16.msra.mxu0 %v5698_v63  ;;  %v312_v63 = vld [vmem:[#allocation2 + $0x648] sm:$0xff]  ;;  %v149_v53 = vld [vmem:[#allocation2 + $0x130] sm:$0xff] }
  0xec   :  { %2809 = vmatpush1.bf16.msra.mxu1 %v5842_v0  ;;  %2771 = vmatprep.subr.bf16.mxu0 %v5691_v1  ;;  %v316_v0 = vld [vmem:[#allocation2 + $0x668] sm:$0xff]  ;;  %v5762_v1 = vcombine.low %v320_v55, %v324_v57  ;;  %v273_v55 = vld [vmem:[#allocation2 + $0x510] sm:$0xff]  ;;  %v5589_v56 = vcombine.high %v145_v52, %v149_v53 }
  0xed   :  { %2810 = vmatprep.subr.bf16.mxu1 %v5835_v3  ;;  %v5755_v22 = vcombine.high %v312_v63, %v316_v0  ;;  %v448_v3 = vld [vmem:[#allocation2 + $0xa88] sm:$0xff]  ;;  %v277_v57 = vld [vmem:[#allocation2 + $0x530] sm:$0xff] }
  0xee   :  { %v5891_v14 = vcombine.high %v448_v3, %v452_v4  ;;  %v5890_v19 = vcombine.low %v448_v3, %v452_v4  ;;  %v436_v23 = vld [vmem:[#allocation2 + $0xa28] sm:$0xff]  ;;  %v129_v4 = vld [vmem:[#allocation2 + $0x90] sm:$0xff] }
  0xef   :  { %2772 = vmatpush1.bf16.msra.mxu0 %v5690_v6  ;;  %v304_v6 = vld [vmem:[#allocation2 + $0x608] sm:$0xff] }
  0xf0   :  { %2811 = vmatpush1.bf16.msra.mxu1 %v5834_v7  ;;  %2773 = vmatprep.subr.bf16.mxu0 %v5683_v8  ;;  %v308_v7 = vld [vmem:[#allocation2 + $0x628] sm:$0xff]  ;;  %v5754_v8 = vcombine.low %v312_v63, %v316_v0  ;;  %v5717_v63 = vcombine.high %v273_v55, %v277_v57  ;;  %v265_v0 = vld [vmem:[#allocation2 + $0x4d0] sm:$0xff] }
  0xf1   :  { %2812 = vmatprep.subr.bf16.mxu1 %v5827_v11  ;;  %v5747_v10 = vcombine.high %v304_v6, %v308_v7  ;;  %v440_v11 = vld [vmem:[#allocation2 + $0xa48] sm:$0xff] }
  0xf2   :  { %v5883_v24 = vcombine.high %v440_v11, %v444_v13  ;;  %v5882_v29 = vcombine.low %v440_v11, %v444_v13  ;;  %v121_v13 = vld [vmem:[#allocation2 + $0x50] sm:$0xff] }
  0xf3   :  { %2774 = vmatpush1.bf16.msra.mxu0 %v5682_v16  ;;  %v496_v16 = vld [vmem:[#allocation2 + $0xc08] sm:$0xff] }
  0xf4   :  { %2813 = vmatpush1.bf16.msra.mxu1 %v5826_v17  ;;  %2775 = vmatprep.subr.bf16.mxu0 %v5803_v18  ;;  %v500_v17 = vld [vmem:[#allocation2 + $0xc28] sm:$0xff]  ;;  %v5746_v18 = vcombine.low %v304_v6, %v308_v7  ;;  %v257_v7 = vld [vmem:[#allocation2 + $0x490] sm:$0xff] }
  0xf5   :  { %2814 = vmatprep.subr.bf16.mxu1 %v5819_v21  ;;  %v5939_v20 = vcombine.high %v496_v16, %v500_v17  ;;  %v432_v21 = vld [vmem:[#allocation2 + $0xa08] sm:$0xff] }
  0xf7   :  { %2776 = vmatpush2.bf16.msra.mxu0 %v5802_v25  ;;  %v169_v25 = vld [vmem:[#allocation2 + $0x1d0] sm:$0xff] }
  0xf8   :  { %2815 = vmatpush1.bf16.msra.mxu1 %v5818_v26  ;;  %2777 = vmatprep.subr.bf16.mxu0 %v5795_v27  ;;  %v173_v26 = vld [vmem:[#allocation2 + $0x1f0] sm:$0xff]  ;;  %v5938_v27 = vcombine.low %v496_v16, %v500_v17 }
  0xf9   :  { %2816 = vmatprep.subr.bf16.mxu1 %v5811_v31  ;;  %v5613_v30 = vcombine.high %v169_v25, %v173_v26  ;;  %v5875_v31 = vcombine.high %v432_v21, %v436_v23  ;;  %v5612_v41 = vcombine.low %v169_v25, %v173_v26  ;;  %v249_v17 = vld [vmem:[#allocation2 + $0x450] sm:$0xff] }
  0xfa   :  { %v241_v26 = vld [vmem:[#allocation2 + $0x410] sm:$0xff] }
  0xfb   :  { %2778 = vmatpush2.bf16.msra.mxu0 %v5794_v34  ;;  %v6993_v34 = vld [vmem:[%s7180_s0 + $0x8] ss:$28 sps:$4 sm:$0xff]  }
  0xfc   :  { %2817 = vmatpush1.bf16.msra.mxu1 %v5810_v35  ;;  %2779 = vmatprep.subr.bf16.mxu0 %v5787_v36  ;;  %v5874_v35 = vcombine.low %v432_v21, %v436_v23  ;;  %v161_v36 = vld [vmem:[#allocation2 + $0x190] sm:$0xff] }
  0xfd   :  { %2818 = vmatprep.subr.bf16.mxu1 %v5931_v39  ;;  %v289_v39 = vld [vmem:[#allocation2 + $0x590] sm:$0xff] }
  0xfe   :  { %v5733_v45 = vcombine.high %v289_v39, %v293_v40  ;;  %v113_v23 = vld [vmem:[#allocation2 + $0x10] sm:$0xff] }
  0xff   :  { %2780 = vmatpush2.bf16.msra.mxu0 %v5786_v42  ;;  %v5740_v42 = vcombine.low %v297_v32, %v301_v33  ;;  %v233_v32 = vld [vmem:[#allocation2 + $0x3d0] sm:$0xff] }
 0x100   :  { %2819 = vmatpush2.bf16.msra.mxu1 %v5930_v43  ;;  %2781 = vmatprep.subr.bf16.mxu0 %v5779_v44  ;;  %v5605_v43 = vcombine.high %v161_v36, %v165_v37  ;;  %v153_v44 = vld [vmem:[#allocation2 + $0x150] sm:$0xff] }
 0x101   :  { %2820 = vmatprep.subr.bf16.mxu1 %v5923_v46  ;;  %v281_v46 = vld [vmem:[#allocation2 + $0x550] sm:$0xff] }
 0x102   :  { %v237_v33 = vld [vmem:[#allocation2 + $0x3f0] sm:$0xff] }
 0x103   :  { %2782 = vmatpush2.bf16.msra.mxu0 %v5778_v49  ;;  %v5604_v49 = vcombine.low %v161_v36, %v165_v37  ;;  %v361_v36 = vld [vmem:[#allocation2 + $0x7d0] sm:$0xff] }
 0x104   :  { %2821 = vmatpush2.bf16.msra.mxu1 %v5922_v50  ;;  %2783 = vmatprep.subr.bf16.mxu0 %v5771_v51  ;;  %v5732_v50 = vcombine.low %v289_v39, %v293_v40  ;;  %v5597_v51 = vcombine.high %v153_v44, %v157_v59  ;;  %v365_v37 = vld [vmem:[#allocation2 + $0x7f0] sm:$0xff]  ;;  %v5677_v40 = vcombine.high %v233_v32, %v237_v33 }
 0x105   :  { %2822 = vmatprep.subr.bf16.mxu1 %v5915_v54  ;;  %v5725_v54 = vcombine.high %v281_v46, %v285_v48 }
 0x107   :  { %2784 = vmatpush2.bf16.msra.mxu0 %v5770_v12  ;;  %v7008_v12 = vld [vmem:[%s7180_s0 + $0x4] ss:$28 sps:$4 sm:$0xff]  }
 0x108   :  { %2823 = vmatpush2.bf16.msra.mxu1 %v5914_v58  ;;  %2785 = vmatprep.subr.bf16.mxu0 %v5763_v60  ;;  %v5596_v58 = vcombine.low %v153_v44, %v157_v59  ;;  %v5724_v60 = vcombine.low %v281_v46, %v285_v48  ;;  %v353_v44 = vld [vmem:[#allocation2 + $0x790] sm:$0xff]  ;;  %v5676_v59 = vcombine.low %v233_v32, %v237_v33  ;;  %v7020_v32 = vld [vmem:[#allocation4] sm:$0xff] }
 0x109   :  { %2824 = vmatprep.subr.bf16.mxu1 %v5907_v62  ;;  %v141_v62 = vld [vmem:[#allocation2 + $0xf0] sm:$0xff]  ;;  %v5804_v46 = vcombine.low %v361_v36, %v365_v37 }
 0x10a   :  { %v5581_v3 = vcombine.high %v137_v61, %v141_v62 }
 0x10b   :  { %2786 = vmatpush2.bf16.msra.mxu0 %v5762_v1  ;;  %v269_v1 = vld [vmem:[#allocation2 + $0x4f0] sm:$0xff] }
 0x10c   :  { %2825 = vmatpush2.bf16.msra.mxu1 %v5906_v2  ;;  %2787 = vmatprep.subr.bf16.mxu0 %v5755_v22  ;;  %v5588_v2 = vcombine.low %v145_v52, %v149_v53  ;;  %v5716_v22 = vcombine.low %v273_v55, %v277_v57  ;;  %v5709_v6 = vcombine.high %v265_v0, %v269_v1  ;;  %v345_v52 = vld [vmem:[#allocation2 + $0x750] sm:$0xff] }
 0x10d   :  { %2826 = vmatprep.subr.bf16.mxu1 %v5899_v5  ;;  %v133_v5 = vld [vmem:[#allocation2 + $0xb0] sm:$0xff] }
 0x10e   :  { %v5573_v11 = vcombine.high %v129_v4, %v133_v5  ;;  %v349_v53 = vld [vmem:[#allocation2 + $0x770] sm:$0xff] }
 0x10f   :  { %2788 = vmatpush2.bf16.msra.mxu0 %v5754_v8  ;;  %v261_v8 = vld [vmem:[#allocation2 + $0x4b0] sm:$0xff] }
 0x110   :  { %2827 = vmatpush2.bf16.msra.mxu1 %v5898_v9  ;;  %2789 = vmatprep.subr.bf16.mxu0 %v5747_v10  ;;  %v5580_v9 = vcombine.low %v137_v61, %v141_v62  ;;  %v5708_v10 = vcombine.low %v265_v0, %v269_v1  ;;  %v5701_v16 = vcombine.high %v257_v7, %v261_v8  ;;  %v337_v61 = vld [vmem:[#allocation2 + $0x710] sm:$0xff] }
 0x111   :  { %2828 = vmatprep.subr.bf16.mxu1 %v5891_v14  ;;  %v125_v14 = vld [vmem:[#allocation2 + $0x70] sm:$0xff]  ;;  %v5788_v0 = vcombine.low %v345_v52, %v349_v53 }
 0x112   :  { %v5565_v21 = vcombine.high %v121_v13, %v125_v14  ;;  %v341_v62 = vld [vmem:[#allocation2 + $0x730] sm:$0xff] }
 0x113   :  { %2790 = vmatpush2.bf16.msra.mxu0 %v5746_v18  ;;  %v253_v18 = vld [vmem:[#allocation2 + $0x470] sm:$0xff] }
 0x114   :  { %2829 = vmatpush2.bf16.msra.mxu1 %v5890_v19  ;;  %2859 = vmatprep.subr.bf16.mxu0 %v5939_v20  ;;  %v5572_v19 = vcombine.low %v129_v4, %v133_v5  ;;  %v5700_v20 = vcombine.low %v257_v7, %v261_v8  ;;  %v5693_v25 = vcombine.high %v249_v17, %v253_v18  ;;  %v329_v4 = vld [vmem:[#allocation2 + $0x6d0] sm:$0xff]  ;;  %v505_v7 = vlaneseq }
 0x115   :  { %2830 = vmatprep.subr.bf16.mxu1 %v5883_v24  ;;  %v117_v24 = vld [vmem:[#allocation2 + $0x30] sm:$0xff]  ;;  %v5780_v8 = vcombine.low %v337_v61, %v341_v62 }
 0x116   :  { %2792 = vmatmul.mubr.bf16.vlgmr.msra.gmra.mxu0 %v6993_v34  ;;  %v333_v5 = vld [vmem:[#allocation2 + $0x6f0] sm:$0xff] }
 0x117   :  { %2860 = vmatpush1.bf16.msra.mxu0 %v5938_v27  ;;  %2877 = vmatprep.mubr.bf16.mxu0 %v6889_v28  ;;  %v245_v27 = vld [vmem:[#allocation2 + $0x430] sm:$0xff] }
 0x118   :  { %2831 = vmatpush2.bf16.msra.mxu1 %v5882_v29  ;;  %2888 = vmatprep.subr.bf16.mxu0 %v5613_v30  ;;  %v5564_v29 = vcombine.low %v121_v13, %v125_v14  ;;  %v5692_v30 = vcombine.low %v249_v17, %v253_v18  ;;  %v5684_v39 = vcombine.low %v241_v26, %v245_v27  ;;  %v197_v13 = vld [vmem:[#allocation2 + $0x2b0] sm:$0xff]  ;;  %v7017_v18 = vshrl.u32 %v505_v7, 7 }
 0x119   :  { %2832 = vmatprep.subr.bf16.mxu1 %v5875_v31  ;;  %v5557_v31 = vcombine.high %v113_v23, %v117_v24  ;;  %v321_v14 = vld [vmem:[#allocation2 + $0x690] sm:$0xff] }
 0x11a   :  { %v413_v7 = vld [vmem:[#allocation2 + $0x970] sm:$0xff] }
 0x11c   :  { %2833 = vmatpush2.bf16.msra.mxu1 %v5874_v35  ;;  %v5685_v35 = vcombine.high %v241_v26, %v245_v27  ;;  %v317_v26 = vld [vmem:[#allocation2 + $0x670] sm:$0xff] }
 0x11d   :  { %2931 = vmatprep.subr.bf16.mxu1 %v5741_v38  ;;  %v5556_v38 = vcombine.low %v113_v23, %v117_v24  ;;  %v185_v23 = vld [vmem:[#allocation2 + $0x250] sm:$0xff] }
 0x11e   :  { %5945 = vmatmul.mubr.msk.bf16.vlgmr.msra.gmra.mxu0 %vm2540_vm0, %v7000_v47  ;;  %v189_v24 = vld [vmem:[#allocation2 + $0x270] sm:$0xff] }
 0x11f   :  { %2835 = vmatmul.mubr.bf16.vlgmr.msra.gmra.mxu1 %v6984_v15  ;;  %2889 = vmatpush1.bf16.msra.mxu0 %v5612_v41  ;;  %v7014_v15 = vld [vmem:[%s7180_s0 + $0xc] ss:$28 sps:$4 sm:$0xff]   ;;  %v5805_v41 = vcombine.high %v361_v36, %v365_v37  ;;  %v181_v36 = vld [vmem:[#allocation2 + $0x230] sm:$0xff] }
 0x120   :  { %2932 = vmatpush1.bf16.msra.mxu1 %v5740_v42  ;;  %2890 = vmatprep.subr.bf16.mxu0 %v5605_v43  ;;  %v225_v42 = vld [vmem:[#allocation2 + $0x390] sm:$0xff] }
 0x121   :  { %2933 = vmatprep.subr.bf16.mxu1 %v5733_v45  ;;  %2920 = vmatprep.mubr.bf16.mxu0 %v7008_v12  ;;  %v229_v43 = vld [vmem:[#allocation2 + $0x3b0] sm:$0xff] }
 0x122   :  { %2963 = vmatprep.mubr.bf16.mxu1 %v7014_v15  ;;  %v357_v45 = vld [vmem:[#allocation2 + $0x7b0] sm:$0xff]  ;;  %v5669_v48 = vcombine.high %v225_v42, %v229_v43 }
 0x123   :  { %2891 = vmatpush1.bf16.msra.mxu0 %v5604_v49  ;;  %v5797_v49 = vcombine.high %v353_v44, %v357_v45  ;;  %v5796_v55 = vcombine.low %v353_v44, %v357_v45  ;;  %v305_v37 = vld [vmem:[#allocation2 + $0x610] sm:$0xff] }
 0x124   :  { %2934 = vmatpush1.bf16.msra.mxu1 %v5732_v50  ;;  %2892 = vmatprep.subr.bf16.mxu0 %v5597_v51  ;;  %v217_v50 = vld [vmem:[#allocation2 + $0x350] sm:$0xff] }
 0x125   :  { %2935 = vmatprep.subr.bf16.mxu1 %v5725_v54  ;;  %v221_v51 = vld [vmem:[#allocation2 + $0x370] sm:$0xff]  ;;  %v5668_v54 = vcombine.low %v225_v42, %v229_v43 }
 0x126   :  { %v5661_v57 = vcombine.high %v217_v50, %v221_v51  ;;  %v425_v44 = vld [vmem:[#allocation2 + $0x9d0] sm:$0xff] }
 0x127   :  { %2893 = vmatpush1.bf16.msra.mxu0 %v5596_v58  ;;  %v5789_v58 = vcombine.high %v345_v52, %v349_v53  ;;  %v429_v45 = vld [vmem:[#allocation2 + $0x9f0] sm:$0xff] }
 0x128   :  { %2936 = vmatpush1.bf16.msra.mxu1 %v5724_v60  ;;  %2894 = vmatprep.subr.bf16.mxu0 %v5589_v56  ;;  %v209_v60 = vld [vmem:[#allocation2 + $0x310] sm:$0xff] }
 0x129   :  { %2937 = vmatprep.subr.bf16.mxu1 %v5717_v63  ;;  %v213_v56 = vld [vmem:[#allocation2 + $0x330] sm:$0xff]  ;;  %v5660_v63 = vcombine.low %v217_v50, %v221_v51 }
 0x12a   :  { %v5653_v1 = vcombine.high %v209_v60, %v213_v56 }
 0x12b   :  { %2895 = vmatpush1.bf16.msra.mxu0 %v5588_v2  ;;  %v5781_v2 = vcombine.high %v337_v61, %v341_v62  ;;  %v170_v62 = vld [vmem:[#allocation2 + $0x1d8] sm:$0xff] }
 0x12c   :  { %2938 = vmatpush1.bf16.msra.mxu1 %v5716_v22  ;;  %2896 = vmatprep.subr.bf16.mxu0 %v5581_v3  ;;  %v201_v22 = vld [vmem:[#allocation2 + $0x2d0] sm:$0xff] }
 0x12d   :  { %2939 = vmatprep.subr.bf16.mxu1 %v5709_v6  ;;  %v205_v3 = vld [vmem:[#allocation2 + $0x2f0] sm:$0xff]  ;;  %v5652_v6 = vcombine.low %v209_v60, %v213_v56 }
 0x12e   :  { %v5644_v17 = vcombine.low %v201_v22, %v205_v3  ;;  %v417_v60 = vld [vmem:[#allocation2 + $0x990] sm:$0xff] }
 0x12f   :  { %2897 = vmatpush1.bf16.msra.mxu0 %v5580_v9  ;;  %v5645_v9 = vcombine.high %v201_v22, %v205_v3  ;;  %v421_v56 = vld [vmem:[#allocation2 + $0x9b0] sm:$0xff] }
 0x130   :  { %2940 = vmatpush1.bf16.msra.mxu1 %v5708_v10  ;;  %2898 = vmatprep.subr.bf16.mxu0 %v5573_v11  ;;  %v5773_v10 = vcombine.high %v329_v4, %v333_v5  ;;  %v193_v11 = vld [vmem:[#allocation2 + $0x290] sm:$0xff]  ;;  %v5861_v3 = vcombine.high %v417_v60, %v421_v56 }
 0x131   :  { %2941 = vmatprep.subr.bf16.mxu1 %v5701_v16  ;;  %v325_v16 = vld [vmem:[#allocation2 + $0x6b0] sm:$0xff]  ;;  %v5636_v27 = vcombine.low %v193_v11, %v197_v13 }
 0x133   :  { %2899 = vmatpush1.bf16.msra.mxu0 %v5572_v19  ;;  %v5772_v19 = vcombine.low %v329_v4, %v333_v5 }
 0x134   :  { %2942 = vmatpush1.bf16.msra.mxu1 %v5700_v20  ;;  %2900 = vmatprep.subr.bf16.mxu0 %v5565_v21  ;;  %v5637_v20 = vcombine.high %v193_v11, %v197_v13  ;;  %v5765_v21 = vcombine.high %v321_v14, %v325_v16  ;;  %v401_v11 = vld [vmem:[#allocation2 + $0x910] sm:$0xff] }
 0x135   :  { %2943 = vmatprep.subr.bf16.mxu1 %v5693_v25  ;;  %v313_v25 = vld [vmem:[#allocation2 + $0x650] sm:$0xff] }
 0x136   :  { %v5757_v33 = vcombine.high %v313_v25, %v317_v26  ;;  %v405_v13 = vld [vmem:[#allocation2 + $0x930] sm:$0xff] }
 0x137   :  { %2901 = vmatpush1.bf16.msra.mxu0 %v5564_v29  ;;  %v507_v29 = vsub.s32 0, %v7017_v18 }
 0x138   :  { %2944 = vmatpush1.bf16.msra.mxu1 %v5692_v30  ;;  %2902 = vmatprep.subr.bf16.mxu0 %v5557_v31  ;;  %v5764_v30 = vcombine.low %v321_v14, %v325_v16  ;;  %v5629_v31 = vcombine.high %v185_v23, %v189_v24  ;;  %v162_v14 = vld [vmem:[#allocation2 + $0x198] sm:$0xff] }
 0x139   :  { %2945 = vmatprep.subr.bf16.mxu1 %v5685_v35  ;;  %v177_v35 = vld [vmem:[#allocation2 + $0x210] sm:$0xff]  ;;  %v166_v16 = vld [vmem:[#allocation2 + $0x1b8] sm:$0xff] }
 0x13a   :  { %v5621_v42 = vcombine.high %v177_v35, %v181_v36  ;;  %v5620_v51 = vcombine.low %v177_v35, %v181_v36  ;;  %v385_v35 = vld [vmem:[#allocation2 + $0x890] sm:$0xff] }
 0x13b   :  { %2903 = vmatpush1.bf16.msra.mxu0 %v5556_v38  ;;  %v309_v38 = vld [vmem:[#allocation2 + $0x630] sm:$0xff] }
 0x13c   :  { %2946 = vmatpush1.bf16.msra.mxu1 %v5684_v39  ;;  %2904 = vmatprep.subr.bf16.mxu0 %v5677_v40  ;;  %v5628_v39 = vcombine.low %v185_v23, %v189_v24  ;;  %v508_v40 = vrot.slane %v7020_v32, %v507_v29  ;;  %v5749_v43 = vcombine.high %v305_v37, %v309_v38  ;;  %v393_v23 = vld [vmem:[#allocation2 + $0x8d0] sm:$0xff] }
 0x13d   :  { %2947 = vmatprep.subr.bf16.mxu1 %v5805_v41  ;;  %v5756_v41 = vcombine.low %v313_v25, %v317_v26  ;;  %v5748_v53 = vcombine.low %v305_v37, %v309_v38  ;;  %v397_v24 = vld [vmem:[#allocation2 + $0x8f0] sm:$0xff]  ;;  %v154_v25 = vld [vmem:[#allocation2 + $0x158] sm:$0xff] }
 0x13e   :  { %v158_v26 = vld [vmem:[#allocation2 + $0x178] sm:$0xff]  ;;  %v389_v36 = vld [vmem:[#allocation2 + $0x8b0] sm:$0xff] }
 0x13f   :  { %2905 = vmatpush2.bf16.msra.mxu0 %v5676_v59  ;;  %v146_v37 = vld [vmem:[#allocation2 + $0x118] sm:$0xff] }
 0x140   :  { %2948 = vmatpush2.bf16.msra.mxu1 %v5804_v46  ;;  %2906 = vmatprep.subr.bf16.mxu0 %v5669_v48  ;;  %v497_v46 = vld [vmem:[#allocation2 + $0xc10] sm:$0xff]  ;;  %v150_v38 = vld [vmem:[#allocation2 + $0x138] sm:$0xff] }
 0x141   :  { %2949 = vmatprep.subr.bf16.mxu1 %v5797_v49  ;;  %v501_v48 = vld [vmem:[#allocation2 + $0xc30] sm:$0xff] }
 0x142   :  { %v5940_v22 = vcombine.low %v497_v46, %v501_v48 }
 0x143   :  { %2907 = vmatpush2.bf16.msra.mxu0 %v5668_v54  ;;  %v5869_v54 = vcombine.high %v425_v44, %v429_v45 }
 0x144   :  { %2950 = vmatpush2.bf16.msra.mxu1 %v5796_v55  ;;  %2908 = vmatprep.subr.bf16.mxu0 %v5661_v57 }
 0x145   :  { %2951 = vmatprep.subr.bf16.mxu1 %v5789_v58  ;;  %v5941_v58 = vcombine.high %v497_v46, %v501_v48  ;;  %v5590_v46 = vcombine.low %v146_v37, %v150_v38 }
 0x147   :  { %2909 = vmatpush2.bf16.msra.mxu0 %v5660_v63  ;;  %v174_v63 = vld [vmem:[#allocation2 + $0x1f8] sm:$0xff] }
 0x148   :  { %2952 = vmatpush2.bf16.msra.mxu1 %v5788_v0  ;;  %2910 = vmatprep.subr.bf16.mxu0 %v5653_v1  ;;  %v5868_v1 = vcombine.low %v425_v44, %v429_v45  ;;  %v5615_v5 = vcombine.high %v170_v62, %v174_v63  ;;  %v138_v44 = vld [vmem:[#allocation2 + $0xd8] sm:$0xff] }
 0x149   :  { %2953 = vmatprep.subr.bf16.mxu1 %v5781_v2  ;;  %v142_v45 = vld [vmem:[#allocation2 + $0xf8] sm:$0xff] }
 0x14a   :  { %v5583_v48 = vcombine.high %v138_v44, %v142_v45 }
 0x14b   :  { %2911 = vmatpush2.bf16.msra.mxu0 %v5652_v6  ;;  %v409_v6 = vld [vmem:[#allocation2 + $0x950] sm:$0xff] }
 0x14c   :  { %2954 = vmatpush2.bf16.msra.mxu1 %v5780_v8  ;;  %2912 = vmatprep.subr.bf16.mxu0 %v5645_v9  ;;  %v7036_v8 = vld [vmem:[%s7180_s0] ss:$28 sps:$4 sm:$0xff]   ;;  %v5860_v9 = vcombine.low %v417_v60, %v421_v56 }
 0x14d   :  { %2955 = vmatprep.subr.bf16.mxu1 %v5773_v10  ;;  %v5853_v10 = vcombine.high %v409_v6, %v413_v7 }
 0x14f   :  { %2913 = vmatpush2.bf16.msra.mxu0 %v5644_v17  ;;  %v7044_v17 = vld [vmem:[%s7180_s0 + $0x14] ss:$28 sps:$4 sm:$0xff]  }
 0x150   :  { %2956 = vmatpush2.bf16.msra.mxu1 %v5772_v19  ;;  %2914 = vmatprep.subr.bf16.mxu0 %v5637_v20  ;;  %v5614_v19 = vcombine.low %v170_v62, %v174_v63  ;;  %v5845_v20 = vcombine.high %v401_v11, %v405_v13  ;;  %v493_v62 = vld [vmem:[#allocation2 + $0xbf0] sm:$0xff]  ;;  %v122_v63 = vld [vmem:[#allocation2 + $0x58] sm:$0xff] }
 0x151   :  { %2957 = vmatprep.subr.bf16.mxu1 %v5765_v21  ;;  %v5607_v21 = vcombine.high %v162_v14, %v166_v16 }
 0x153   :  { %2915 = vmatpush2.bf16.msra.mxu0 %v5636_v27  ;;  %v5844_v27 = vcombine.low %v401_v11, %v405_v13 }
 0x154   :  { %2958 = vmatpush2.bf16.msra.mxu1 %v5764_v30  ;;  %2916 = vmatprep.subr.bf16.mxu0 %v5629_v31  ;;  %v5606_v30 = vcombine.low %v162_v14, %v166_v16  ;;  %v5837_v31 = vcombine.high %v393_v23, %v397_v24  ;;  %v473_v16 = vld [vmem:[#allocation2 + $0xb50] sm:$0xff] }
 0x155   :  { %2959 = vmatprep.subr.bf16.mxu1 %v5757_v33  ;;  %v5599_v33 = vcombine.high %v154_v25, %v158_v26 }
 0x156   :  { %v2578_v59 = vpop.f32.mrf.mxu0  ;;  %v2621_v50 = vpop.f32.mrf.mxu1 }
 0x157   :  { %v2579_v49 = vadd.f32 %v2578_v59, %v508_v40  ;;  %2917 = vmatpush2.bf16.msra.mxu0 %v5628_v39  ;;  %v5836_v39 = vcombine.low %v393_v23, %v397_v24  ;;  %v5828_v59 = vcombine.low %v385_v35, %v389_v36 }
 0x158   :  { %2960 = vmatpush2.bf16.msra.mxu1 %v5756_v41  ;;  %v7025_v52 = vpop.f32.mrf.mxu0  ;;  %2918 = vmatprep.subr.bf16.mxu0 %v5621_v42  ;;  %v7029_v57 = vpop.f32.mrf.mxu1  ;;  %v5591_v41 = vcombine.high %v146_v37, %v150_v38  ;;  %v377_v42 = vld [vmem:[#allocation2 + $0x850] sm:$0xff] }
 0x159   :  { %v7027_v55 = vadd.f32 %v2621_v50, %v2579_v49  ;;  %2961 = vmatprep.subr.bf16.mxu1 %v5749_v43  ;;  %v381_v43 = vld [vmem:[#allocation2 + $0x870] sm:$0xff] }
 0x15a   :  { %v2582_v61 = vpop.f32.mrf.mxu0  ;;  %v2625_v2 = vpop.f32.mrf.mxu1  ;;  %v369_v49 = vld [vmem:[#allocation2 + $0x810] sm:$0xff] }
 0x15b   :  { %v2583_v0 = vadd.f32 %v2582_v61, %v508_v40  ;;  %2919 = vmatpush2.bf16.msra.mxu0 %v5620_v51  ;;  %v5598_v40 = vcombine.low %v154_v25, %v158_v26  ;;  %v373_v50 = vld [vmem:[#allocation2 + $0x830] sm:$0xff]  ;;  %v130_v51 = vld [vmem:[#allocation2 + $0x98] sm:$0xff] }
 0x15c   :  { %2962 = vmatpush2.bf16.msra.mxu1 %v5748_v53  ;;  %2974 = vmatprep.subr.bf16.mxu0 %v5869_v54  ;;  %v134_v53 = vld [vmem:[#allocation2 + $0xb8] sm:$0xff]  ;;  %v5820_v54 = vcombine.low %v377_v42, %v381_v43  ;;  %v5813_v60 = vcombine.high %v369_v49, %v373_v50  ;;  %v489_v61 = vld [vmem:[#allocation2 + $0xbd0] sm:$0xff] }
 0x15d   :  { %v7031_v4 = vadd.f32 %v2625_v2, %v2583_v0  ;;  %3031 = vmatprep.subr.bf16.mxu1 %v5941_v58  ;;  %v5582_v58 = vcombine.low %v138_v44, %v142_v45  ;;  %v5575_v56 = vcombine.high %v130_v51, %v134_v53  ;;  %v126_v0 = vld [vmem:[#allocation2 + $0x78] sm:$0xff]  ;;  %v5574_v2 = vcombine.low %v130_v51, %v134_v53  ;;  %v465_v26 = vld [vmem:[#allocation2 + $0xb10] sm:$0xff] }
 0x15e   :  { %2921 = vmatmul.mubr.bf16.vlgmr.msra.gmra.mxu0 %v7036_v8  ;;  %v5566_v11 = vcombine.low %v122_v63, %v126_v0  ;;  %v457_v38 = vld [vmem:[#allocation2 + $0xad0] sm:$0xff] }
 0x15f   :  { %2964 = vmatmul.mubr.bf16.vlgmr.msra.gmra.mxu1 %v6993_v34  ;;  %2975 = vmatpush1.bf16.msra.mxu0 %v5868_v1  ;;  %v5852_v34 = vcombine.low %v409_v6, %v413_v7  ;;  %v5812_v1 = vcombine.low %v369_v49, %v373_v50  ;;  %v485_v6 = vld [vmem:[#allocation2 + $0xbb0] sm:$0xff]  ;;  %v114_v7 = vld [vmem:[#allocation2 + $0x18] sm:$0xff] }
 0x160   :  { %3032 = vmatpush1.bf16.msra.mxu1 %v5940_v22  ;;  %2976 = vmatprep.subr.bf16.mxu0 %v5861_v3  ;;  %v5933_v22 = vcombine.high %v489_v61, %v493_v62  ;;  %v5567_v3 = vcombine.high %v122_v63, %v126_v0  ;;  %v449_v45 = vld [vmem:[#allocation2 + $0xa90] sm:$0xff] }
 0x161   :  { %3049 = vmatprep.mubr.bf16.mxu1 %v6889_v28  ;;  %3060 = vmatprep.subr.bf16.mxu1 %v5615_v5  ;;  %v481_v5 = vld [vmem:[#allocation2 + $0xb90] sm:$0xff] }
 0x162   :  { %3006 = vmatprep.mubr.bf16.mxu0 %v7044_v17  ;;  %v5925_v13 = vcombine.high %v481_v5, %v485_v6  ;;  %v441_v53 = vld [vmem:[#allocation2 + $0xa50] sm:$0xff] }
 0x163   :  { %2977 = vmatpush1.bf16.msra.mxu0 %v5860_v9  ;;  %v118_v9 = vld [vmem:[#allocation2 + $0x38] sm:$0xff] }
 0x164   :  { %2978 = vmatprep.subr.bf16.mxu0 %v5853_v10  ;;  %v5932_v10 = vcombine.low %v489_v61, %v493_v62  ;;  %v5559_v14 = vcombine.high %v114_v7, %v118_v9  ;;  %v5558_v23 = vcombine.low %v114_v7, %v118_v9  ;;  %v7050_v61 = vpop.f32.mrf.mxu1 }
 0x166   :  { %v2707_v7 = vpop.f32.mrf.mxu1 }
 0x167   :  { %5946 = vmatmul.mubr.msk.bf16.vlgmr.msra.gmra.mxu1 %vm2540_vm0, %v7000_v47  ;;  %2979 = vmatpush1.bf16.msra.mxu0 %v5852_v34  ;;  %v5829_v47 = vcombine.high %v385_v35, %v389_v36  ;;  %v477_v34 = vld [vmem:[#allocation2 + $0xb70] sm:$0xff] }
 0x168   :  { %3061 = vmatpush1.bf16.msra.mxu1 %v5614_v19  ;;  %2980 = vmatprep.subr.bf16.mxu0 %v5845_v20  ;;  %v234_v19 = vld [vmem:[#allocation2 + $0x3d8] sm:$0xff]  ;;  %v5917_v24 = vcombine.high %v473_v16, %v477_v34 }
 0x169   :  { %3062 = vmatprep.subr.bf16.mxu1 %v5607_v21  ;;  %3092 = vmatprep.mubr.bf16.mxu1 %v7008_v12  ;;  %v5821_v12 = vcombine.high %v377_v42, %v381_v43  ;;  %v238_v20 = vld [vmem:[#allocation2 + $0x3f8] sm:$0xff]  ;;  %v5924_v21 = vcombine.low %v481_v5, %v485_v6  ;;  %v7052_v6 = vpop.f32.mrf.mxu0 }
 0x16a   :  { %v5679_v25 = vcombine.high %v234_v19, %v238_v20  ;;  %v5678_v35 = vcombine.low %v234_v19, %v238_v20  ;;  %v190_v19 = vld [vmem:[#allocation2 + $0x278] sm:$0xff] }
 0x16b   :  { %2981 = vmatpush1.bf16.msra.mxu0 %v5844_v27  ;;  %v469_v27 = vld [vmem:[#allocation2 + $0xb30] sm:$0xff] }
 0x16c   :  { %3063 = vmatpush1.bf16.msra.mxu1 %v5606_v30  ;;  %2982 = vmatprep.subr.bf16.mxu0 %v5837_v31  ;;  %v226_v30 = vld [vmem:[#allocation2 + $0x398] sm:$0xff]  ;;  %v5909_v36 = vcombine.high %v465_v26, %v469_v27 }
 0x16d   :  { %3064 = vmatprep.subr.bf16.mxu1 %v5599_v33  ;;  %v230_v31 = vld [vmem:[#allocation2 + $0x3b8] sm:$0xff]  ;;  %v5916_v33 = vcombine.low %v473_v16, %v477_v34 }
 0x16e   :  { %v5671_v37 = vcombine.high %v226_v30, %v230_v31  ;;  %v5670_v42 = vcombine.low %v226_v30, %v230_v31  ;;  %v186_v34 = vld [vmem:[#allocation2 + $0x258] sm:$0xff] }
 0x16f   :  { %2983 = vmatpush1.bf16.msra.mxu0 %v5836_v39  ;;  %v461_v39 = vld [vmem:[#allocation2 + $0xaf0] sm:$0xff]  ;;  %v5631_v30 = vcombine.high %v186_v34, %v190_v19  ;;  %v290_v31 = vld [vmem:[#allocation2 + $0x598] sm:$0xff] }
 0x170   :  { %3065 = vmatpush1.bf16.msra.mxu1 %v5598_v40  ;;  %2984 = vmatprep.subr.bf16.mxu0 %v5829_v47  ;;  %v218_v40 = vld [vmem:[#allocation2 + $0x358] sm:$0xff]  ;;  %v5901_v43 = vcombine.high %v457_v38, %v461_v39 }
 0x171   :  { %3066 = vmatprep.subr.bf16.mxu1 %v5591_v41  ;;  %v222_v47 = vld [vmem:[#allocation2 + $0x378] sm:$0xff]  ;;  %v5908_v41 = vcombine.low %v465_v26, %v469_v27 }
 0x172   :  { %v5663_v44 = vcombine.high %v218_v40, %v222_v47  ;;  %v5662_v49 = vcombine.low %v218_v40, %v222_v47  ;;  %v5630_v40 = vcombine.low %v186_v34, %v190_v19 }
 0x173   :  { %2985 = vmatpush1.bf16.msra.mxu0 %v5828_v59  ;;  %v453_v59 = vld [vmem:[#allocation2 + $0xab0] sm:$0xff] }
 0x174   :  { %3067 = vmatpush1.bf16.msra.mxu1 %v5590_v46  ;;  %2986 = vmatprep.subr.bf16.mxu0 %v5821_v12  ;;  %v210_v46 = vld [vmem:[#allocation2 + $0x318] sm:$0xff]  ;;  %v5893_v50 = vcombine.high %v449_v45, %v453_v59 }
 0x175   :  { %3068 = vmatprep.subr.bf16.mxu1 %v5583_v48  ;;  %v214_v12 = vld [vmem:[#allocation2 + $0x338] sm:$0xff]  ;;  %v5900_v48 = vcombine.low %v457_v38, %v461_v39 }
 0x176   :  { %v5655_v51 = vcombine.high %v210_v46, %v214_v12  ;;  %v5654_v62 = vcombine.low %v210_v46, %v214_v12 }
 0x177   :  { %2987 = vmatpush1.bf16.msra.mxu0 %v5820_v54  ;;  %v445_v54 = vld [vmem:[#allocation2 + $0xa70] sm:$0xff] }
 0x178   :  { %3069 = vmatpush1.bf16.msra.mxu1 %v5582_v58  ;;  %2988 = vmatprep.subr.bf16.mxu0 %v5813_v60  ;;  %v202_v58 = vld [vmem:[#allocation2 + $0x2d8] sm:$0xff]  ;;  %v5885_v63 = vcombine.high %v441_v53, %v445_v54  ;;  %v5884_v5 = vcombine.low %v441_v53, %v445_v54 }
 0x179   :  { %3070 = vmatprep.subr.bf16.mxu1 %v5575_v56  ;;  %v206_v60 = vld [vmem:[#allocation2 + $0x2f8] sm:$0xff]  ;;  %v5892_v56 = vcombine.low %v449_v45, %v453_v59  ;;  %v7063_v45 = vld [vmem:[%s7180_s0 + $0x10] ss:$28 sps:$4 sm:$0xff]  }
 0x17a   :  { %v5647_v0 = vcombine.high %v202_v58, %v206_v60  ;;  %v5646_v9 = vcombine.low %v202_v58, %v206_v60  ;;  %v430_v59 = vld [vmem:[#allocation2 + $0x9f8] sm:$0xff] }
 0x17b   :  { %2989 = vmatpush1.bf16.msra.mxu0 %v5812_v1  ;;  %v433_v1 = vld [vmem:[#allocation2 + $0xa10] sm:$0xff]  ;;  %v274_v54 = vld [vmem:[#allocation2 + $0x518] sm:$0xff] }
 0x17c   :  { %3071 = vmatpush1.bf16.msra.mxu1 %v5574_v2  ;;  %2990 = vmatprep.subr.bf16.mxu0 %v5933_v22  ;;  %v437_v2 = vld [vmem:[#allocation2 + $0xa30] sm:$0xff]  ;;  %v194_v22 = vld [vmem:[#allocation2 + $0x298] sm:$0xff] }
 0x17d   :  { %3072 = vmatprep.subr.bf16.mxu1 %v5567_v3  ;;  %v198_v3 = vld [vmem:[#allocation2 + $0x2b8] sm:$0xff] }
 0x17e   :  { %v278_v58 = vld [vmem:[#allocation2 + $0x538] sm:$0xff] }
 0x17f   :  { %2991 = vmatpush2.bf16.msra.mxu0 %v5932_v10  ;;  %v5877_v10 = vcombine.high %v433_v1, %v437_v2  ;;  %v418_v60 = vld [vmem:[#allocation2 + $0x998] sm:$0xff] }
 0x180   :  { %3073 = vmatpush1.bf16.msra.mxu1 %v5566_v11  ;;  %2992 = vmatprep.subr.bf16.mxu0 %v5925_v13  ;;  %v5639_v11 = vcombine.high %v194_v22, %v198_v3  ;;  %v298_v13 = vld [vmem:[#allocation2 + $0x5d8] sm:$0xff] }
 0x181   :  { %3074 = vmatprep.subr.bf16.mxu1 %v5559_v14  ;;  %v302_v14 = vld [vmem:[#allocation2 + $0x5f8] sm:$0xff] }
 0x182   :  { %v5743_v26 = vcombine.high %v298_v13, %v302_v14  ;;  %v5742_v38 = vcombine.low %v298_v13, %v302_v14  ;;  %v262_v13 = vld [vmem:[#allocation2 + $0x4b8] sm:$0xff] }
 0x183   :  { %2993 = vmatpush2.bf16.msra.mxu0 %v5924_v21  ;;  %v5876_v21 = vcombine.low %v433_v1, %v437_v2  ;;  %v266_v1 = vld [vmem:[#allocation2 + $0x4d8] sm:$0xff] }
 0x184   :  { %3075 = vmatpush1.bf16.msra.mxu1 %v5558_v23  ;;  %2994 = vmatprep.subr.bf16.mxu0 %v5917_v24  ;;  %v7055_v23 = vpop.f32.mrf.mxu1  ;;  %v270_v2 = vld [vmem:[#allocation2 + $0x4f8] sm:$0xff] }
 0x185   :  { %3076 = vmatprep.subr.bf16.mxu1 %v5679_v25  ;;  %v5638_v25 = vcombine.low %v194_v22, %v198_v3  ;;  %v410_v22 = vld [vmem:[#allocation2 + $0x958] sm:$0xff]  ;;  %v5710_v34 = vcombine.low %v266_v1, %v270_v2 }
 0x186   :  { %v2711_v39 = vpop.f32.mrf.mxu1  ;;  %v414_v3 = vld [vmem:[#allocation2 + $0x978] sm:$0xff] }
 0x187   :  { %2995 = vmatpush2.bf16.msra.mxu0 %v5916_v33  ;;  %v294_v33 = vld [vmem:[#allocation2 + $0x5b8] sm:$0xff]  ;;  %v5854_v19 = vcombine.low %v410_v22, %v414_v3 }
 0x188   :  { %3077 = vmatpush2.bf16.msra.mxu1 %v5678_v35  ;;  %2996 = vmatprep.subr.bf16.mxu0 %v5909_v36  ;;  %v178_v36 = vld [vmem:[#allocation2 + $0x218] sm:$0xff]  ;;  %v5735_v47 = vcombine.high %v290_v31, %v294_v33 }
 0x189   :  { %3078 = vmatprep.subr.bf16.mxu1 %v5671_v37  ;;  %v182_v37 = vld [vmem:[#allocation2 + $0x238] sm:$0xff] }
 0x18a   :  { %v402_v14 = vld [vmem:[#allocation2 + $0x918] sm:$0xff] }
 0x18b   :  { %2997 = vmatpush2.bf16.msra.mxu0 %v5908_v41 }
 0x18c   :  { %3079 = vmatpush2.bf16.msra.mxu1 %v5670_v42  ;;  %2998 = vmatprep.subr.bf16.mxu0 %v5901_v43  ;;  %v5623_v42 = vcombine.high %v178_v36, %v182_v37  ;;  %v282_v43 = vld [vmem:[#allocation2 + $0x558] sm:$0xff] }
 0x18d   :  { %3080 = vmatprep.subr.bf16.mxu1 %v5663_v44  ;;  %v286_v44 = vld [vmem:[#allocation2 + $0x578] sm:$0xff] }
 0x18f   :  { %2999 = vmatpush2.bf16.msra.mxu0 %v5900_v48  ;;  %v5734_v48 = vcombine.low %v290_v31, %v294_v33 }
 0x190   :  { %3081 = vmatpush2.bf16.msra.mxu1 %v5662_v49  ;;  %3000 = vmatprep.subr.bf16.mxu0 %v5893_v50  ;;  %v5622_v49 = vcombine.low %v178_v36, %v182_v37  ;;  %v5727_v50 = vcombine.high %v282_v43, %v286_v44  ;;  %v246_v36 = vld [vmem:[#allocation2 + $0x438] sm:$0xff] }
 0x191   :  { %3082 = vmatprep.subr.bf16.mxu1 %v5655_v51  ;;  %v386_v37 = vld [vmem:[#allocation2 + $0x898] sm:$0xff] }
 0x193   :  { %3001 = vmatpush2.bf16.msra.mxu0 %v5892_v56  ;;  %v422_v56 = vld [vmem:[#allocation2 + $0x9b8] sm:$0xff] }
 0x194   :  { %3083 = vmatpush2.bf16.msra.mxu1 %v5654_v62  ;;  %3002 = vmatprep.subr.bf16.mxu0 %v5885_v63  ;;  %v5726_v62 = vcombine.low %v282_v43, %v286_v44  ;;  %v378_v43 = vld [vmem:[#allocation2 + $0x858] sm:$0xff] }
 0x195   :  { %3084 = vmatprep.subr.bf16.mxu1 %v5647_v0  ;;  %v5719_v0 = vcombine.high %v274_v54, %v278_v58  ;;  %v382_v44 = vld [vmem:[#allocation2 + $0x878] sm:$0xff] }
 0x196   :  { %v2664_v16 = vpop.f32.mrf.mxu0 }
 0x197   :  { %v2665_v20 = vadd.f32 %v2664_v16, %v7027_v55  ;;  %3003 = vmatpush2.bf16.msra.mxu0 %v5884_v5  ;;  %v5718_v5 = vcombine.low %v274_v54, %v278_v58  ;;  %v406_v16 = vld [vmem:[#allocation2 + $0x938] sm:$0xff]  ;;  %v5822_v58 = vcombine.low %v378_v43, %v382_v44 }
 0x198   :  { %3085 = vmatpush2.bf16.msra.mxu1 %v5646_v9  ;;  %v7057_v24 = vpop.f32.mrf.mxu0  ;;  %3004 = vmatprep.subr.bf16.mxu0 %v5877_v10  ;;  %v5711_v9 = vcombine.high %v266_v1, %v270_v2  ;;  %v5855_v10 = vcombine.high %v410_v22, %v414_v3  ;;  %v5846_v31 = vcombine.low %v402_v14, %v406_v16 }
 0x199   :  { %v2708_v27 = vadd.f32 %v2707_v7, %v2665_v20  ;;  %3086 = vmatprep.subr.bf16.mxu1 %v5639_v11  ;;  %v5862_v7 = vcombine.low %v418_v60, %v422_v56  ;;  %v258_v11 = vld [vmem:[#allocation2 + $0x498] sm:$0xff]  ;;  %v5847_v20 = vcombine.high %v402_v14, %v406_v16 }
 0x19a   :  { %v2668_v35 = vpop.f32.mrf.mxu0 }
 0x19b   :  { %v2669_v55 = vadd.f32 %v2668_v35, %v7031_v4  ;;  %3005 = vmatpush2.bf16.msra.mxu0 %v5876_v21  ;;  %v426_v4 = vld [vmem:[#allocation2 + $0x9d8] sm:$0xff]  ;;  %v3232_v46 = vmax.f32 %v2708_v27, 0.0 }
 0x19c   :  { %3087 = vmatpush2.bf16.msra.mxu1 %v5638_v25  ;;  %3103 = vmatprep.subr.bf16.mxu0 %v5743_v26  ;;  %v5871_v53 = vcombine.high %v426_v4, %v430_v59  ;;  %v5870_v63 = vcombine.low %v426_v4, %v430_v59  ;;  %v250_v21 = vld [vmem:[#allocation2 + $0x458] sm:$0xff] }
 0x19d   :  { %v2712_v41 = vadd.f32 %v2711_v39, %v2669_v55  ;;  %3088 = vmatprep.subr.bf16.mxu1 %v5631_v30  ;;  %v254_v25 = vld [vmem:[#allocation2 + $0x478] sm:$0xff]  ;;  %v5702_v30 = vcombine.low %v258_v11, %v262_v13 }
 0x19e   :  { %3007 = vmatmul.mubr.bf16.vlgmr.msra.gmra.mxu0 %v7063_v45  ;;  %v394_v26 = vld [vmem:[#allocation2 + $0x8d8] sm:$0xff] }
 0x19f   :  { %v3240_v12 = vmax.f32 %v2712_v41, 0.0  ;;  %3104 = vmatpush1.bf16.msra.mxu0 %v5742_v38  ;;  %3135 = vmatprep.mubr.bf16.mxu0 %v7014_v15  ;;  %v5863_v15 = vcombine.high %v418_v60, %v422_v56  ;;  %v398_v27 = vld [vmem:[#allocation2 + $0x8f8] sm:$0xff]  ;;  %v5694_v38 = vcombine.low %v250_v21, %v254_v25 }
 0x1a0   :  { %3089 = vmatpush2.bf16.msra.mxu1 %v5630_v40  ;;  %3105 = vmatprep.subr.bf16.mxu0 %v5735_v47  ;;  %v5839_v33 = vcombine.high %v394_v26, %v398_v27  ;;  %v242_v35 = vld [vmem:[#allocation2 + $0x418] sm:$0xff]  ;;  %v5838_v39 = vcombine.low %v394_v26, %v398_v27 }
 0x1a1   :  { %v7067_v51 = vpack.c.bf16 %v3240_v12, %v3232_v46  ;;  %3090 = vmatprep.subr.bf16.mxu1 %v5623_v42  ;;  %v390_v55 = vld [vmem:[#allocation2 + $0x8b8] sm:$0xff]  ;;  %v5687_v40 = vcombine.high %v242_v35, %v246_v36  ;;  %v5686_v4 = vcombine.low %v242_v35, %v246_v36  ;;  %v5823_v12 = vcombine.high %v378_v43, %v382_v44  ;;  %v7073_v43 = vpop.f32.mrf.mxu1 }
 0x1a2   :  { %v5831_v47 = vcombine.high %v386_v37, %v390_v55  ;;  %v362_v41 = vld [vmem:[#allocation2 + $0x7d8] sm:$0xff]  ;;  %v5830_v59 = vcombine.low %v386_v37, %v390_v55  ;;  %v515_v55 = vsub.s32 2, %v7017_v18 }
 0x1a3   :  { %3106 = vmatpush1.bf16.msra.mxu0 %v5734_v48  ;;  %v366_v42 = vld [vmem:[#allocation2 + $0x7f8] sm:$0xff] }
 0x1a4   :  { %3091 = vmatpush2.bf16.msra.mxu1 %v5622_v49  ;;  %3107 = vmatprep.subr.bf16.mxu0 %v5727_v50  ;;  %v5807_v46 = vcombine.high %v362_v41, %v366_v42  ;;  %v354_v48 = vld [vmem:[#allocation2 + $0x798] sm:$0xff]  ;;  %v5806_v54 = vcombine.low %v362_v41, %v366_v42 }
 0x1a5   :  { %3146 = vmatprep.subr.bf16.mxu1 %v5871_v53  ;;  %v358_v49 = vld [vmem:[#allocation2 + $0x7b8] sm:$0xff] }
 0x1a6   :  { %v370_v50 = vld [vmem:[#allocation2 + $0x818] sm:$0xff]  ;;  %v5799_v60 = vcombine.high %v354_v48, %v358_v49  ;;  %v5798_v1 = vcombine.low %v354_v48, %v358_v49 }
 0x1a7   :  { %3093 = vmatmul.mubr.bf16.vlgmr.msra.gmra.mxu1 %v7036_v8  ;;  %3108 = vmatpush1.bf16.msra.mxu0 %v5726_v62  ;;  %v5703_v8 = vcombine.high %v258_v11, %v262_v13  ;;  %v374_v53 = vld [vmem:[#allocation2 + $0x838] sm:$0xff] }
 0x1a8   :  { %3147 = vmatpush1.bf16.msra.mxu1 %v5870_v63  ;;  %3109 = vmatprep.subr.bf16.mxu0 %v5719_v0  ;;  %v5815_v56 = vcombine.high %v370_v50, %v374_v53  ;;  %v346_v62 = vld [vmem:[#allocation2 + $0x758] sm:$0xff]  ;;  %v5814_v2 = vcombine.low %v370_v50, %v374_v53 }
 0x1a9   :  { %3148 = vmatprep.subr.bf16.mxu1 %v5863_v15  ;;  %3178 = vmatprep.mubr.bf16.mxu1 %v7044_v17  ;;  %v5695_v17 = vcombine.high %v250_v21, %v254_v25  ;;  %v350_v63 = vld [vmem:[#allocation2 + $0x778] sm:$0xff] }
 0x1aa   :  { %v490_v0 = vld [vmem:[#allocation2 + $0xbd8] sm:$0xff]  ;;  %v5791_v22 = vcombine.high %v346_v62, %v350_v63  ;;  %v5790_v11 = vcombine.low %v346_v62, %v350_v63  ;;  %v2670_v62 = vpop.f32.mrf.mxu0 }
 0x1ab   :  { %3110 = vmatpush1.bf16.msra.mxu0 %v5718_v5  ;;  %v494_v15 = vld [vmem:[#allocation2 + $0xbf8] sm:$0xff] }
 0x1ac   :  { %3149 = vmatpush1.bf16.msra.mxu1 %v5862_v7  ;;  %3111 = vmatprep.subr.bf16.mxu0 %v5711_v9  ;;  %v5935_v3 = vcombine.high %v490_v0, %v494_v15  ;;  %v338_v5 = vld [vmem:[#allocation2 + $0x718] sm:$0xff]  ;;  %v5934_v13 = vcombine.low %v490_v0, %v494_v15 }
 0x1ad   :  { %3150 = vmatprep.subr.bf16.mxu1 %v5855_v10  ;;  %v342_v7 = vld [vmem:[#allocation2 + $0x738] sm:$0xff] }
 0x1ae   :  { %v482_v9 = vld [vmem:[#allocation2 + $0xb98] sm:$0xff]  ;;  %v5783_v14 = vcombine.high %v338_v5, %v342_v7  ;;  %v5782_v21 = vcombine.low %v338_v5, %v342_v7  ;;  %v519_v7 = vsub.s32 3, %v7017_v18 }
 0x1af   :  { %3112 = vmatpush1.bf16.msra.mxu0 %v5710_v34  ;;  %v486_v10 = vld [vmem:[#allocation2 + $0xbb8] sm:$0xff] }
 0x1b0   :  { %3151 = vmatpush1.bf16.msra.mxu1 %v5854_v19  ;;  %3113 = vmatprep.subr.bf16.mxu0 %v5703_v8  ;;  %v5927_v16 = vcombine.high %v482_v9, %v486_v10  ;;  %v330_v34 = vld [vmem:[#allocation2 + $0x6d8] sm:$0xff]  ;;  %v5926_v25 = vcombine.low %v482_v9, %v486_v10 }
 0x1b1   :  { %3152 = vmatprep.subr.bf16.mxu1 %v5847_v20  ;;  %v334_v19 = vld [vmem:[#allocation2 + $0x6f8] sm:$0xff] }
 0x1b2   :  { %v474_v8 = vld [vmem:[#allocation2 + $0xb58] sm:$0xff]  ;;  %v5775_v26 = vcombine.high %v330_v34, %v334_v19  ;;  %v5774_v35 = vcombine.low %v330_v34, %v334_v19 }
 0x1b3   :  { %3114 = vmatpush1.bf16.msra.mxu0 %v5702_v30  ;;  %v478_v20 = vld [vmem:[#allocation2 + $0xb78] sm:$0xff] }
 0x1b4   :  { %3153 = vmatpush1.bf16.msra.mxu1 %v5846_v31  ;;  %3115 = vmatprep.subr.bf16.mxu0 %v5695_v17  ;;  %v5919_v27 = vcombine.high %v474_v8, %v478_v20  ;;  %v322_v30 = vld [vmem:[#allocation2 + $0x698] sm:$0xff]  ;;  %v5918_v36 = vcombine.low %v474_v8, %v478_v20 }
 0x1b5   :  { %3154 = vmatprep.subr.bf16.mxu1 %v5839_v33  ;;  %v326_v31 = vld [vmem:[#allocation2 + $0x6b8] sm:$0xff] }
 0x1b6   :  { %v466_v17 = vld [vmem:[#allocation2 + $0xb18] sm:$0xff]  ;;  %v5767_v37 = vcombine.high %v322_v30, %v326_v31  ;;  %v5766_v44 = vcombine.low %v322_v30, %v326_v31 }
 0x1b7   :  { %3116 = vmatpush1.bf16.msra.mxu0 %v5694_v38  ;;  %v470_v33 = vld [vmem:[#allocation2 + $0xb38] sm:$0xff] }
 0x1b8   :  { %3155 = vmatpush1.bf16.msra.mxu1 %v5838_v39  ;;  %3117 = vmatprep.subr.bf16.mxu0 %v5687_v40  ;;  %v5911_v38 = vcombine.high %v466_v17, %v470_v33  ;;  %v314_v39 = vld [vmem:[#allocation2 + $0x658] sm:$0xff] }
 0x1b9   :  { %3156 = vmatprep.subr.bf16.mxu1 %v5831_v47  ;;  %v318_v40 = vld [vmem:[#allocation2 + $0x678] sm:$0xff]  ;;  %v511_v47 = vsub.s32 1, %v7017_v18 }
 0x1ba   :  { %v458_v41 = vld [vmem:[#allocation2 + $0xad8] sm:$0xff] }
 0x1bb   :  { %3118 = vmatpush1.bf16.msra.mxu0 %v5686_v4  ;;  %v462_v42 = vld [vmem:[#allocation2 + $0xaf8] sm:$0xff]  ;;  %v5910_v4 = vcombine.low %v466_v17, %v470_v33  ;;  %v512_v53 = vrot.slane %v7020_v32, %v511_v47 }
 0x1bc   :  { %3157 = vmatpush1.bf16.msra.mxu1 %v5830_v59  ;;  %3119 = vmatprep.subr.bf16.mxu0 %v5807_v46  ;;  %v5759_v59 = vcombine.high %v314_v39, %v318_v40  ;;  %v7078_v46 = vrot.slane %v7020_v32, %v515_v55  ;;  %v5903_v48 = vcombine.high %v458_v41, %v462_v42  ;;  %v306_v49 = vld [vmem:[#allocation2 + $0x618] sm:$0xff] }
 0x1bd   :  { %3158 = vmatprep.subr.bf16.mxu1 %v5823_v12  ;;  %v2750_v12 = vpop.f32.mrf.mxu1  ;;  %v310_v50 = vld [vmem:[#allocation2 + $0x638] sm:$0xff]  ;;  %v5902_v63 = vcombine.low %v458_v41, %v462_v42  ;;  %v2581_v5 = vadd.f32 %v7025_v52, %v512_v53 }
 0x1be   :  { %v5751_v0 = vcombine.high %v306_v49, %v310_v50  ;;  %v2751_v15 = vadd.f32 %v2750_v12, %v7078_v46  ;;  %v442_v10 = vld [vmem:[#allocation2 + $0xa58] sm:$0xff] }
 0x1bf   :  { %3120 = vmatpush2.bf16.msra.mxu0 %v5806_v54  ;;  %v450_v54 = vld [vmem:[#allocation2 + $0xa98] sm:$0xff]  ;;  %v2624_v20 = vadd.f32 %v7029_v57, %v2581_v5 }
 0x1c0   :  { %3159 = vmatpush1.bf16.msra.mxu1 %v5822_v58  ;;  %3121 = vmatprep.subr.bf16.mxu0 %v5799_v60  ;;  %v454_v58 = vld [vmem:[#allocation2 + $0xab8] sm:$0xff]  ;;  %v5758_v60 = vcombine.low %v314_v39, %v318_v40 }
 0x1c1   :  { %3160 = vmatprep.subr.bf16.mxu1 %v5815_v56  ;;  %v2585_v56 = vadd.f32 %v7052_v6, %v512_v53  ;;  %v5894_v34 = vcombine.low %v450_v54, %v454_v58  ;;  %v2667_v31 = vadd.f32 %v7057_v24, %v2624_v20  ;;  %v6315_v53 = vld [vmem:[#allocation6 + $0xe0] ss:$16 sps:$4 sm:$0xff]   ;;  %v6329_v5 = vld [vmem:[#allocation6 + $0xa4] ss:$16 sps:$4 sm:$0xff]  }
 0x1c2   :  { %v6341_v20 = vld [vmem:[#allocation6 + $0x64] ss:$16 sps:$4 sm:$0xff]  }
 0x1c3   :  { %3122 = vmatpush2.bf16.msra.mxu0 %v5798_v1  ;;  %v2752_v1 = vpop.f32.mrf.mxu1  ;;  %v2710_v24 = vadd.f32 %v7055_v23, %v2667_v31  ;;  %v6318_v23 = vld [vmem:[#allocation6 + $0x2e0] ss:$16 sps:$4 sm:$0xff]  }
 0x1c4   :  { %3161 = vmatpush1.bf16.msra.mxu1 %v5814_v2  ;;  %3123 = vmatprep.subr.bf16.mxu0 %v5791_v22  ;;  %v5895_v2 = vcombine.high %v450_v54, %v454_v58  ;;  %v498_v22 = vld [vmem:[#allocation2 + $0xc18] sm:$0xff] }
 0x1c5   :  { %3162 = vmatprep.subr.bf16.mxu1 %v5935_v3  ;;  %v502_v3 = vld [vmem:[#allocation2 + $0xc38] sm:$0xff]  ;;  %v7090_v8 = vpop.f32.mrf.mxu1  ;;  %v3233_v54 = vmax.f32 %v2710_v24, 0.0 }
 0x1c6   :  { %v5943_v19 = vcombine.high %v498_v22, %v502_v3  ;;  %v5942_v30 = vcombine.low %v498_v22, %v502_v3  ;;  %v6324_v3 = vld [vmem:[#allocation6 + $0x2c0] ss:$16 sps:$4 sm:$0xff]  }
 0x1c7   :  { %3124 = vmatpush2.bf16.msra.mxu0 %v5790_v11  ;;  %v446_v11 = vld [vmem:[#allocation2 + $0xa78] sm:$0xff] }
 0x1c8   :  { %3163 = vmatpush2.bf16.msra.mxu1 %v5934_v13  ;;  %3125 = vmatprep.subr.bf16.mxu0 %v5783_v14  ;;  %v5750_v13 = vcombine.low %v306_v49, %v310_v50  ;;  %v2628_v14 = vadd.f32 %v7050_v61, %v2585_v56  ;;  %v5887_v52 = vcombine.high %v442_v10, %v446_v11  ;;  %v438_v61 = vld [vmem:[#allocation2 + $0xa38] sm:$0xff] }
 0x1c9   :  { %3164 = vmatprep.subr.bf16.mxu1 %v5927_v16  ;;  %v5886_v33 = vcombine.low %v442_v10, %v446_v11  ;;  %v6323_v56 = vld [vmem:[#allocation6 + $0xc4] ss:$16 sps:$4 sm:$0xff]   ;;  %v6345_v31 = vld [vmem:[#allocation6 + $0x40] ss:$16 sps:$4 sm:$0xff]  }
 0x1ca   :  { %v6360_v24 = vld [vmem:[#allocation6 + $0x200] ss:$16 sps:$4 sm:$0xff]  }
 0x1cb   :  { %3126 = vmatpush2.bf16.msra.mxu0 %v5782_v21  ;;  %v2671_v21 = vadd.f32 %v2670_v62, %v2628_v14  ;;  %v6326_v62 = vld [vmem:[#allocation6 + $0x2c4] ss:$16 sps:$4 sm:$0xff]  }
 0x1cc   :  { %3165 = vmatpush2.bf16.msra.mxu1 %v5926_v25  ;;  %3127 = vmatprep.subr.bf16.mxu0 %v5775_v26  ;;  %v520_v25 = vrot.slane %v7020_v32, %v519_v7  ;;  %v6746_v32 = vld [vmem:[%s7180_s0 + $0x8] ss:$28 sps:$4 sm:$0xff]  }
 0x1cd   :  { %3166 = vmatprep.subr.bf16.mxu1 %v5919_v27  ;;  %v434_v27 = vld [vmem:[#allocation2 + $0xa18] sm:$0xff] }
 0x1ce   :  { %v5879_v57 = vcombine.high %v434_v27, %v438_v61 }
 0x1cf   :  { %3128 = vmatpush2.bf16.msra.mxu0 %v5774_v35  ;;  %v6317_v35 = vld [vmem:[#allocation6 + $0xe4] ss:$16 sps:$4 sm:$0xff]  }
 0x1d0   :  { %3167 = vmatpush2.bf16.msra.mxu1 %v5918_v36  ;;  %3129 = vmatprep.subr.bf16.mxu0 %v5767_v37  ;;  %v2756_v36 = vpop.f32.mrf.mxu1  ;;  %v2714_v37 = vadd.f32 %v7073_v43, %v2671_v21  ;;  %v6344_v21 = vld [vmem:[#allocation6 + $0x264] ss:$16 sps:$4 sm:$0xff]  }
 0x1d1   :  { %3168 = vmatprep.subr.bf16.mxu1 %v5911_v38  ;;  %v2753_v38 = vadd.f32 %v2752_v1, %v520_v25  ;;  %v2757_v12 = vadd.f32 %v2756_v36, %v520_v25  ;;  %v6339_v25 = vld [vmem:[#allocation6 + $0x60] ss:$16 sps:$4 sm:$0xff]  }
 0x1d2   :  { %v6351_v36 = vld [vmem:[#allocation6 + $0x20] ss:$16 sps:$4 sm:$0xff]  }
 0x1d3   :  { %3130 = vmatpush2.bf16.msra.mxu0 %v5766_v44  ;;  %v5878_v44 = vcombine.low %v434_v27, %v438_v61  ;;  %v6342_v27 = vld [vmem:[#allocation6 + $0x260] ss:$16 sps:$4 sm:$0xff]   ;;  %v6347_v61 = vld [vmem:[#allocation6 + $0x44] ss:$16 sps:$4 sm:$0xff]  }
 0x1d4   :  { %3169 = vmatpush2.bf16.msra.mxu1 %v5910_v4  ;;  %3131 = vmatprep.subr.bf16.mxu0 %v5759_v59  ;;  %v6320_v4 = vld [vmem:[#allocation6 + $0x2e4] ss:$16 sps:$4 sm:$0xff]   ;;  %v3241_v59 = vmax.f32 %v2714_v37, 0.0 }
 0x1d5   :  { %3170 = vmatprep.subr.bf16.mxu1 %v5903_v48  ;;  %v6359_v37 = vld [vmem:[#allocation6 + $0x4] ss:$16 sps:$4 sm:$0xff]  }
 0x1d6   :  { %v2793_v9 = vpop.f32.mrf.mxu0  ;;  %v7117_v1 = vpack.c.bf16 %v3241_v59, %v3233_v54  ;;  %v6374_v59 = vld [vmem:[#allocation6 + $0x3c4] ss:$16 sps:$4 sm:$0xff]  }
 0x1d7   :  { %v7087_v6 = vadd.f32 %v2793_v9, %v2751_v15  ;;  %3132 = vmatpush2.bf16.msra.mxu0 %v5758_v60  ;;  %v6747_v15 = vld [vmem:[%s7180_s0 + $0x18] ss:$28 sps:$4 sm:$0xff]   ;;  %v6332_v9 = vld [vmem:[#allocation6 + $0x2a4] ss:$16 sps:$4 sm:$0xff]  }
 0x1d8   :  { %3171 = vmatpush2.bf16.msra.mxu1 %v5902_v63  ;;  %v2795_v16 = vpop.f32.mrf.mxu0  ;;  %3133 = vmatprep.subr.bf16.mxu0 %v5751_v0  ;;  %v6380_v54 = vld [vmem:[#allocation6 + $0x3a4] ss:$16 sps:$4 sm:$0xff]  }
 0x1d9   :  { %3172 = vmatprep.subr.bf16.mxu1 %v5895_v2  ;;  %v2796_v41 = vadd.f32 %v2795_v16, %v2753_v38  ;;  %v6321_v2 = vld [vmem:[#allocation6 + $0xc0] ss:$16 sps:$4 sm:$0xff]   ;;  %v6335_v16 = vld [vmem:[#allocation6 + $0x84] ss:$16 sps:$4 sm:$0xff]  }
 0x1da   :  { %v7096_v26 = vpop.f32.mrf.mxu0  ;;  %v6362_v38 = vld [vmem:[#allocation6 + $0x204] ss:$16 sps:$4 sm:$0xff]  }
 0x1db   :  { %3134 = vmatpush2.bf16.msra.mxu0 %v5750_v13  ;;  %v6327_v13 = vld [vmem:[#allocation6 + $0xa0] ss:$16 sps:$4 sm:$0xff]  }
 0x1dc   :  { %3173 = vmatpush2.bf16.msra.mxu1 %v5894_v34  ;;  %v2799_v17 = vpop.f32.mrf.mxu0  ;;  %3203 = vmatprep.subr.bf16.mxu0 %v5943_v19  ;;  %v6338_v34 = vld [vmem:[#allocation6 + $0x284] ss:$16 sps:$4 sm:$0xff]   ;;  %v6333_v19 = vld [vmem:[#allocation6 + $0x80] ss:$16 sps:$4 sm:$0xff]  }
 0x1dd   :  { %3174 = vmatprep.subr.bf16.mxu1 %v5887_v52  ;;  %v6336_v52 = vld [vmem:[#allocation6 + $0x280] ss:$16 sps:$4 sm:$0xff]  }
 0x1de   :  { %3136 = vmatmul.mubr.bf16.vlgmr.msra.gmra.mxu0 %v6746_v32  ;;  %v7103_v39 = vpop.f32.mrf.mxu0  ;;  %v6357_v32 = vld [vmem:[#allocation6] ss:$16 sps:$4 sm:$0xff]  }
 0x1df   :  { %v7105_v40 = vpop.f32.mrf.mxu1  ;;  %3204 = vmatpush1.bf16.msra.mxu0 %v5942_v30  ;;  %3221 = vmatprep.mubr.bf16.mxu0 %v6889_v28  ;;  %v2800_v28 = vadd.f32 %v2799_v17, %v2757_v12  ;;  %v6350_v30 = vld [vmem:[#allocation6 + $0x244] ss:$16 sps:$4 sm:$0xff]   ;;  %v6348_v17 = vld [vmem:[#allocation6 + $0x240] ss:$16 sps:$4 sm:$0xff]  }
 0x1e0   :  { %3175 = vmatpush2.bf16.msra.mxu1 %v5886_v33  ;;  %v2881_v42 = vpop.f32.mrf.mxu0  ;;  %4814 = vmatprep.subr.bf16.mxu0 %v6317_v35  ;;  %v6353_v33 = vld [vmem:[#allocation6 + $0x24] ss:$16 sps:$4 sm:$0xff]   ;;  %v6369_v12 = vld [vmem:[#allocation6 + $0x1c0] ss:$16 sps:$4 sm:$0xff]  }
 0x1e1   :  { %v2838_v43 = vpop.f32.mrf.mxu1  ;;  %3176 = vmatprep.subr.bf16.mxu1 %v5879_v57  ;;  %v6356_v35 = vld [vmem:[#allocation6 + $0x224] ss:$16 sps:$4 sm:$0xff]   ;;  %v6354_v57 = vld [vmem:[#allocation6 + $0x220] ss:$16 sps:$4 sm:$0xff]  }
 0x1e2   :  { %v2839_v48 = vadd.f32 %v2838_v43, %v2796_v41  ;;  %v7109_v49 = vpop.f32.mrf.mxu0  ;;  %v6365_v41 = vld [vmem:[#allocation6 + $0x1e4] ss:$16 sps:$4 sm:$0xff]   ;;  %v6366_v43 = vld [vmem:[#allocation6 + $0x3e0] ss:$16 sps:$4 sm:$0xff]  }
 0x1e3   :  { %v7111_v50 = vpop.f32.mrf.mxu1 }
 0x1e4   :  { %3177 = vmatpush2.bf16.msra.mxu1 %v5878_v44  ;;  %v2885_v60 = vpop.f32.mrf.mxu0  ;;  %v2882_v63 = vadd.f32 %v2881_v42, %v2839_v48  ;;  %v6368_v42 = vld [vmem:[#allocation6 + $0x3e4] ss:$16 sps:$4 sm:$0xff]   ;;  %v6363_v44 = vld [vmem:[#allocation6 + $0x1e0] ss:$16 sps:$4 sm:$0xff]  }
 0x1e5   :  { %v2842_v58 = vpop.f32.mrf.mxu1  ;;  %4857 = vmatprep.subr.bf16.mxu1 %v6320_v4  ;;  %v6371_v4 = vld [vmem:[#allocation6 + $0x1c4] ss:$16 sps:$4 sm:$0xff]   ;;  %v6372_v48 = vld [vmem:[#allocation6 + $0x3c0] ss:$16 sps:$4 sm:$0xff]  }
 0x1e6   :  { %v2843_v0 = vadd.f32 %v2842_v58, %v2800_v28  ;;  %5947 = vmatmul.mubr.msk.bf16.vlgmr.msra.gmra.mxu0 %vm2540_vm0, %v6747_v15  ;;  %v3235_v10 = vmax.f32 %v2882_v63, 0.0  ;;  %v6375_v28 = vld [vmem:[#allocation6 + $0x1a0] ss:$16 sps:$4 sm:$0xff]   ;;  %v6383_v58 = vld [vmem:[#allocation6 + $0x184] ss:$16 sps:$4 sm:$0xff]  }
 0x1e7   :  { %3179 = vmatmul.mubr.bf16.vlgmr.msra.gmra.mxu1 %v7063_v45  ;;  %4815 = vmatpush1.bf16.msra.mxu0 %v6315_v53  ;;  %v6330_v45 = vld [vmem:[#allocation6 + $0x2a0] ss:$16 sps:$4 sm:$0xff]   ;;  %v6377_v53 = vld [vmem:[#allocation6 + $0x1a4] ss:$16 sps:$4 sm:$0xff]  }
 0x1e8   :  { %v2886_v22 = vadd.f32 %v2885_v60, %v2843_v0  ;;  %4858 = vmatpush1.bf16.msra.mxu1 %v6318_v23  ;;  %4846 = vmatprep.mubr.bf16.mxu0 %v7117_v1  ;;  %v6378_v23 = vld [vmem:[#allocation6 + $0x3a0] ss:$16 sps:$4 sm:$0xff]   ;;  %v6386_v60 = vld [vmem:[#allocation6 + $0x384] ss:$16 sps:$4 sm:$0xff]  }
 0x1e9   :  { %4816 = vmatprep.subr.bf16.mxu0 %v6323_v56  ;;  %4859 = vmatprep.subr.bf16.mxu1 %v6326_v62  ;;  %v6381_v56 = vld [vmem:[#allocation6 + $0x180] ss:$16 sps:$4 sm:$0xff]   ;;  %v6389_v63 = vld [vmem:[#allocation6 + $0x164] ss:$16 sps:$4 sm:$0xff]  }
 0x1ea   :  { %v3243_v11 = vmax.f32 %v2886_v22, 0.0  ;;  %v6384_v62 = vld [vmem:[#allocation6 + $0x380] ss:$16 sps:$4 sm:$0xff]   ;;  %v6392_v0 = vld [vmem:[#allocation6 + $0x364] ss:$16 sps:$4 sm:$0xff]  }
 0x1eb   :  { %4817 = vmatpush1.bf16.msra.mxu0 %v6321_v2  ;;  %v6387_v15 = vld [vmem:[#allocation6 + $0x160] ss:$16 sps:$4 sm:$0xff]   ;;  %v6395_v22 = vld [vmem:[#allocation6 + $0x144] ss:$16 sps:$4 sm:$0xff]  }
 0x1ec   :  { %v7121_v14 = vpack.c.bf16 %v3243_v11, %v3235_v10  ;;  %4860 = vmatpush1.bf16.msra.mxu1 %v6324_v3  ;;  %4818 = vmatprep.subr.bf16.mxu0 %v6329_v5  ;;  %v6390_v2 = vld [vmem:[#allocation6 + $0x360] ss:$16 sps:$4 sm:$0xff]   ;;  %v2755_v3 = vadd.f32 %v7090_v8, %v7078_v46  ;;  %v6398_v5 = vld [vmem:[#allocation6 + $0x344] ss:$16 sps:$4 sm:$0xff]  }
 0x1ed   :  { %4861 = vmatprep.subr.bf16.mxu1 %v6332_v9  ;;  %v6393_v10 = vld [vmem:[#allocation6 + $0x140] ss:$16 sps:$4 sm:$0xff]   ;;  %v6407_v8 = vld [vmem:[#allocation6 + $0x104] ss:$16 sps:$4 sm:$0xff]  }
 0x1ee   :  { %4889 = vmatprep.mubr.bf16.mxu1 %v7121_v14  ;;  %v2798_v9 = vadd.f32 %v7096_v26, %v2755_v3  ;;  %v6396_v11 = vld [vmem:[#allocation6 + $0x340] ss:$16 sps:$4 sm:$0xff]  }
 0x1ef   :  { %4819 = vmatpush1.bf16.msra.mxu0 %v6327_v13  ;;  %v6401_v13 = vld [vmem:[#allocation6 + $0x124] ss:$16 sps:$4 sm:$0xff]   ;;  %v6402_v46 = vld [vmem:[#allocation6 + $0x320] ss:$16 sps:$4 sm:$0xff]  }
 0x1f0   :  { %4862 = vmatpush1.bf16.msra.mxu1 %v6330_v45  ;;  %4820 = vmatprep.subr.bf16.mxu0 %v6335_v16  ;;  %v2841_v45 = vadd.f32 %v7111_v50, %v2798_v9  ;;  %v6404_v16 = vld [vmem:[#allocation6 + $0x324] ss:$16 sps:$4 sm:$0xff]   ;;  %v6408_v50 = vld [vmem:[#allocation6 + $0x300] ss:$16 sps:$4 sm:$0xff]  }
 0x1f1   :  { %4863 = vmatprep.subr.bf16.mxu1 %v6338_v34  ;;  %v2837_v34 = vadd.f32 %v7105_v40, %v7087_v6  ;;  %v6467_v6 = vld [vmem:[#allocation6 + $0x6e4] ss:$16 sps:$4 sm:$0xff]   ;;  %v6513_v3 = vld [vmem:[#allocation6 + $0x7e0] ss:$16 sps:$4 sm:$0xff]  }
 0x1f2   :  { %v2884_v26 = vadd.f32 %v7109_v49, %v2841_v45  ;;  %v6465_v49 = vld [vmem:[#allocation6 + $0x6e0] ss:$16 sps:$4 sm:$0xff]  }
 0x1f3   :  { %4821 = vmatpush1.bf16.msra.mxu0 %v6333_v19  ;;  %v6399_v19 = vld [vmem:[#allocation6 + $0x120] ss:$16 sps:$4 sm:$0xff]  }
 0x1f4   :  { %4864 = vmatpush1.bf16.msra.mxu1 %v6336_v52  ;;  %4822 = vmatprep.subr.bf16.mxu0 %v6341_v20  ;;  %v6410_v52 = vld [vmem:[#allocation6 + $0x304] ss:$16 sps:$4 sm:$0xff]   ;;  %v2880_v20 = vadd.f32 %v7103_v39, %v2837_v34  ;;  %v6438_v9 = vld [vmem:[#allocation6 + $0x5c0] ss:$16 sps:$4 sm:$0xff]  }
 0x1f5   :  { %4865 = vmatprep.subr.bf16.mxu1 %v6344_v21  ;;  %v6405_v21 = vld [vmem:[#allocation6 + $0x100] ss:$16 sps:$4 sm:$0xff]   ;;  %v6473_v39 = vld [vmem:[#allocation6 + $0x6c4] ss:$16 sps:$4 sm:$0xff]  }
 0x1f6   :  { %v3234_v40 = vmax.f32 %v2880_v20, 0.0  ;;  %v6446_v34 = vld [vmem:[#allocation6 + $0x584] ss:$16 sps:$4 sm:$0xff]  }
 0x1f7   :  { %4823 = vmatpush1.bf16.msra.mxu0 %v6339_v25  ;;  %v6413_v25 = vld [vmem:[#allocation6 + $0x4e4] ss:$16 sps:$4 sm:$0xff]  }
 0x1f8   :  { %4866 = vmatpush1.bf16.msra.mxu1 %v6342_v27  ;;  %4824 = vmatprep.subr.bf16.mxu0 %v6347_v61  ;;  %v3242_v27 = vmax.f32 %v2884_v26, 0.0  ;;  %v6411_v61 = vld [vmem:[#allocation6 + $0x4e0] ss:$16 sps:$4 sm:$0xff]   ;;  %v6449_v20 = vld [vmem:[#allocation6 + $0x564] ss:$16 sps:$4 sm:$0xff]  }
 0x1f9   :  { %4867 = vmatprep.subr.bf16.mxu1 %v6350_v30  ;;  %v6416_v30 = vld [vmem:[#allocation6 + $0x4c4] ss:$16 sps:$4 sm:$0xff]   ;;  %v6444_v26 = vld [vmem:[#allocation6 + $0x580] ss:$16 sps:$4 sm:$0xff]  }
 0x1fb   :  { %4825 = vmatpush1.bf16.msra.mxu0 %v6345_v31  ;;  %v7132_v31 = vpack.c.bf16 %v3242_v27, %v3234_v40  ;;  %v527_v27 = vsub.s32 5, %v7017_v18  ;;  %v523_v40 = vsub.s32 4, %v7017_v18 }
 0x1fc   :  { %4868 = vmatpush1.bf16.msra.mxu1 %v6348_v17  ;;  %4826 = vmatprep.subr.bf16.mxu0 %v6353_v33  ;;  %v6414_v17 = vld [vmem:[#allocation6 + $0x4c0] ss:$16 sps:$4 sm:$0xff]   ;;  %v6419_v33 = vld [vmem:[#allocation6 + $0x4a4] ss:$16 sps:$4 sm:$0xff]  }
 0x1fd   :  { %4869 = vmatprep.subr.bf16.mxu1 %v6356_v35  ;;  %v6471_v35 = vld [vmem:[#allocation6 + $0x6c0] ss:$16 sps:$4 sm:$0xff]  }
 0x1ff   :  { %4827 = vmatpush1.bf16.msra.mxu0 %v6351_v36  ;;  %v6479_v36 = vld [vmem:[#allocation6 + $0x6a4] ss:$16 sps:$4 sm:$0xff]  }
 0x200   :  { %4870 = vmatpush1.bf16.msra.mxu1 %v6354_v57  ;;  %4828 = vmatprep.subr.bf16.mxu0 %v6359_v37  ;;  %v6417_v57 = vld [vmem:[#allocation6 + $0x4a0] ss:$16 sps:$4 sm:$0xff]   ;;  %v6422_v37 = vld [vmem:[#allocation6 + $0x484] ss:$16 sps:$4 sm:$0xff]  }
 0x201   :  { %4871 = vmatprep.subr.bf16.mxu1 %v6362_v38  ;;  %v6477_v38 = vld [vmem:[#allocation6 + $0x6a0] ss:$16 sps:$4 sm:$0xff]  }
 0x203   :  { %4829 = vmatpush1.bf16.msra.mxu0 %v6357_v32  ;;  %v6485_v32 = vld [vmem:[#allocation6 + $0x684] ss:$16 sps:$4 sm:$0xff]  }
 0x204   :  { %4872 = vmatpush1.bf16.msra.mxu1 %v6360_v24  ;;  %4830 = vmatprep.subr.bf16.mxu0 %v6365_v41  ;;  %v6420_v24 = vld [vmem:[#allocation6 + $0x480] ss:$16 sps:$4 sm:$0xff]   ;;  %v6425_v41 = vld [vmem:[#allocation6 + $0x464] ss:$16 sps:$4 sm:$0xff]  }
 0x205   :  { %4873 = vmatprep.subr.bf16.mxu1 %v6368_v42  ;;  %v6483_v42 = vld [vmem:[#allocation6 + $0x680] ss:$16 sps:$4 sm:$0xff]  }
 0x207   :  { %4831 = vmatpush2.bf16.msra.mxu0 %v6363_v44  ;;  %v6491_v44 = vld [vmem:[#allocation6 + $0x664] ss:$16 sps:$4 sm:$0xff]  }
 0x208   :  { %4874 = vmatpush2.bf16.msra.mxu1 %v6366_v43  ;;  %4832 = vmatprep.subr.bf16.mxu0 %v6371_v4  ;;  %v6423_v43 = vld [vmem:[#allocation6 + $0x460] ss:$16 sps:$4 sm:$0xff]   ;;  %v6428_v4 = vld [vmem:[#allocation6 + $0x444] ss:$16 sps:$4 sm:$0xff]  }
 0x209   :  { %4875 = vmatprep.subr.bf16.mxu1 %v6374_v59  ;;  %v6489_v59 = vld [vmem:[#allocation6 + $0x660] ss:$16 sps:$4 sm:$0xff]  }
 0x20b   :  { %4833 = vmatpush2.bf16.msra.mxu0 %v6369_v12  ;;  %v6497_v12 = vld [vmem:[#allocation6 + $0x644] ss:$16 sps:$4 sm:$0xff]  }
 0x20c   :  { %4876 = vmatpush2.bf16.msra.mxu1 %v6372_v48  ;;  %4834 = vmatprep.subr.bf16.mxu0 %v6377_v53  ;;  %v6426_v48 = vld [vmem:[#allocation6 + $0x440] ss:$16 sps:$4 sm:$0xff]   ;;  %v6431_v53 = vld [vmem:[#allocation6 + $0x424] ss:$16 sps:$4 sm:$0xff]  }
 0x20d   :  { %4877 = vmatprep.subr.bf16.mxu1 %v6380_v54  ;;  %v6495_v54 = vld [vmem:[#allocation6 + $0x640] ss:$16 sps:$4 sm:$0xff]  }
 0x20f   :  { %4835 = vmatpush2.bf16.msra.mxu0 %v6375_v28  ;;  %v6503_v28 = vld [vmem:[#allocation6 + $0x624] ss:$16 sps:$4 sm:$0xff]  }
 0x210   :  { %4878 = vmatpush2.bf16.msra.mxu1 %v6378_v23  ;;  %4836 = vmatprep.subr.bf16.mxu0 %v6383_v58  ;;  %v6429_v23 = vld [vmem:[#allocation6 + $0x420] ss:$16 sps:$4 sm:$0xff]   ;;  %v6434_v58 = vld [vmem:[#allocation6 + $0x404] ss:$16 sps:$4 sm:$0xff]  }
 0x211   :  { %4879 = vmatprep.subr.bf16.mxu1 %v6386_v60  ;;  %v6501_v60 = vld [vmem:[#allocation6 + $0x620] ss:$16 sps:$4 sm:$0xff]  }
 0x213   :  { %4837 = vmatpush2.bf16.msra.mxu0 %v6381_v56  ;;  %v6509_v56 = vld [vmem:[#allocation6 + $0x604] ss:$16 sps:$4 sm:$0xff]  }
 0x214   :  { %4880 = vmatpush2.bf16.msra.mxu1 %v6384_v62  ;;  %4838 = vmatprep.subr.bf16.mxu0 %v6389_v63  ;;  %v6432_v62 = vld [vmem:[#allocation6 + $0x400] ss:$16 sps:$4 sm:$0xff]   ;;  %v6437_v63 = vld [vmem:[#allocation6 + $0x5e4] ss:$16 sps:$4 sm:$0xff]  }
 0x215   :  { %4881 = vmatprep.subr.bf16.mxu1 %v6392_v0  ;;  %v6507_v0 = vld [vmem:[#allocation6 + $0x600] ss:$16 sps:$4 sm:$0xff]  }
 0x217   :  { %4839 = vmatpush2.bf16.msra.mxu0 %v6387_v15  ;;  %v6515_v15 = vld [vmem:[#allocation6 + $0x7e4] ss:$16 sps:$4 sm:$0xff]  }
 0x218   :  { %4882 = vmatpush2.bf16.msra.mxu1 %v6390_v2  ;;  %4840 = vmatprep.subr.bf16.mxu0 %v6395_v22  ;;  %v6435_v2 = vld [vmem:[#allocation6 + $0x5e0] ss:$16 sps:$4 sm:$0xff]   ;;  %v6440_v22 = vld [vmem:[#allocation6 + $0x5c4] ss:$16 sps:$4 sm:$0xff]  }
 0x219   :  { %4883 = vmatprep.subr.bf16.mxu1 %v6398_v5  ;;  %v6521_v5 = vld [vmem:[#allocation6 + $0x7c4] ss:$16 sps:$4 sm:$0xff]  }
 0x21b   :  { %4841 = vmatpush2.bf16.msra.mxu0 %v6393_v10  ;;  %v6443_v10 = vld [vmem:[#allocation6 + $0x5a4] ss:$16 sps:$4 sm:$0xff]  }
 0x21c   :  { %4884 = vmatpush2.bf16.msra.mxu1 %v6396_v11  ;;  %4842 = vmatprep.subr.bf16.mxu0 %v6401_v13  ;;  %v6519_v11 = vld [vmem:[#allocation6 + $0x7c0] ss:$16 sps:$4 sm:$0xff]   ;;  %v6527_v13 = vld [vmem:[#allocation6 + $0x7a4] ss:$16 sps:$4 sm:$0xff]  }
 0x21d   :  { %4885 = vmatprep.subr.bf16.mxu1 %v6404_v16  ;;  %v6441_v16 = vld [vmem:[#allocation6 + $0x5a0] ss:$16 sps:$4 sm:$0xff]  }
 0x21f   :  { %4843 = vmatpush2.bf16.msra.mxu0 %v6399_v19  ;;  %v7136_v45 = vpop.f32.mrf.mxu1  ;;  %v6525_v19 = vld [vmem:[#allocation6 + $0x7a0] ss:$16 sps:$4 sm:$0xff]  }
 0x220   :  { %4886 = vmatpush2.bf16.msra.mxu1 %v6402_v46  ;;  %4844 = vmatprep.subr.bf16.mxu0 %v6407_v8  ;;  %v6533_v46 = vld [vmem:[#allocation6 + $0x784] ss:$16 sps:$4 sm:$0xff]  }
 0x221   :  { %4887 = vmatprep.subr.bf16.mxu1 %v6410_v52  ;;  %v2967_v8 = vpop.f32.mrf.mxu1  ;;  %v2922_v52 = vpop.f32.mrf.mxu0 }
 0x223   :  { %4845 = vmatpush2.bf16.msra.mxu0 %v6405_v21  ;;  %v6531_v21 = vld [vmem:[#allocation6 + $0x780] ss:$16 sps:$4 sm:$0xff]  }
 0x224   :  { %4888 = vmatpush2.bf16.msra.mxu1 %v6408_v50  ;;  %4900 = vmatprep.subr.bf16.mxu0 %v6413_v25  ;;  %v6539_v50 = vld [vmem:[#allocation6 + $0x764] ss:$16 sps:$4 sm:$0xff]   ;;  %v2969_v25 = vpop.f32.mrf.mxu1 }
 0x225   :  { %4943 = vmatprep.subr.bf16.mxu1 %v6467_v6  ;;  %v6447_v6 = vld [vmem:[#allocation6 + $0x560] ss:$16 sps:$4 sm:$0xff]  }
 0x226   :  { %4847 = vmatmul.mubr.bf16.vlgmr.msra.gmra.mxu0 %v7067_v51 }
 0x227   :  { %4890 = vmatmul.mubr.bf16.vlgmr.msra.gmra.mxu1 %v7132_v31  ;;  %4901 = vmatpush1.bf16.msra.mxu0 %v6411_v61  ;;  %v2924_v61 = vpop.f32.mrf.mxu0 }
 0x228   :  { %4902 = vmatprep.subr.bf16.mxu0 %v6416_v30  ;;  %4944 = vmatpush1.bf16.msra.mxu1 %v6465_v49  ;;  %v6452_v30 = vld [vmem:[#allocation6 + $0x544] ss:$16 sps:$4 sm:$0xff]   ;;  %v6537_v49 = vld [vmem:[#allocation6 + $0x760] ss:$16 sps:$4 sm:$0xff]  }
 0x229   :  { %4945 = vmatprep.subr.bf16.mxu1 %v6473_v39  ;;  %v6545_v39 = vld [vmem:[#allocation6 + $0x744] ss:$16 sps:$4 sm:$0xff]  }
 0x22b   :  { %4903 = vmatpush1.bf16.msra.mxu0 %v6414_v17  ;;  %v2971_v17 = vpop.f32.mrf.mxu1 }
 0x22c   :  { %4904 = vmatprep.subr.bf16.mxu0 %v6419_v33  ;;  %4946 = vmatpush1.bf16.msra.mxu1 %v6471_v35  ;;  %v7140_v33 = vld [vmem:[#allocation4] sm:$0xff] }
 0x22d   :  { %4947 = vmatprep.subr.bf16.mxu1 %v6479_v36  ;;  %v528_v35 = vrot.slane %v7140_v33, %v527_v27  ;;  %v6450_v36 = vld [vmem:[#allocation6 + $0x540] ss:$16 sps:$4 sm:$0xff]  }
 0x22f   :  { %4905 = vmatpush1.bf16.msra.mxu0 %v6417_v57  ;;  %v524_v57 = vrot.slane %v7140_v33, %v523_v40  ;;  %v6462_v40 = vld [vmem:[#allocation6 + $0xc8] ss:$16 sps:$4 sm:$0xff]  }
 0x230   :  { %4906 = vmatprep.subr.bf16.mxu0 %v6422_v37  ;;  %4948 = vmatpush1.bf16.msra.mxu1 %v6477_v38  ;;  %v2926_v37 = vpop.f32.mrf.mxu0  ;;  %v6455_v38 = vld [vmem:[#allocation6 + $0x524] ss:$16 sps:$4 sm:$0xff]  }
 0x231   :  { %4949 = vmatprep.subr.bf16.mxu1 %v6485_v32  ;;  %v6543_v32 = vld [vmem:[#allocation6 + $0x740] ss:$16 sps:$4 sm:$0xff]  }
 0x233   :  { %4907 = vmatpush1.bf16.msra.mxu0 %v6420_v24  ;;  %v6551_v24 = vld [vmem:[#allocation6 + $0x724] ss:$16 sps:$4 sm:$0xff]  }
 0x234   :  { %4908 = vmatprep.subr.bf16.mxu0 %v6425_v41  ;;  %4950 = vmatpush1.bf16.msra.mxu1 %v6483_v42  ;;  %v3051_v41 = vpop.f32.mrf.mxu1  ;;  %v2925_v42 = vadd.f32 %v2924_v61, %v528_v35  ;;  %v6470_v61 = vld [vmem:[#allocation6 + $0xac] ss:$16 sps:$4 sm:$0xff]  }
 0x235   :  { %4951 = vmatprep.subr.bf16.mxu1 %v6491_v44  ;;  %v6453_v44 = vld [vmem:[#allocation6 + $0x520] ss:$16 sps:$4 sm:$0xff]  }
 0x237   :  { %4909 = vmatpush1.bf16.msra.mxu0 %v6423_v43  ;;  %v2923_v43 = vadd.f32 %v2922_v52, %v524_v57 }
 0x238   :  { %4910 = vmatprep.subr.bf16.mxu0 %v6428_v4  ;;  %4952 = vmatpush1.bf16.msra.mxu1 %v6489_v59  ;;  %v2928_v4 = vpop.f32.mrf.mxu0  ;;  %v6458_v59 = vld [vmem:[#allocation6 + $0x504] ss:$16 sps:$4 sm:$0xff]  }
 0x239   :  { %4953 = vmatprep.subr.bf16.mxu1 %v6497_v12  ;;  %v6549_v12 = vld [vmem:[#allocation6 + $0x720] ss:$16 sps:$4 sm:$0xff]  }
 0x23b   :  { %4911 = vmatpush1.bf16.msra.mxu0 %v6426_v48  ;;  %v2927_v48 = vadd.f32 %v2926_v37, %v524_v57  ;;  %v6486_v57 = vld [vmem:[#allocation6 + $0x48] ss:$16 sps:$4 sm:$0xff]   ;;  %v6494_v37 = vld [vmem:[#allocation6 + $0x2c] ss:$16 sps:$4 sm:$0xff]  }
 0x23c   :  { %4912 = vmatprep.subr.bf16.mxu0 %v6431_v53  ;;  %4954 = vmatpush1.bf16.msra.mxu1 %v6495_v54  ;;  %v6557_v53 = vld [vmem:[#allocation6 + $0x704] ss:$16 sps:$4 sm:$0xff]   ;;  %v3053_v54 = vpop.f32.mrf.mxu1 }
 0x23d   :  { %4955 = vmatprep.subr.bf16.mxu1 %v6503_v28 }
 0x23f   :  { %4913 = vmatpush1.bf16.msra.mxu0 %v6429_v23  ;;  %v2968_v23 = vadd.f32 %v2967_v8, %v2925_v42  ;;  %v6512_v42 = vld [vmem:[#allocation6 + $0x1cc] ss:$16 sps:$4 sm:$0xff]  }
 0x240   :  { %4914 = vmatprep.subr.bf16.mxu0 %v6434_v58  ;;  %4956 = vmatpush1.bf16.msra.mxu1 %v6501_v60  ;;  %v2929_v58 = vadd.f32 %v2928_v4, %v528_v35  ;;  %v6456_v60 = vld [vmem:[#allocation6 + $0x500] ss:$16 sps:$4 sm:$0xff]   ;;  %v6480_v35 = vld [vmem:[#allocation6 + $0x68] ss:$16 sps:$4 sm:$0xff]  }
 0x241   :  { %4957 = vmatprep.subr.bf16.mxu1 %v6509_v56  ;;  %v2966_v56 = vadd.f32 %v7136_v45, %v2923_v43  ;;  %v6518_v43 = vld [vmem:[#allocation6 + $0x1ac] ss:$16 sps:$4 sm:$0xff]   ;;  %v6516_v4 = vld [vmem:[#allocation6 + $0x1a8] ss:$16 sps:$4 sm:$0xff]  }
 0x243   :  { %4915 = vmatpush1.bf16.msra.mxu0 %v6432_v62 }
 0x244   :  { %4916 = vmatprep.subr.bf16.mxu0 %v6437_v63  ;;  %4958 = vmatpush1.bf16.msra.mxu1 %v6507_v0  ;;  %v6461_v63 = vld [vmem:[#allocation6 + $0xec] ss:$16 sps:$4 sm:$0xff]   ;;  %v6555_v0 = vld [vmem:[#allocation6 + $0x700] ss:$16 sps:$4 sm:$0xff]  }
 0x245   :  { %4959 = vmatprep.subr.bf16.mxu1 %v6515_v15  ;;  %v2970_v15 = vadd.f32 %v2969_v25, %v2927_v48  ;;  %v6459_v25 = vld [vmem:[#allocation6 + $0xe8] ss:$16 sps:$4 sm:$0xff]   ;;  %v6530_v48 = vld [vmem:[#allocation6 + $0x16c] ss:$16 sps:$4 sm:$0xff]  }
 0x247   :  { %4917 = vmatpush2.bf16.msra.mxu0 %v6435_v2 }
 0x248   :  { %4918 = vmatprep.subr.bf16.mxu0 %v6440_v22  ;;  %4960 = vmatpush2.bf16.msra.mxu1 %v6513_v3  ;;  %v6563_v22 = vld [vmem:[#allocation6 + $0x2ec] ss:$16 sps:$4 sm:$0xff]   ;;  %v3055_v3 = vpop.f32.mrf.mxu1 }
 0x249   :  { %4961 = vmatprep.subr.bf16.mxu1 %v6521_v5 }
 0x24b   :  { %4919 = vmatpush2.bf16.msra.mxu0 %v6438_v9 }
 0x24c   :  { %4920 = vmatprep.subr.bf16.mxu0 %v6443_v10  ;;  %4962 = vmatpush2.bf16.msra.mxu1 %v6519_v11  ;;  %v2972_v10 = vadd.f32 %v2971_v17, %v2929_v58  ;;  %v6482_v17 = vld [vmem:[#allocation6 + $0x6c] ss:$16 sps:$4 sm:$0xff]   ;;  %v535_v58 = vsub.s32 7, %v7017_v18 }
 0x24d   :  { %4963 = vmatprep.subr.bf16.mxu1 %v6527_v13 }
 0x24f   :  { %4921 = vmatpush2.bf16.msra.mxu0 %v6441_v16 }
 0x250   :  { %4922 = vmatprep.subr.bf16.mxu0 %v6446_v34  ;;  %4964 = vmatpush2.bf16.msra.mxu1 %v6525_v19  ;;  %v3057_v19 = vpop.f32.mrf.mxu1 }
 0x251   :  { %4965 = vmatprep.subr.bf16.mxu1 %v6533_v46 }
 0x253   :  { %4923 = vmatpush2.bf16.msra.mxu0 %v6444_v26 }
 0x254   :  { %4924 = vmatprep.subr.bf16.mxu0 %v6449_v20  ;;  %4966 = vmatpush2.bf16.msra.mxu1 %v6531_v21 }
 0x255   :  { %4967 = vmatprep.subr.bf16.mxu1 %v6539_v50 }
 0x257   :  { %4925 = vmatpush2.bf16.msra.mxu0 %v6447_v6  ;;  %v6464_v6 = vld [vmem:[#allocation6 + $0xcc] ss:$16 sps:$4 sm:$0xff]  }
 0x258   :  { %4926 = vmatprep.subr.bf16.mxu0 %v6452_v30  ;;  %4968 = vmatpush2.bf16.msra.mxu1 %v6537_v49  ;;  %v6468_v30 = vld [vmem:[#allocation6 + $0xa8] ss:$16 sps:$4 sm:$0xff]   ;;  %v6476_v49 = vld [vmem:[#allocation6 + $0x8c] ss:$16 sps:$4 sm:$0xff]  }
 0x259   :  { %4969 = vmatprep.subr.bf16.mxu1 %v6545_v39  ;;  %v6474_v39 = vld [vmem:[#allocation6 + $0x88] ss:$16 sps:$4 sm:$0xff]  }
 0x25b   :  { %4927 = vmatpush2.bf16.msra.mxu0 %v6450_v36  ;;  %v6488_v36 = vld [vmem:[#allocation6 + $0x4c] ss:$16 sps:$4 sm:$0xff]  }
 0x25c   :  { %4928 = vmatprep.subr.bf16.mxu0 %v6455_v38  ;;  %4970 = vmatpush2.bf16.msra.mxu1 %v6543_v32  ;;  %v6500_v38 = vld [vmem:[#allocation6 + $0xc] ss:$16 sps:$4 sm:$0xff]   ;;  %v6498_v32 = vld [vmem:[#allocation6 + $0x8] ss:$16 sps:$4 sm:$0xff]  }
 0x25d   :  { %4971 = vmatprep.subr.bf16.mxu1 %v6551_v24  ;;  %v6506_v24 = vld [vmem:[#allocation6 + $0x1ec] ss:$16 sps:$4 sm:$0xff]  }
 0x25e   :  { %v3008_v28 = vpop.f32.mrf.mxu0 }
 0x25f   :  { %4929 = vmatpush2.bf16.msra.mxu0 %v6453_v44  ;;  %v3009_v5 = vadd.f32 %v3008_v28, %v2966_v56  ;;  %v6510_v44 = vld [vmem:[#allocation6 + $0x1c8] ss:$16 sps:$4 sm:$0xff]   ;;  %v6536_v28 = vld [vmem:[#allocation6 + $0x14c] ss:$16 sps:$4 sm:$0xff]   ;;  %v531_v56 = vsub.s32 6, %v7017_v18 }
 0x260   :  { %v3010_v62 = vpop.f32.mrf.mxu0  ;;  %4930 = vmatprep.subr.bf16.mxu0 %v6458_v59  ;;  %4972 = vmatpush2.bf16.msra.mxu1 %v6549_v12  ;;  %v6524_v59 = vld [vmem:[#allocation6 + $0x18c] ss:$16 sps:$4 sm:$0xff]   ;;  %v6522_v12 = vld [vmem:[#allocation6 + $0x188] ss:$16 sps:$4 sm:$0xff]  }
 0x261   :  { %v3011_v2 = vadd.f32 %v3010_v62, %v2968_v23  ;;  %4973 = vmatprep.subr.bf16.mxu1 %v6557_v53  ;;  %v3052_v46 = vadd.f32 %v3051_v41, %v3009_v5  ;;  %v6504_v41 = vld [vmem:[#allocation6 + $0x1e8] ss:$16 sps:$4 sm:$0xff]  }
 0x262   :  { %v3012_v9 = vpop.f32.mrf.mxu0  ;;  %v6534_v62 = vld [vmem:[#allocation6 + $0x148] ss:$16 sps:$4 sm:$0xff]  }
 0x263   :  { %v3013_v11 = vadd.f32 %v3012_v9, %v2970_v15  ;;  %4931 = vmatpush2.bf16.msra.mxu0 %v6456_v60  ;;  %v3054_v16 = vadd.f32 %v3053_v54, %v3011_v2  ;;  %v3236_v21 = vmax.f32 %v3052_v46, 0.0  ;;  %v6528_v54 = vld [vmem:[#allocation6 + $0x168] ss:$16 sps:$4 sm:$0xff]   ;;  %v536_v2 = vrot.slane %v7140_v33, %v535_v58  ;;  %v6578_v58 = vld [vmem:[#allocation6 + $0x46c] ss:$16 sps:$4 sm:$0xff]  }
 0x264   :  { %v3014_v13 = vpop.f32.mrf.mxu0  ;;  %4986 = vmatprep.subr.bf16.mxu0 %v6461_v63  ;;  %4974 = vmatpush2.bf16.msra.mxu1 %v6555_v0  ;;  %v6542_v0 = vld [vmem:[#allocation6 + $0x12c] ss:$16 sps:$4 sm:$0xff]   ;;  %v6540_v5 = vld [vmem:[#allocation6 + $0x128] ss:$16 sps:$4 sm:$0xff]  }
 0x265   :  { %v3056_v45 = vadd.f32 %v3055_v3, %v3013_v11  ;;  %v3015_v34 = vadd.f32 %v3014_v13, %v2972_v10  ;;  %5029 = vmatprep.subr.bf16.mxu1 %v6563_v22  ;;  %v3237_v52 = vmax.f32 %v3054_v16, 0.0  ;;  %v532_v3 = vrot.slane %v7140_v33, %v531_v56  ;;  %v6548_v10 = vld [vmem:[#allocation6 + $0x10c] ss:$16 sps:$4 sm:$0xff]   ;;  %v6576_v56 = vld [vmem:[#allocation6 + $0x468] ss:$16 sps:$4 sm:$0xff]  }
 0x267   :  { %v3058_v8 = vadd.f32 %v3057_v19, %v3015_v34  ;;  %v3244_v26 = vmax.f32 %v3056_v45, 0.0  ;;  %v3094_v53 = vpop.f32.mrf.mxu1  ;;  %v6546_v19 = vld [vmem:[#allocation6 + $0x108] ss:$16 sps:$4 sm:$0xff]  }
 0x268   :  { %v3095_v45 = vadd.f32 %v3094_v53, %v532_v3  ;;  %v6561_v53 = vld [vmem:[#allocation6 + $0x2e8] ss:$16 sps:$4 sm:$0xff]  }
 0x269   :  { %v3245_v20 = vmax.f32 %v3058_v8, 0.0  ;;  %v7147_v27 = vpack.c.bf16 %v3244_v26, %v3236_v21  ;;  %v3096_v23 = vpop.f32.mrf.mxu1 }
 0x26a   :  { %v3097_v13 = vadd.f32 %v3096_v23, %v536_v2  ;;  %v6567_v23 = vld [vmem:[#allocation6 + $0x2c8] ss:$16 sps:$4 sm:$0xff]  }
 0x26b   :  { %v7145_v50 = vpack.c.bf16 %v3245_v20, %v3237_v52  ;;  %v3098_v15 = vpop.f32.mrf.mxu1  ;;  %v6554_v52 = vld [vmem:[#allocation6 + $0x4ec] ss:$16 sps:$4 sm:$0xff]  }
 0x26c   :  { %v3099_v46 = vadd.f32 %v3098_v15, %v532_v3  ;;  %v6582_v15 = vld [vmem:[#allocation6 + $0x448] ss:$16 sps:$4 sm:$0xff]  }
 0x26d   :  { %4932 = vmatprep.mubr.bf16.mxu0 %v7145_v50  ;;  %v3100_v11 = vpop.f32.mrf.mxu1  ;;  %v6588_v3 = vld [vmem:[#allocation6 + $0x428] ss:$16 sps:$4 sm:$0xff]  }
 0x26e   :  { %4933 = vmatmul.mubr.bf16.vlgmr.msra.gmra.mxu0 %v7147_v27  ;;  %v3101_v33 = vadd.f32 %v3100_v11, %v536_v2  ;;  %v6579_v2 = vld [vmem:[#allocation6 + $0x288] ss:$16 sps:$4 sm:$0xff]  }
 0x26f   :  { %4987 = vmatpush1.bf16.msra.mxu0 %v6459_v25  ;;  %5018 = vmatprep.mubr.bf16.mxu0 %v7117_v1  ;;  %v6492_v1 = vld [vmem:[#allocation6 + $0x28] ss:$16 sps:$4 sm:$0xff]  }
 0x270   :  { %4988 = vmatprep.subr.bf16.mxu0 %v6464_v6  ;;  %v6594_v11 = vld [vmem:[#allocation6 + $0x408] ss:$16 sps:$4 sm:$0xff]  }
 0x273   :  { %4989 = vmatpush1.bf16.msra.mxu0 %v6462_v40 }
 0x274   :  { %4990 = vmatprep.subr.bf16.mxu0 %v6470_v61 }
 0x277   :  { %4991 = vmatpush1.bf16.msra.mxu0 %v6468_v30 }
 0x278   :  { %4992 = vmatprep.subr.bf16.mxu0 %v6476_v49  ;;  %v6552_v49 = vld [vmem:[#allocation6 + $0x4e8] ss:$16 sps:$4 sm:$0xff]  }
 0x27b   :  { %4993 = vmatpush1.bf16.msra.mxu0 %v6474_v39 }
 0x27c   :  { %4994 = vmatprep.subr.bf16.mxu0 %v6482_v17 }
 0x27f   :  { %4995 = vmatpush1.bf16.msra.mxu0 %v6480_v35  ;;  %v6560_v35 = vld [vmem:[#allocation6 + $0x4cc] ss:$16 sps:$4 sm:$0xff]  }
 0x280   :  { %4996 = vmatprep.subr.bf16.mxu0 %v6488_v36 }
 0x283   :  { %4997 = vmatpush1.bf16.msra.mxu0 %v6486_v57 }
 0x284   :  { %4998 = vmatprep.subr.bf16.mxu0 %v6494_v37 }
 0x287   :  { %4999 = vmatpush1.bf16.msra.mxu0 %v6492_v1 }
 0x288   :  { %5000 = vmatprep.subr.bf16.mxu0 %v6500_v38 }
 0x28b   :  { %5001 = vmatpush1.bf16.msra.mxu0 %v6498_v32 }
 0x28c   :  { %5002 = vmatprep.subr.bf16.mxu0 %v6506_v24  ;;  %v6558_v24 = vld [vmem:[#allocation6 + $0x4c8] ss:$16 sps:$4 sm:$0xff]  }
 0x28f   :  { %5003 = vmatpush2.bf16.msra.mxu0 %v6504_v41 }
 0x290   :  { %5004 = vmatprep.subr.bf16.mxu0 %v6512_v42  ;;  %v6566_v42 = vld [vmem:[#allocation6 + $0x4ac] ss:$16 sps:$4 sm:$0xff]  }
 0x293   :  { %5005 = vmatpush2.bf16.msra.mxu0 %v6510_v44 }
 0x294   :  { %5006 = vmatprep.subr.bf16.mxu0 %v6518_v43 }
 0x297   :  { %5007 = vmatpush2.bf16.msra.mxu0 %v6516_v4 }
 0x298   :  { %5008 = vmatprep.subr.bf16.mxu0 %v6524_v59 }
 0x29b   :  { %5009 = vmatpush2.bf16.msra.mxu0 %v6522_v12  ;;  %v6564_v12 = vld [vmem:[#allocation6 + $0x4a8] ss:$16 sps:$4 sm:$0xff]  }
 0x29c   :  { %5010 = vmatprep.subr.bf16.mxu0 %v6530_v48 }
 0x29e   :  { %v3137_v60 = vpop.f32.mrf.mxu0 }
 0x29f   :  { %5011 = vmatpush2.bf16.msra.mxu0 %v6528_v54  ;;  %v3138_v20 = vadd.f32 %v3137_v60, %v3095_v45  ;;  %v6575_v60 = vld [vmem:[#allocation6 + $0x2ac] ss:$16 sps:$4 sm:$0xff]  }
 0x2a0   :  { %v3139_v63 = vpop.f32.mrf.mxu0  ;;  %5012 = vmatprep.subr.bf16.mxu0 %v6536_v28  ;;  %v6572_v28 = vld [vmem:[#allocation6 + $0x48c] ss:$16 sps:$4 sm:$0xff]  }
 0x2a1   :  { %v3140_v8 = vadd.f32 %v3139_v63, %v3097_v13  ;;  %v6584_v63 = vld [vmem:[#allocation6 + $0x44c] ss:$16 sps:$4 sm:$0xff]   ;;  %v6591_v13 = vld [vmem:[#allocation6 + $0x248] ss:$16 sps:$4 sm:$0xff]  }
 0x2a2   :  { %v3141_v22 = vpop.f32.mrf.mxu0  ;;  %v6599_v45 = vld [vmem:[#allocation6 + $0x22c] ss:$16 sps:$4 sm:$0xff]  }
 0x2a3   :  { %5013 = vmatpush2.bf16.msra.mxu0 %v6534_v62  ;;  %v3142_v25 = vadd.f32 %v3141_v22, %v3099_v46  ;;  %v6573_v62 = vld [vmem:[#allocation6 + $0x2a8] ss:$16 sps:$4 sm:$0xff]   ;;  %v6590_v22 = vld [vmem:[#allocation6 + $0x42c] ss:$16 sps:$4 sm:$0xff]  }
 0x2a4   :  { %v3143_v9 = vpop.f32.mrf.mxu0  ;;  %5014 = vmatprep.subr.bf16.mxu0 %v6542_v0  ;;  %v6581_v0 = vld [vmem:[#allocation6 + $0x28c] ss:$16 sps:$4 sm:$0xff]  }
 0x2a5   :  { %v3144_v39 = vadd.f32 %v3143_v9, %v3101_v33  ;;  %v6596_v9 = vld [vmem:[#allocation6 + $0x40c] ss:$16 sps:$4 sm:$0xff]   ;;  %v6612_v33 = vld [vmem:[#allocation6 + $0x5a8] ss:$16 sps:$4 sm:$0xff]  }
 0x2a6   :  { %v3223_v16 = vpop.f32.mrf.mxu0  ;;  %v6608_v46 = vld [vmem:[#allocation6 + $0x5cc] ss:$16 sps:$4 sm:$0xff]  }
 0x2a7   :  { %v3180_v34 = vpop.f32.mrf.mxu1  ;;  %5015 = vmatpush2.bf16.msra.mxu0 %v6540_v5  ;;  %v6585_v5 = vld [vmem:[#allocation6 + $0x268] ss:$16 sps:$4 sm:$0xff]  }
 0x2a8   :  { %v3225_v26 = vpop.f32.mrf.mxu0  ;;  %5016 = vmatprep.subr.bf16.mxu0 %v6548_v10  ;;  %v3181_v61 = vadd.f32 %v3180_v34, %v3138_v20  ;;  %v6593_v10 = vld [vmem:[#allocation6 + $0x24c] ss:$16 sps:$4 sm:$0xff]   ;;  %v6600_v34 = vld [vmem:[#allocation6 + $0x5e8] ss:$16 sps:$4 sm:$0xff]  }
 0x2a9   :  { %v3182_v21 = vpop.f32.mrf.mxu1  ;;  %v6614_v20 = vld [vmem:[#allocation6 + $0x5ac] ss:$16 sps:$4 sm:$0xff]  }
 0x2aa   :  { %v3183_v6 = vadd.f32 %v3182_v21, %v3140_v8  ;;  %v3227_v40 = vpop.f32.mrf.mxu0  ;;  %v3224_v32 = vadd.f32 %v3223_v16, %v3181_v61  ;;  %v6602_v16 = vld [vmem:[#allocation6 + $0x5ec] ss:$16 sps:$4 sm:$0xff]   ;;  %v6618_v61 = vld [vmem:[#allocation6 + $0x588] ss:$16 sps:$4 sm:$0xff]  }
 0x2ab   :  { %v3184_v30 = vpop.f32.mrf.mxu1  ;;  %5017 = vmatpush2.bf16.msra.mxu0 %v6546_v19  ;;  %v6597_v19 = vld [vmem:[#allocation6 + $0x228] ss:$16 sps:$4 sm:$0xff]   ;;  %v6605_v8 = vld [vmem:[#allocation6 + $0x20c] ss:$16 sps:$4 sm:$0xff]  }
 0x2ac   :  { %v3185_v17 = vadd.f32 %v3184_v30, %v3142_v25  ;;  %5072 = vmatprep.subr.bf16.mxu0 %v6554_v52  ;;  %v3229_v57 = vpop.f32.mrf.mxu0  ;;  %v3226_v37 = vadd.f32 %v3225_v26, %v3183_v6  ;;  %v3238_v59 = vmax.f32 %v3224_v32, 0.0  ;;  %v6606_v26 = vld [vmem:[#allocation6 + $0x5c8] ss:$16 sps:$4 sm:$0xff]   ;;  %v6611_v21 = vld [vmem:[#allocation6 + $0x3ec] ss:$16 sps:$4 sm:$0xff]  }
 0x2ad   :  { %v3186_v36 = vpop.f32.mrf.mxu1  ;;  %v6603_v52 = vld [vmem:[#allocation6 + $0x208] ss:$16 sps:$4 sm:$0xff]   ;;  %v6620_v6 = vld [vmem:[#allocation6 + $0x58c] ss:$16 sps:$4 sm:$0xff]  }
 0x2ae   :  { %v3228_v1 = vadd.f32 %v3227_v40, %v3185_v17  ;;  %v3187_v38 = vadd.f32 %v3186_v36, %v3144_v39  ;;  %5019 = vmatmul.mubr.bf16.vlgmr.msra.gmra.mxu0 %v7067_v51  ;;  %v3239_v43 = vmax.f32 %v3226_v37, 0.0  ;;  %v6569_v51 = vld [vmem:[#allocation6 + $0x2cc] ss:$16 sps:$4 sm:$0xff]   ;;  %v6609_v25 = vld [vmem:[#allocation6 + $0x3e8] ss:$16 sps:$4 sm:$0xff]  }
 0x2af   :  { %5073 = vmatpush1.bf16.msra.mxu0 %v6552_v49  ;;  %5104 = vmatprep.mubr.bf16.mxu0 %v7145_v50  ;;  %v6570_v50 = vld [vmem:[#allocation6 + $0x488] ss:$16 sps:$4 sm:$0xff]   ;;  %v6617_v40 = vld [vmem:[#allocation6 + $0x3cc] ss:$16 sps:$4 sm:$0xff]  }
 0x2b0   :  { %v3230_v41 = vadd.f32 %v3229_v57, %v3187_v38  ;;  %5074 = vmatprep.subr.bf16.mxu0 %v6560_v35  ;;  %v3246_v44 = vmax.f32 %v3228_v1, 0.0  ;;  %v6615_v30 = vld [vmem:[#allocation6 + $0x3c8] ss:$16 sps:$4 sm:$0xff]   ;;  %v6626_v49 = vld [vmem:[#allocation6 + $0x56c] ss:$16 sps:$4 sm:$0xff]  }
 0x2b1   :  { %v6623_v39 = vld [vmem:[#allocation6 + $0x3ac] ss:$16 sps:$4 sm:$0xff]   ;;  %v6624_v17 = vld [vmem:[#allocation6 + $0x568] ss:$16 sps:$4 sm:$0xff]  }
 0x2b2   :  { %v3247_v4 = vmax.f32 %v3230_v41, 0.0  ;;  %v7160_v54 = vpack.c.bf16 %v3246_v44, %v3238_v59  ;;  %v6621_v35 = vld [vmem:[#allocation6 + $0x3a8] ss:$16 sps:$4 sm:$0xff]   ;;  %v6632_v36 = vld [vmem:[#allocation6 + $0x54c] ss:$16 sps:$4 sm:$0xff]  }
 0x2b3   :  { %5075 = vmatpush1.bf16.msra.mxu0 %v6558_v24  ;;  %v6629_v57 = vld [vmem:[#allocation6 + $0x38c] ss:$16 sps:$4 sm:$0xff]   ;;  %v6630_v37 = vld [vmem:[#allocation6 + $0x548] ss:$16 sps:$4 sm:$0xff]  }
 0x2b4   :  { %v7158_v48 = vpack.c.bf16 %v3247_v4, %v3239_v43  ;;  %5076 = vmatprep.subr.bf16.mxu0 %v6566_v42  ;;  %v6627_v1 = vld [vmem:[#allocation6 + $0x388] ss:$16 sps:$4 sm:$0xff]   ;;  %v6638_v38 = vld [vmem:[#allocation6 + $0x52c] ss:$16 sps:$4 sm:$0xff]  }
 0x2b5   :  { %v6635_v32 = vld [vmem:[#allocation6 + $0x36c] ss:$16 sps:$4 sm:$0xff]   ;;  %v6636_v24 = vld [vmem:[#allocation6 + $0x528] ss:$16 sps:$4 sm:$0xff]  }
 0x2b6   :  { %4975 = vmatprep.mubr.bf16.mxu1 %v7158_v48  ;;  %v6633_v41 = vld [vmem:[#allocation6 + $0x368] ss:$16 sps:$4 sm:$0xff]   ;;  %v6644_v42 = vld [vmem:[#allocation6 + $0x50c] ss:$16 sps:$4 sm:$0xff]  }
 0x2b7   :  { %4976 = vmatmul.mubr.bf16.vlgmr.msra.gmra.mxu1 %v7160_v54  ;;  %5077 = vmatpush1.bf16.msra.mxu0 %v6564_v12  ;;  %v6641_v44 = vld [vmem:[#allocation6 + $0x34c] ss:$16 sps:$4 sm:$0xff]   ;;  %v6642_v43 = vld [vmem:[#allocation6 + $0x508] ss:$16 sps:$4 sm:$0xff]  }
 0x2b8   :  { %5030 = vmatpush1.bf16.msra.mxu1 %v6561_v53  ;;  %5061 = vmatprep.mubr.bf16.mxu1 %v7121_v14  ;;  %v6587_v14 = vld [vmem:[#allocation6 + $0x26c] ss:$16 sps:$4 sm:$0xff]   ;;  %v6639_v4 = vld [vmem:[#allocation6 + $0x348] ss:$16 sps:$4 sm:$0xff]  }
 0x2b9   :  { %5031 = vmatprep.subr.bf16.mxu1 %v6569_v51  ;;  %5078 = vmatprep.subr.bf16.mxu0 %v6572_v28  ;;  %v6699_v59 = vld [vmem:[#allocation9 + $0x78] sm:$0xff]   ;;  %v6645_v51 = vld [vmem:[#allocation6 + $0x328] ss:$16 sps:$4 sm:$0xff]  }
 0x2ba   :  { %v6647_v12 = vld [vmem:[#allocation6 + $0x32c] ss:$16 sps:$4 sm:$0xff]   ;;  %v6701_v28 = vld [vmem:[#allocation9 + $0x70] sm:$0xff]  }
 0x2bb   :  { %5079 = vmatpush1.bf16.msra.mxu0 %v6570_v50  ;;  %v6700_v53 = vld [vmem:[#allocation9 + $0x38] sm:$0xff]  }
 0x2bc   :  { %5032 = vmatpush1.bf16.msra.mxu1 %v6567_v23  ;;  %5080 = vmatprep.subr.bf16.mxu0 %v6578_v58  ;;  %v6650_v50 = vld [vmem:[#allocation6 + $0x30c] ss:$16 sps:$4 sm:$0xff]   ;;  %v6702_v23 = vld [vmem:[#allocation9 + $0x30] sm:$0xff]  }
 0x2bd   :  { %5033 = vmatprep.subr.bf16.mxu1 %v6575_v60  ;;  %v6648_v58 = vld [vmem:[#allocation6 + $0x308] ss:$16 sps:$4 sm:$0xff]   ;;  %v6703_v60 = vld [vmem:[#allocation9 + $0x68] sm:$0xff]  }
 0x2bf   :  { %5081 = vmatpush1.bf16.msra.mxu0 %v6576_v56  ;;  %v6653_v56 = vld [vmem:[#allocation6 + $0x6ec] ss:$16 sps:$4 sm:$0xff]  }
 0x2c0   :  { %5034 = vmatpush1.bf16.msra.mxu1 %v6573_v62  ;;  %5082 = vmatprep.subr.bf16.mxu0 %v6584_v63  ;;  %v6704_v62 = vld [vmem:[#allocation9 + $0x28] sm:$0xff]   ;;  %v6651_v63 = vld [vmem:[#allocation6 + $0x6e8] ss:$16 sps:$4 sm:$0xff]  }
 0x2c1   :  { %5035 = vmatprep.subr.bf16.mxu1 %v6581_v0  ;;  %v6656_v0 = vld [vmem:[#allocation6 + $0x6cc] ss:$16 sps:$4 sm:$0xff]  }
 0x2c3   :  { %5083 = vmatpush1.bf16.msra.mxu0 %v6582_v15  ;;  %v6705_v15 = vld [vmem:[#allocation9 + $0x60] sm:$0xff]  }
 0x2c4   :  { %5036 = vmatpush1.bf16.msra.mxu1 %v6579_v2  ;;  %5084 = vmatprep.subr.bf16.mxu0 %v6590_v22  ;;  %v6654_v2 = vld [vmem:[#allocation6 + $0x6c8] ss:$16 sps:$4 sm:$0xff]   ;;  %v6707_v22 = vld [vmem:[#allocation9 + $0x58] sm:$0xff]  }
 0x2c5   :  { %5037 = vmatprep.subr.bf16.mxu1 %v6587_v14  ;;  %v6659_v14 = vld [vmem:[#allocation6 + $0x6ac] ss:$16 sps:$4 sm:$0xff]  }
 0x2c7   :  { %5085 = vmatpush1.bf16.msra.mxu0 %v6588_v3  ;;  %v6708_v3 = vld [vmem:[#allocation9 + $0x18] sm:$0xff]  }
 0x2c8   :  { %5038 = vmatpush1.bf16.msra.mxu1 %v6585_v5  ;;  %5086 = vmatprep.subr.bf16.mxu0 %v6596_v9  ;;  %v6657_v5 = vld [vmem:[#allocation6 + $0x6a8] ss:$16 sps:$4 sm:$0xff]  }
 0x2c9   :  { %5039 = vmatprep.subr.bf16.mxu1 %v6593_v10  ;;  %v6709_v9 = vld [vmem:[#allocation9 + $0x50] sm:$0xff]   ;;  %v6662_v10 = vld [vmem:[#allocation6 + $0x68c] ss:$16 sps:$4 sm:$0xff]  }
 0x2cb   :  { %5087 = vmatpush1.bf16.msra.mxu0 %v6594_v11  ;;  %v6660_v11 = vld [vmem:[#allocation6 + $0x688] ss:$16 sps:$4 sm:$0xff]  }
 0x2cc   :  { %5040 = vmatpush1.bf16.msra.mxu1 %v6591_v13  ;;  %5088 = vmatprep.subr.bf16.mxu0 %v6602_v16  ;;  %v6711_v13 = vld [vmem:[#allocation9 + $0x48] sm:$0xff]  }
 0x2cd   :  { %5041 = vmatprep.subr.bf16.mxu1 %v6599_v45  ;;  %v6712_v16 = vld [vmem:[#allocation9 + $0x8] sm:$0xff]   ;;  %v6663_v45 = vld [vmem:[#allocation6 + $0x668] ss:$16 sps:$4 sm:$0xff]  }
 0x2cf   :  { %5089 = vmatpush2.bf16.msra.mxu0 %v6600_v34  ;;  %v6713_v34 = vld [vmem:[#allocation9 + $0x40] sm:$0xff]  }
 0x2d0   :  { %5042 = vmatpush1.bf16.msra.mxu1 %v6597_v19  ;;  %5090 = vmatprep.subr.bf16.mxu0 %v6608_v46  ;;  %v6668_v19 = vld [vmem:[#allocation6 + $0x64c] ss:$16 sps:$4 sm:$0xff]   ;;  %v6714_v46 = vld [vmem:[#allocation9] sm:$0xff]  }
 0x2d1   :  { %5043 = vmatprep.subr.bf16.mxu1 %v6605_v8  ;;  %v6666_v8 = vld [vmem:[#allocation6 + $0x648] ss:$16 sps:$4 sm:$0xff]  }
 0x2d3   :  { %5091 = vmatpush2.bf16.msra.mxu0 %v6606_v26  ;;  %v6671_v26 = vld [vmem:[#allocation6 + $0x62c] ss:$16 sps:$4 sm:$0xff]  }
 0x2d4   :  { %5044 = vmatpush1.bf16.msra.mxu1 %v6603_v52  ;;  %5092 = vmatprep.subr.bf16.mxu0 %v6614_v20  ;;  %v6669_v52 = vld [vmem:[#allocation6 + $0x628] ss:$16 sps:$4 sm:$0xff]   ;;  %v6674_v20 = vld [vmem:[#allocation6 + $0x60c] ss:$16 sps:$4 sm:$0xff]  }
 0x2d5   :  { %5045 = vmatprep.subr.bf16.mxu1 %v6611_v21  ;;  %v6672_v21 = vld [vmem:[#allocation6 + $0x608] ss:$16 sps:$4 sm:$0xff]  }
 0x2d7   :  { %5093 = vmatpush2.bf16.msra.mxu0 %v6612_v33  ;;  %v6677_v33 = vld [vmem:[#allocation6 + $0x7ec] ss:$16 sps:$4 sm:$0xff]  }
 0x2d8   :  { %5046 = vmatpush2.bf16.msra.mxu1 %v6609_v25  ;;  %5094 = vmatprep.subr.bf16.mxu0 %v6620_v6  ;;  %v6675_v25 = vld [vmem:[#allocation6 + $0x7e8] ss:$16 sps:$4 sm:$0xff]   ;;  %v6680_v6 = vld [vmem:[#allocation6 + $0x7cc] ss:$16 sps:$4 sm:$0xff]  }
 0x2d9   :  { %5047 = vmatprep.subr.bf16.mxu1 %v6617_v40  ;;  %v6678_v40 = vld [vmem:[#allocation6 + $0x7c8] ss:$16 sps:$4 sm:$0xff]  }
 0x2db   :  { %5095 = vmatpush2.bf16.msra.mxu0 %v6618_v61  ;;  %v6683_v61 = vld [vmem:[#allocation6 + $0x7ac] ss:$16 sps:$4 sm:$0xff]  }
 0x2dc   :  { %5048 = vmatpush2.bf16.msra.mxu1 %v6615_v30  ;;  %5096 = vmatprep.subr.bf16.mxu0 %v6626_v49  ;;  %v6681_v30 = vld [vmem:[#allocation6 + $0x7a8] ss:$16 sps:$4 sm:$0xff]   ;;  %v6686_v49 = vld [vmem:[#allocation6 + $0x78c] ss:$16 sps:$4 sm:$0xff]  }
 0x2dd   :  { %5049 = vmatprep.subr.bf16.mxu1 %v6623_v39  ;;  %v6684_v39 = vld [vmem:[#allocation6 + $0x788] ss:$16 sps:$4 sm:$0xff]  }
 0x2df   :  { %5097 = vmatpush2.bf16.msra.mxu0 %v6624_v17  ;;  %v6689_v17 = vld [vmem:[#allocation6 + $0x76c] ss:$16 sps:$4 sm:$0xff]  }
 0x2e0   :  { %5050 = vmatpush2.bf16.msra.mxu1 %v6621_v35  ;;  %5098 = vmatprep.subr.bf16.mxu0 %v6632_v36  ;;  %v6687_v35 = vld [vmem:[#allocation6 + $0x768] ss:$16 sps:$4 sm:$0xff]   ;;  %v6692_v36 = vld [vmem:[#allocation6 + $0x74c] ss:$16 sps:$4 sm:$0xff]  }
 0x2e1   :  { %5051 = vmatprep.subr.bf16.mxu1 %v6629_v57  ;;  %v6690_v57 = vld [vmem:[#allocation6 + $0x748] ss:$16 sps:$4 sm:$0xff]  }
 0x2e3   :  { %5099 = vmatpush2.bf16.msra.mxu0 %v6630_v37  ;;  %v6695_v37 = vld [vmem:[#allocation6 + $0x72c] ss:$16 sps:$4 sm:$0xff]  }
 0x2e4   :  { %5052 = vmatpush2.bf16.msra.mxu1 %v6627_v1  ;;  %5100 = vmatprep.subr.bf16.mxu0 %v6638_v38  ;;  %v6693_v1 = vld [vmem:[#allocation6 + $0x728] ss:$16 sps:$4 sm:$0xff]   ;;  %v6698_v38 = vld [vmem:[#allocation6 + $0x70c] ss:$16 sps:$4 sm:$0xff]  }
 0x2e5   :  { %5053 = vmatprep.subr.bf16.mxu1 %v6635_v32  ;;  %v6696_v32 = vld [vmem:[#allocation6 + $0x708] ss:$16 sps:$4 sm:$0xff]  }
 0x2e7   :  { %5101 = vmatpush2.bf16.msra.mxu0 %v6636_v24  ;;  %v6715_v24 = vld [vmem:[#allocation9 + $0xf8] sm:$0xff]  }
 0x2e8   :  { %5054 = vmatpush2.bf16.msra.mxu1 %v6633_v41  ;;  %5102 = vmatprep.subr.bf16.mxu0 %v6644_v42  ;;  %v6716_v41 = vld [vmem:[#allocation9 + $0xb8] sm:$0xff]   ;;  %v6717_v42 = vld [vmem:[#allocation9 + $0xf0] sm:$0xff]  }
 0x2e9   :  { %5055 = vmatprep.subr.bf16.mxu1 %v6641_v44  ;;  %v6718_v44 = vld [vmem:[#allocation9 + $0xb0] sm:$0xff]  }
 0x2eb   :  { %5103 = vmatpush2.bf16.msra.mxu0 %v6642_v43  ;;  %v6719_v43 = vld [vmem:[#allocation9 + $0xe8] sm:$0xff]  }
 0x2ec   :  { %5056 = vmatpush2.bf16.msra.mxu1 %v6639_v4  ;;  %6248 = vmatprep.subr.bf16.mxu0 %v6699_v59  ;;  %v6720_v4 = vld [vmem:[#allocation9 + $0xa8] sm:$0xff]   ;;  %v6721_v59 = vld [vmem:[#allocation9 + $0xe0] sm:$0xff]  }
 0x2ed   :  { %5057 = vmatprep.subr.bf16.mxu1 %v6647_v12  ;;  %v6722_v12 = vld [vmem:[#allocation9 + $0xa0] sm:$0xff]  }
 0x2ee   :  { %5105 = vmatmul.mubr.bf16.vlgmr.msra.gmra.mxu0 %v7147_v27  ;;  %v6706_v27 = vld [vmem:[#allocation9 + $0x20] sm:$0xff]  }
 0x2ef   :  { %6249 = vmatpush3.bf16.msra.mxu0 %v6700_v53  ;;  %v6723_v53 = vld [vmem:[#allocation9 + $0xd8] sm:$0xff]  }
 0x2f0   :  { %5058 = vmatpush2.bf16.msra.mxu1 %v6645_v51  ;;  %6250 = vmatprep.subr.bf16.mxu0 %v6701_v28  ;;  %v6724_v51 = vld [vmem:[#allocation9 + $0x98] sm:$0xff]  }
 0x2f1   :  { %5059 = vmatprep.subr.bf16.mxu1 %v6650_v50 }
 0x2f3   :  { %6251 = vmatpush3.bf16.msra.mxu0 %v6702_v23  ;;  %v4891_v23 = vpop.f32.mrf.mxu1 }
 0x2f4   :  { %5060 = vmatpush2.bf16.msra.mxu1 %v6648_v58  ;;  %6252 = vmatprep.subr.bf16.mxu0 %v6703_v60 }
 0x2f5   :  { %5115 = vmatprep.subr.bf16.mxu1 %v6653_v56  ;;  %v4893_v60 = vpop.f32.mrf.mxu1 }
 0x2f7   :  { %5062 = vmatmul.mubr.bf16.vlgmr.msra.gmra.mxu1 %v7132_v31  ;;  %6253 = vmatpush3.bf16.msra.mxu0 %v6704_v62  ;;  %v6710_v31 = vld [vmem:[#allocation9 + $0x10] sm:$0xff]   ;;  %v3512_v62 = vld [vmem:[#allocation7] sm:$0xf] }
 0x2f8   :  { %5116 = vmatpush1.bf16.msra.mxu1 %v6651_v63  ;;  %5147 = vmatprep.mubr.bf16.mxu1 %v7158_v48  ;;  %v6665_v48 = vld [vmem:[#allocation6 + $0x66c] ss:$16 sps:$4 sm:$0xff]   ;;  %v3521_v63 = vrot.slane %v3512_v62, %v511_v47 }
 0x2f9   :  { %5117 = vmatprep.subr.bf16.mxu1 %v6656_v0  ;;  %6254 = vmatprep.subr.bf16.mxu0 %v6705_v15  ;;  %v3517_v0 = vrot.slane %v3512_v62, %v507_v29  ;;  %v4895_v15 = vpop.f32.mrf.mxu1 }
 0x2fb   :  { %6255 = vmatpush3.bf16.msra.mxu0 %v6706_v27 }
 0x2fc   :  { %5118 = vmatpush1.bf16.msra.mxu1 %v6654_v2  ;;  %6256 = vmatprep.subr.bf16.mxu0 %v6707_v22 }
 0x2fd   :  { %5119 = vmatprep.subr.bf16.mxu1 %v6659_v14 }
 0x2ff   :  { %6257 = vmatpush3.bf16.msra.mxu0 %v6708_v3  ;;  %v4897_v3 = vpop.f32.mrf.mxu1 }
 0x300   :  { %5120 = vmatpush1.bf16.msra.mxu1 %v6657_v5  ;;  %6258 = vmatprep.subr.bf16.mxu0 %v6709_v9 }
 0x301   :  { %5121 = vmatprep.subr.bf16.mxu1 %v6662_v10 }
 0x303   :  { %6259 = vmatpush3.bf16.msra.mxu0 %v6710_v31  ;;  %v6725_v31 = vld [vmem:[#allocation9 + $0xd0] sm:$0xff]  }
 0x304   :  { %5122 = vmatpush1.bf16.msra.mxu1 %v6660_v11  ;;  %6260 = vmatprep.subr.bf16.mxu0 %v6711_v13 }
 0x305   :  { %5123 = vmatprep.subr.bf16.mxu1 %v6665_v48  ;;  %v6726_v48 = vld [vmem:[#allocation9 + $0x90] sm:$0xff]  }
 0x307   :  { %6261 = vmatpush3.bf16.msra.mxu0 %v6712_v16 }
 0x308   :  { %5124 = vmatpush1.bf16.msra.mxu1 %v6663_v45  ;;  %6262 = vmatprep.subr.bf16.mxu0 %v6713_v34 }
 0x309   :  { %5125 = vmatprep.subr.bf16.mxu1 %v6668_v19 }
 0x30b   :  { %6263 = vmatpush3.bf16.msra.mxu0 %v6714_v46 }
 0x30c   :  { %5126 = vmatpush1.bf16.msra.mxu1 %v6666_v8 }
 0x30d   :  { %5127 = vmatprep.subr.bf16.mxu1 %v6671_v26  ;;  %v6727_v26 = vld [vmem:[#allocation9 + $0xc8] sm:$0xff]  }
 0x310   :  { %5128 = vmatpush1.bf16.msra.mxu1 %v6669_v52 }
 0x311   :  { %5129 = vmatprep.subr.bf16.mxu1 %v6674_v20 }
 0x314   :  { %5130 = vmatpush1.bf16.msra.mxu1 %v6672_v21 }
 0x315   :  { %5131 = vmatprep.subr.bf16.mxu1 %v6677_v33  ;;  %v6728_v33 = vld [vmem:[#allocation9 + $0x88] sm:$0xff]  }
 0x318   :  { %5132 = vmatpush2.bf16.msra.mxu1 %v6675_v25 }
 0x319   :  { %5133 = vmatprep.subr.bf16.mxu1 %v6680_v6 }
 0x31c   :  { %5134 = vmatpush2.bf16.msra.mxu1 %v6678_v40 }
 0x31d   :  { %5135 = vmatprep.subr.bf16.mxu1 %v6683_v61 }
 0x320   :  { %5136 = vmatpush2.bf16.msra.mxu1 %v6681_v30  ;;  %v6729_v30 = vld [vmem:[#allocation9 + $0xc0] sm:$0xff]  }
 0x321   :  { %5137 = vmatprep.subr.bf16.mxu1 %v6686_v49 }
 0x324   :  { %5138 = vmatpush2.bf16.msra.mxu1 %v6684_v39 }
 0x325   :  { %5139 = vmatprep.subr.bf16.mxu1 %v6689_v17  ;;  %v6730_v17 = vld [vmem:[#allocation9 + $0x80] sm:$0xff]  }
 0x328   :  { %5140 = vmatpush2.bf16.msra.mxu1 %v6687_v35 }
 0x329   :  { %5141 = vmatprep.subr.bf16.mxu1 %v6692_v36 }
 0x32c   :  { %5142 = vmatpush2.bf16.msra.mxu1 %v6690_v57 }
 0x32d   :  { %5143 = vmatprep.subr.bf16.mxu1 %v6695_v37 }
 0x330   :  { %5144 = vmatpush2.bf16.msra.mxu1 %v6693_v1 }
 0x331   :  { %5145 = vmatprep.subr.bf16.mxu1 %v6698_v38 }
 0x334   :  { %5146 = vmatpush2.bf16.msra.mxu1 %v6696_v32 }
 0x335   :  { %6270 = vmatprep.subr.bf16.mxu1 %v6715_v24 }
 0x337   :  { %5148 = vmatmul.mubr.bf16.vlgmr.msra.gmra.mxu1 %v7160_v54  ;;  %v4848_v54 = vpop.f32.mrf.mxu0 }
 0x338   :  { %6271 = vmatpush3.bf16.msra.mxu1 %v6716_v41  ;;  %v4849_v14 = vadd.f32 %v4848_v54, %v3517_v0 }
 0x339   :  { %6272 = vmatprep.subr.bf16.mxu1 %v6717_v42  ;;  %v4850_v28 = vpop.f32.mrf.mxu0 }
 0x33a   :  { %v4851_v2 = vadd.f32 %v4850_v28, %v3521_v63  ;;  %v4892_v16 = vadd.f32 %v4891_v23, %v4849_v14 }
 0x33b   :  { %v4852_v50 = vpop.f32.mrf.mxu0 }
 0x33c   :  { %6273 = vmatpush3.bf16.msra.mxu1 %v6718_v44  ;;  %v4853_v22 = vadd.f32 %v4852_v50, %v3517_v0  ;;  %v4894_v11 = vadd.f32 %v4893_v60, %v4851_v2  ;;  %v3529_v44 = vrot.slane %v3512_v62, %v519_v7 }
 0x33d   :  { %6274 = vmatprep.subr.bf16.mxu1 %v6719_v43  ;;  %v4854_v58 = vpop.f32.mrf.mxu0  ;;  %v3525_v43 = vrot.slane %v3512_v62, %v515_v55 }
 0x33e   :  { %v4855_v9 = vadd.f32 %v4854_v58, %v3521_v63  ;;  %v4896_v13 = vadd.f32 %v4895_v15, %v4853_v22 }
 0x33f   :  { %v4934_v56 = vpop.f32.mrf.mxu0 }
 0x340   :  { %6275 = vmatpush3.bf16.msra.mxu1 %v6720_v4  ;;  %v4898_v47 = vadd.f32 %v4897_v3, %v4855_v9  ;;  %v4935_v46 = vadd.f32 %v4934_v56, %v4892_v16 }
 0x341   :  { %6276 = vmatprep.subr.bf16.mxu1 %v6721_v59  ;;  %v4936_v27 = vpop.f32.mrf.mxu0 }
 0x342   :  { %v4937_v19 = vadd.f32 %v4936_v27, %v4894_v11 }
 0x343   :  { %v4938_v5 = vpop.f32.mrf.mxu0 }
 0x344   :  { %6277 = vmatpush3.bf16.msra.mxu1 %v6722_v12  ;;  %v4939_v29 = vadd.f32 %v4938_v5, %v4896_v13 }
 0x345   :  { %6278 = vmatprep.subr.bf16.mxu1 %v6723_v53  ;;  %v4940_v45 = vpop.f32.mrf.mxu0 }
 0x346   :  { %v4941_v52 = vadd.f32 %v4940_v45, %v4898_v47 }
 0x348   :  { %6279 = vmatpush3.bf16.msra.mxu1 %v6724_v51 }
 0x349   :  { %6280 = vmatprep.subr.bf16.mxu1 %v6725_v31 }
 0x34c   :  { %6281 = vmatpush3.bf16.msra.mxu1 %v6726_v48 }
 0x34d   :  { %6282 = vmatprep.subr.bf16.mxu1 %v6727_v26 }
 0x350   :  { %6283 = vmatpush3.bf16.msra.mxu1 %v6728_v33 }
 0x351   :  { %6284 = vmatprep.subr.bf16.mxu1 %v6729_v30 }
 0x354   :  { %6285 = vmatpush3.bf16.msra.mxu1 %v6730_v17 }
 0x36e   :  { %v5020_v37 = vpop.f32.mrf.mxu0 }
 0x36f   :  { %v5021_v51 = vadd.f32 %v5020_v37, %v3525_v43 }
 0x370   :  { %v5022_v1 = vpop.f32.mrf.mxu0 }
 0x371   :  { %v5023_v12 = vadd.f32 %v5022_v1, %v3529_v44 }
 0x372   :  { %v5024_v38 = vpop.f32.mrf.mxu0 }
 0x373   :  { %v5025_v53 = vadd.f32 %v5024_v38, %v3525_v43 }
 0x374   :  { %v5026_v24 = vpop.f32.mrf.mxu0 }
 0x375   :  { %v5027_v28 = vadd.f32 %v5026_v24, %v3529_v44 }
 0x377   :  { %v4977_v10 = vpop.f32.mrf.mxu1 }
 0x378   :  { %v4978_v25 = vadd.f32 %v4977_v10, %v4935_v46 }
 0x379   :  { %v4979_v34 = vpop.f32.mrf.mxu1 }
 0x37a   :  { %v4980_v20 = vadd.f32 %v4979_v34, %v4937_v19  ;;  %v5158_v35 = vmax.f32 %v4978_v25, 0.0  ;;  %v6204_v19 = vld [vmem:[#allocation10] ss:$0 sm:$0xff] }
 0x37b   :  { %v4981_v8 = vpop.f32.mrf.mxu1 }
 0x37c   :  { %v4982_v21 = vadd.f32 %v4981_v8, %v4939_v29  ;;  %v5159_v49 = vmax.f32 %v4980_v20, 0.0 }
 0x37d   :  { %v4983_v6 = vpop.f32.mrf.mxu1 }
 0x37e   :  { %v4984_v40 = vadd.f32 %v4983_v6, %v4941_v52  ;;  %v5162_v61 = vmax.f32 %v4982_v21, 0.0 }
 0x380   :  { %v5163_v39 = vmax.f32 %v4984_v40, 0.0  ;;  %v5166_v57 = vpack.c.bf16 %v5162_v61, %v5158_v35 }
 0x382   :  { %v5167_v36 = vpack.c.bf16 %v5163_v39, %v5159_v49 }
 0x384   :  { %5465 = vmatprep.mubr.bf16.mxu0 %v5167_v36 }
 0x385   :  { %5466 = vmatmul.mubr.bf16.vlgmr.msra.gmra.mxu0 %v5166_v57 }
 0x3ae   :  { %v5106_v42 = vpop.f32.mrf.mxu0 }
 0x3b0   :  { %v5108_v59 = vpop.f32.mrf.mxu0 }
 0x3b2   :  { %v5110_v58 = vpop.f32.mrf.mxu0 }
 0x3b4   :  { %v5112_v7 = vpop.f32.mrf.mxu0 }
 0x3b7   :  { %v5063_v32 = vpop.f32.mrf.mxu1 }
 0x3b8   :  { %v5064_v60 = vadd.f32 %v5063_v32, %v5021_v51 }
 0x3b9   :  { %v5065_v41 = vpop.f32.mrf.mxu1 }
 0x3ba   :  { %v5066_v50 = vadd.f32 %v5065_v41, %v5023_v12  ;;  %v5107_v2 = vadd.f32 %v5106_v42, %v5064_v60 }
 0x3bb   :  { %v5067_v4 = vpop.f32.mrf.mxu1 }
 0x3bc   :  { %v5068_v23 = vadd.f32 %v5067_v4, %v5025_v53  ;;  %v5109_v15 = vadd.f32 %v5108_v59, %v5066_v50 }
 0x3bd   :  { %v5069_v54 = vpop.f32.mrf.mxu1 }
 0x3be   :  { %v5070_v63 = vadd.f32 %v5069_v54, %v5027_v28  ;;  %v5111_v27 = vadd.f32 %v5110_v58, %v5068_v23 }
 0x3c0   :  { %v5113_v22 = vadd.f32 %v5112_v7, %v5070_v63 }
 0x3f7   :  { %v5149_v56 = vpop.f32.mrf.mxu1 }
 0x3f8   :  { %v5150_v14 = vadd.f32 %v5149_v56, %v5107_v2 }
 0x3f9   :  { %v5151_v0 = vpop.f32.mrf.mxu1 }
 0x3fa   :  { %v5152_v55 = vadd.f32 %v5151_v0, %v5109_v15  ;;  %v5160_v11 = vmax.f32 %v5150_v14, 0.0 }
 0x3fb   :  { %v5153_v18 = vpop.f32.mrf.mxu1 }
 0x3fc   :  { %v5154_v62 = vadd.f32 %v5153_v18, %v5111_v27  ;;  %v5161_v10 = vmax.f32 %v5152_v55, 0.0 }
 0x3fd   :  { %v5155_v3 = vpop.f32.mrf.mxu1 }
 0x3fe   :  { %v5156_v5 = vadd.f32 %v5155_v3, %v5113_v22  ;;  %v5164_v9 = vmax.f32 %v5154_v62, 0.0 }
 0x400   :  { %v5165_v31 = vmax.f32 %v5156_v5, 0.0  ;;  %v5168_v48 = vpack.c.bf16 %v5164_v9, %v5160_v11 }
 0x402   :  { %v5169_v13 = vpack.c.bf16 %v5165_v31, %v5161_v10 }
 0x404   :  { %5506 = vmatprep.mubr.bf16.mxu1 %v5169_v13 }
 0x405   :  { %5507 = vmatmul.mubr.bf16.vlgmr.msra.gmra.mxu1 %v5168_v48 }
 0x445   :  { %v6264_v16 = vpop.f32.mrf.mxu0 }
 0x447   :  { %v6265_v45 = vpop.f32.mrf.mxu0 }
 0x448   :  { %v6266_v47 = vadd.f32 %v6265_v45, %v6264_v16 }
 0x449   :  { %v6267_v34 = vpop.f32.mrf.mxu0 }
 0x44a   :  { %v5468_v26 = vadd.f32 %v6266_v47, %v6204_v19 }
 0x44b   :  { %v6268_v29 = vpop.f32.mrf.mxu0 }
 0x44c   :  { %v6269_v52 = vadd.f32 %v6268_v29, %v6267_v34 }
 0x44e   :  { %v5471_v6 = vadd.f32 %v6269_v52, %v6204_v19 }
 0x4c5   :  { %v6286_v46 = vpop.f32.mrf.mxu1 }
 0x4c7   :  { %v6287_v8 = vpop.f32.mrf.mxu1 }
 0x4c8   :  { %v6288_v20 = vadd.f32 %v6287_v8, %v6286_v46 }
 0x4c9   :  { %v6289_v21 = vpop.f32.mrf.mxu1 }
 0x4ca   :  { %v5509_v33 = vadd.f32 %v6288_v20, %v5468_v26 }
 0x4cb   :  { %v6290_v25 = vpop.f32.mrf.mxu1 }
 0x4cc   :  { %v6237_v40 = vmul.f32 -1.442695, %v5509_v33  ;;  %v6291_v61 = vadd.f32 %v6290_v25, %v6289_v21 }
 0x4ce   :  { %6731 = vpow2.f32 %v6237_v40  ;;  %v5512_v30 = vadd.f32 %v6291_v61, %v5471_v6 }
 0x4d0   :  { %v6238_v49 = vmul.f32 -1.442695, %v5512_v30 }
 0x4d2   :  { %6733 = vpow2.f32 %v6238_v49 }
 0x4db   :  { %v6732_v39 = vpop.eup %6731 }
 0x4dc   :  { %v5521_v17 = vadd.f32 1.0, %v6732_v39 }
 0x4de   :  { %6735 = vrcp.f32 %v5521_v17 }
 0x4df   :  { %v6734_v35 = vpop.eup %6733 }
 0x4e0   :  { %v5522_v36 = vadd.f32 1.0, %v6734_v35 }
 0x4e2   :  { %6737 = vrcp.f32 %v5522_v36 }
 0x4eb   :  { %v6736_v57 = vpop.eup %6735 }
 0x4ef   :  { %v6738_v37 = vpop.eup %6737 }
 0x4f0   :  { %v6246_v1 = vpack.c.bf16 %v6738_v37, %v6736_v57 }
 0x4f2   :  { %6247 = vst [vmem:[%s7187_s7] sm:$0xff] %v6246_v1  }
 0x4f3   :  { %5541 = vsyncpa [#allocation3], 1 }
 0x4f4   :  { %5542 = vsyncpa [#allocation5], 1 }
 0x4f5   :  { %5543 = vsyncpa [#allocation8], 1 }
 0x4f6   :  { %5544 = vsyncpa [#allocation11], 1 }

</bundles_post_ra>
